<compile_context>
chip_gen: v5e
topology: v5e:2x2
jax: 0.10.0
libtpu: 0.0.40
codegen_flags: <defaults>
</compile_context>

<pallas_src>
import jax
import jax.numpy as jnp
from jax import lax
from jax.experimental import pallas as pl
from jax.experimental.pallas import tpu as pltpu


SLOT = 128                       # lanes reserved per batch element (>= OFF0 + L + 1)
OFF0 = 12                        # slot offset of the input samples (>= sum of conv pads)
PADS = (1, 1, 1, 3, 2, 2, 1)     # effective conv paddings, execution order
OFF_END = OFF0 - sum(PADS)       # slot offset of the final valid output samples (= 1)
_TAIL = 8                        # zero columns appended before taking shifted tap views


# --------------------------------- kernel ----------------------------------
def _make_kernel(TB, L):
    W = TB * SLOT

    def kernel(x_ref,
               w1, b1, w2, b2, w3, b3,
               u1, c1, u2, c2, u3, c3, u4, c4,
               o_ref):
        # LeakyReLU(negative_slope=1) == identity; Dropout == identity at inference.
        pos = lax.broadcasted_iota(jnp.int32, (1, W), 1) & (SLOT - 1)   # lane-in-slot

        def mask(h, off, ln):
            keep = (pos >= off) & (pos < off + ln)
            return jnp.where(keep, h, 0.0)

        def tails(h):
            ci = h.shape[0]
            return jnp.concatenate([h, jnp.zeros((ci, _TAIL), jnp.float32)], axis=1)

        def conv(h, w_ref, b_ref, K, p, off, ln):
            """Stride-1 Conv1d over every 128-lane slot: ONE fused MXU matmul."""
            # TODO(synk): on v7x the MRB makes K per-tap accumulating matmuls (no
            # im2col materialization) attractive; kept fused for v5e/v6e's MRF.
            he = tails(h)
            im = jnp.concatenate([he[:, k:k + W] for k in range(K)], axis=0)
            y = jnp.dot(w_ref[...], im, preferred_element_type=jnp.float32)
            y = y + b_ref[...]                                  # (C_out, 1) broadcast
            off, ln = off - p, ln + 2 * p - K + 1
            return mask(y, off, ln), off, ln

        def pool3(h, off, ln):                                  # MaxPool1d(3, stride=1)
            he = tails(h)
            y = jnp.maximum(jnp.maximum(h, he[:, 1:W + 1]), he[:, 2:W + 2])
            return mask(y, off, ln - 2), off, ln - 2

        h = x_ref[0]                        # (1, W): C_in = 1, 128-lane slots
        off, ln = OFF0, L
        # ---- encoder ----
        h, off, ln = conv(h, w1, b1, 3, 1, off, ln)     # (64,  W)
        h, off, ln = pool3(h, off, ln)
        h, off, ln = conv(h, w2, b2, 3, 1, off, ln)     # (32,  W)
        h, off, ln = pool3(h, off, ln)
        h, off, ln = conv(h, w3, b3, 3, 1, off, ln)     # (16,  W)
        # ---- decoder (ConvTranspose1d rewritten as Conv1d in the wrapper) ----
        h, off, ln = conv(h, u1, c1, 5, 3, off, ln)     # (32,  W)
        h, off, ln = conv(h, u2, c2, 4, 2, off, ln)     # (64,  W)
        h, off, ln = conv(h, u3, c3, 4, 2, off, ln)     # (128, W)
        h, off, ln = conv(h, u4, c4, 3, 1, off, ln)     # (1,   W)
        o_ref[0] = h                        # lane-dense (1, W) store

    return kernel


# -------------------------------- wrapper -----------------------------------
def _vmem_limit_bytes():
    cap = 64 << 20                               # conservative default (v7x: 64 MiB/TC)
    try:
        cap = int(getattr(pltpu.get_tpu_info(), "vmem_capacity_bytes", cap))
    except Exception:
        pass
    return int(min(cap * 3 // 4, 112 << 20))     # ~48 MiB on v7x, ~96 MiB on v5e/v6e


def denoise_forward(x_ncl, params, block_b=64):
    """x_ncl: (N, 1, L) float32 in PyTorch NCL layout -> (N, 1, L)."""
    N, C, L = x_ncl.shape
    assert C == 1, "DenoiseCNN expects a single input channel"
    assert 8 <= L <= SLOT - OFF0 - 1, "sequence must fit inside one 128-lane slot"

    vmem_limit = _vmem_limit_bytes()
    per_elem = 512 * 1024        # ~peak live activation bytes per batch element (d3/d4)
    tb_cap = max(8, ((vmem_limit // 2) // per_elem) // 8 * 8)
    TB = max(1, min(block_b, N, tb_cap))
    if N >= 16:                  # >=2 grid blocks so both v7x TensorCores get work
        half = ((N + 1) // 2 + 7) // 8 * 8
        TB = min(TB, max(8, half))
    n_blocks = -(-N // TB)
    N_pad = n_blocks * TB
    W = TB * SLOT

    # Lay every batch element into its own 128-lane slot (zeros elsewhere).
    x2 = x_ncl.astype(jnp.float32).reshape(N, L)
    x_slot = jnp.pad(x2, ((0, N_pad - N), (OFF0, SLOT - OFF0 - L)))
    x_slot = x_slot.reshape(n_blocks, 1, W)

    def conv_w(w):       # Conv1d weight (C_out, C_in, K) -> (C_out, K*C_in)
        Co, Ci, K = w.shape
        return jnp.transpose(w, (0, 2, 1)).reshape(Co, K * Ci).astype(jnp.float32)

    def convT_w(w):      # ConvT1d weight (C_in, C_out, K) -> flipped/swapped (C_out, K*C_in)
        Ci, Co, K = w.shape
        return jnp.transpose(w[:, :, ::-1], (1, 2, 0)).reshape(Co, K * Ci).astype(jnp.float32)

    def bias(b):
        return b.reshape(-1, 1).astype(jnp.float32)

    # TODO(synk): the 14 small weight/bias operands could be packed into 1-2 flat
    # arrays to shave DMA-descriptor / double-buffer overhead at tiny N.
    args = [
        conv_w(params['w1']), bias(params['b1']),
        conv_w(params['w2']), bias(params['b2']),
        conv_w(params['w3']), bias(params['b3']),
        convT_w(params['dw1']), bias(params['db1']),
        convT_w(params['dw2']), bias(params['db2']),
        convT_w(params['dw3']), bias(params['db3']),
        convT_w(params['dw4']), bias(params['db4']),   # (1, 384) row, not a 1-lane column
    ]

    def const_spec(a):
        return pl.BlockSpec(a.shape, lambda n: (0, 0))

    in_specs = ([pl.BlockSpec((1, 1, W), lambda n: (n, 0, 0))]
                + [const_spec(a) for a in args])
    out_specs = pl.BlockSpec((1, 1, W), lambda n: (n, 0, 0))

    out = pl.pallas_call(
        _make_kernel(TB, L),
        out_shape=jax.ShapeDtypeStruct((n_blocks, 1, W), jnp.float32),
        grid_spec=pltpu.PrefetchScalarGridSpec(
            num_scalar_prefetch=0,
            grid=(n_blocks,),
            in_specs=in_specs,
            out_specs=out_specs,
        ),
        compiler_params=pltpu.CompilerParams(
            dimension_semantics=("parallel",),   # batch blocks independent
            vmem_limit_bytes=vmem_limit,
        ),
    )(x_slot, *args)

    out = out.reshape(N_pad, SLOT)[:N, OFF_END:OFF_END + L]
    return out[:, None, :]


# ---------------------------- pure-JAX reference ----------------------------
def ref_forward(x, p):
    def conv(h, w, b, pad):
        y = lax.conv_general_dilated(h, w, (1,), [(pad, pad)],
                                     dimension_numbers=('NCH', 'OIH', 'NCH'))
        return y + b[None, :, None]

    def convT(h, w, b, pad):                 # stride-1 ConvTranspose1d
        K = w.shape[2]
        w_eff = jnp.transpose(w[:, :, ::-1], (1, 0, 2))   # (C_out, C_in, K)
        return conv(h, w_eff, b, K - 1 - pad)

    def maxpool3(h):
        return lax.reduce_window(h, -jnp.inf, lax.max, (1, 1, 3), (1, 1, 1), 'VALID')

    h = conv(x, p['w1'], p['b1'], 1)
    h = maxpool3(h)
    h = conv(h, p['w2'], p['b2'], 1)
    h = maxpool3(h)
    h = conv(h, p['w3'], p['b3'], 1)
    h = convT(h, p['dw1'], p['db1'], 1)
    h = convT(h, p['dw2'], p['db2'], 1)
    h = convT(h, p['dw3'], p['db3'], 1)
    h = convT(h, p['dw4'], p['db4'], 1)
    return h


# ------------------------------ params & main -------------------------------
def init_params(key):
    shapes = {
        'w1': (64, 1, 3), 'b1': (64,),
        'w2': (32, 64, 3), 'b2': (32,),
        'w3': (16, 32, 3), 'b3': (16,),
        'dw1': (16, 32, 5), 'db1': (32,),
        'dw2': (32, 64, 4), 'db2': (64,),
        'dw3': (64, 128, 4), 'db3': (128,),
        'dw4': (128, 1, 3), 'db4': (1,),
    }
    names = sorted(shapes)
    keys = jax.random.split(key, len(names))
    return {n: 0.1 * jax.random.normal(k, shapes[n], jnp.float32)
            for n, k in zip(names, keys)}


if __name__ == "__main__":
    key = jax.random.PRNGKey(0)
    pkey, xkey = jax.random.split(key)
    params = init_params(pkey)

    N, L = 2, 64
    x = jax.random.normal(xkey, (N, 1, L), jnp.float32)   # PyTorch (N, C=1, L)

    y = denoise_forward(x, params)
    y = jax.block_until_ready(y)
    assert y.shape == (N, 1, L), y.shape

    y_ref = ref_forward(x, params)
    err = float(jnp.max(jnp.abs(y - y_ref)))
    assert jnp.allclose(y, y_ref, rtol=1e-4, atol=1e-4), err

    print("KERNEL_OK")
</pallas_src>

<mosaic_0001>
module attributes {stable_mosaic.version = 11 : i64} {
  func.func @kernel(%arg0: i32, %arg1: memref<1x1x256xf32, #tpu.memory_space<vmem>>, %arg2: memref<64x3xf32, #tpu.memory_space<vmem>>, %arg3: memref<64x1xf32, #tpu.memory_space<vmem>>, %arg4: memref<32x192xf32, #tpu.memory_space<vmem>>, %arg5: memref<32x1xf32, #tpu.memory_space<vmem>>, %arg6: memref<16x96xf32, #tpu.memory_space<vmem>>, %arg7: memref<16x1xf32, #tpu.memory_space<vmem>>, %arg8: memref<32x80xf32, #tpu.memory_space<vmem>>, %arg9: memref<32x1xf32, #tpu.memory_space<vmem>>, %arg10: memref<64x128xf32, #tpu.memory_space<vmem>>, %arg11: memref<64x1xf32, #tpu.memory_space<vmem>>, %arg12: memref<128x256xf32, #tpu.memory_space<vmem>>, %arg13: memref<128x1xf32, #tpu.memory_space<vmem>>, %arg14: memref<1x384xf32, #tpu.memory_space<vmem>>, %arg15: memref<1x1xf32, #tpu.memory_space<vmem>>, %arg16: memref<1x1x256xf32, #tpu.memory_space<vmem>>) attributes {dimension_semantics = [#tpu.dimension_semantics<parallel>], iteration_bounds = array<i64: 1>, scalar_prefetch = 0 : i64, scratch_operands = 0 : i64, tpu.core_type = #tpu.core_type<tc>, window_params = [{transform_indices = @transform_0, window_bounds = array<i64: 1, 1, 256>}, {pipeline_mode = #tpu.pipeline_mode<synchronous>, transform_indices = @transform_1, window_bounds = array<i64: 64, 3>}, {pipeline_mode = #tpu.pipeline_mode<synchronous>, transform_indices = @transform_2, window_bounds = array<i64: 64, 1>}, {pipeline_mode = #tpu.pipeline_mode<synchronous>, transform_indices = @transform_3, window_bounds = array<i64: 32, 192>}, {pipeline_mode = #tpu.pipeline_mode<synchronous>, transform_indices = @transform_4, window_bounds = array<i64: 32, 1>}, {pipeline_mode = #tpu.pipeline_mode<synchronous>, transform_indices = @transform_5, window_bounds = array<i64: 16, 96>}, {pipeline_mode = #tpu.pipeline_mode<synchronous>, transform_indices = @transform_6, window_bounds = array<i64: 16, 1>}, {pipeline_mode = #tpu.pipeline_mode<synchronous>, transform_indices = @transform_7, window_bounds = array<i64: 32, 80>}, {pipeline_mode = #tpu.pipeline_mode<synchronous>, transform_indices = @transform_8, window_bounds = array<i64: 32, 1>}, {pipeline_mode = #tpu.pipeline_mode<synchronous>, transform_indices = @transform_9, window_bounds = array<i64: 64, 128>}, {pipeline_mode = #tpu.pipeline_mode<synchronous>, transform_indices = @transform_10, window_bounds = array<i64: 64, 1>}, {pipeline_mode = #tpu.pipeline_mode<synchronous>, transform_indices = @transform_11, window_bounds = array<i64: 128, 256>}, {pipeline_mode = #tpu.pipeline_mode<synchronous>, transform_indices = @transform_12, window_bounds = array<i64: 128, 1>}, {pipeline_mode = #tpu.pipeline_mode<synchronous>, transform_indices = @transform_13, window_bounds = array<i64: 1, 384>}, {pipeline_mode = #tpu.pipeline_mode<synchronous>, transform_indices = @transform_14, window_bounds = array<i64: 1, 1>}, {transform_indices = @transform_15, window_bounds = array<i64: 1, 1, 256>}]} {
    %0 = tpu.iota {dimensions = array<i32: 1>} : vector<1x256xi32>
    %c127_i32 = arith.constant 127 : i32
    %1 = vector.broadcast %c127_i32 : i32 to vector<1x256xi32>
    %2 = arith.andi %0, %1 : vector<1x256xi32>
    %c0 = arith.constant 0 : index
    %c0_0 = arith.constant 0 : index
    %c0_1 = arith.constant 0 : index
    %3 = vector.load %arg1[%c0, %c0_0, %c0_1] : memref<1x1x256xf32, #tpu.memory_space<vmem>>, vector<1x1x256xf32>
    %4 = vector.shape_cast %3 : vector<1x1x256xf32> to vector<1x256xf32>
    %cst = arith.constant 0.000000e+00 : f32
    %5 = vector.broadcast %cst : f32 to vector<1x8xf32>
    %6 = tpu.concatenate %4, %5 in 1 : vector<1x256xf32>, vector<1x8xf32> -> vector<1x264xf32>
    %7 = vector.extract_strided_slice %6 {offsets = [0, 0], sizes = [1, 256], strides = [1, 1]} : vector<1x264xf32> to vector<1x256xf32>
    %8 = vector.extract_strided_slice %6 {offsets = [0, 1], sizes = [1, 256], strides = [1, 1]} : vector<1x264xf32> to vector<1x256xf32>
    %9 = vector.extract_strided_slice %6 {offsets = [0, 2], sizes = [1, 256], strides = [1, 1]} : vector<1x264xf32> to vector<1x256xf32>
    %10 = tpu.concatenate %7, %8, %9 in 0 : vector<1x256xf32>, vector<1x256xf32>, vector<1x256xf32> -> vector<3x256xf32>
    %c0_2 = arith.constant 0 : index
    %c0_3 = arith.constant 0 : index
    %11 = vector.load %arg2[%c0_2, %c0_3] : memref<64x3xf32, #tpu.memory_space<vmem>>, vector<64x3xf32>
    %cst_4 = arith.constant dense<0.000000e+00> : vector<64x256xf32>
    %12 = tpu.matmul %11, %10, %cst_4 {dimension_numbers = #tpu.dot_dimension_numbers<[1], [0], [0], [1], [0, 0, 1, 1], [], []>} : vector<64x3xf32>, vector<3x256xf32>, vector<64x256xf32> -> vector<64x256xf32>
    %c0_5 = arith.constant 0 : index
    %c0_6 = arith.constant 0 : index
    %13 = vector.load %arg3[%c0_5, %c0_6] : memref<64x1xf32, #tpu.memory_space<vmem>>, vector<64x1xf32>
    %14 = vector.broadcast %13 : vector<64x1xf32> to vector<64x256xf32>
    %15 = arith.addf %12, %14 : vector<64x256xf32>
    %c11_i32 = arith.constant 11 : i32
    %16 = vector.broadcast %c11_i32 : i32 to vector<1x256xi32>
    %17 = arith.cmpi sge, %2, %16 : vector<1x256xi32>
    %c75_i32 = arith.constant 75 : i32
    %18 = vector.broadcast %c75_i32 : i32 to vector<1x256xi32>
    %19 = arith.cmpi slt, %2, %18 : vector<1x256xi32>
    %20 = arith.andi %17, %19 : vector<1x256xi1>
    %cst_7 = arith.constant 0.000000e+00 : f32
    %21 = vector.shape_cast %20 : vector<1x256xi1> to vector<1x256xi1>
    %22 = vector.broadcast %21 : vector<1x256xi1> to vector<64x256xi1>
    %23 = vector.broadcast %cst_7 : f32 to vector<64x256xf32>
    %24 = arith.select %22, %15, %23 : vector<64x256xi1>, vector<64x256xf32>
    %cst_8 = arith.constant 0.000000e+00 : f32
    %25 = vector.broadcast %cst_8 : f32 to vector<64x8xf32>
    %26 = tpu.concatenate %24, %25 in 1 : vector<64x256xf32>, vector<64x8xf32> -> vector<64x264xf32>
    %27 = vector.extract_strided_slice %26 {offsets = [0, 1], sizes = [64, 256], strides = [1, 1]} : vector<64x264xf32> to vector<64x256xf32>
    %28 = arith.maximumf %24, %27 : vector<64x256xf32>
    %29 = vector.extract_strided_slice %26 {offsets = [0, 2], sizes = [64, 256], strides = [1, 1]} : vector<64x264xf32> to vector<64x256xf32>
    %30 = arith.maximumf %28, %29 : vector<64x256xf32>
    %c11_i32_9 = arith.constant 11 : i32
    %31 = vector.broadcast %c11_i32_9 : i32 to vector<1x256xi32>
    %32 = arith.cmpi sge, %2, %31 : vector<1x256xi32>
    %c73_i32 = arith.constant 73 : i32
    %33 = vector.broadcast %c73_i32 : i32 to vector<1x256xi32>
    %34 = arith.cmpi slt, %2, %33 : vector<1x256xi32>
    %35 = arith.andi %32, %34 : vector<1x256xi1>
    %cst_10 = arith.constant 0.000000e+00 : f32
    %36 = vector.shape_cast %35 : vector<1x256xi1> to vector<1x256xi1>
    %37 = vector.broadcast %36 : vector<1x256xi1> to vector<64x256xi1>
    %38 = vector.broadcast %cst_10 : f32 to vector<64x256xf32>
    %39 = arith.select %37, %30, %38 : vector<64x256xi1>, vector<64x256xf32>
    %cst_11 = arith.constant 0.000000e+00 : f32
    %40 = vector.broadcast %cst_11 : f32 to vector<64x8xf32>
    %41 = tpu.concatenate %39, %40 in 1 : vector<64x256xf32>, vector<64x8xf32> -> vector<64x264xf32>
    %42 = vector.extract_strided_slice %41 {offsets = [0, 0], sizes = [64, 256], strides = [1, 1]} : vector<64x264xf32> to vector<64x256xf32>
    %43 = vector.extract_strided_slice %41 {offsets = [0, 1], sizes = [64, 256], strides = [1, 1]} : vector<64x264xf32> to vector<64x256xf32>
    %44 = vector.extract_strided_slice %41 {offsets = [0, 2], sizes = [64, 256], strides = [1, 1]} : vector<64x264xf32> to vector<64x256xf32>
    %45 = tpu.concatenate %42, %43, %44 in 0 : vector<64x256xf32>, vector<64x256xf32>, vector<64x256xf32> -> vector<192x256xf32>
    %c0_12 = arith.constant 0 : index
    %c0_13 = arith.constant 0 : index
    %46 = vector.load %arg4[%c0_12, %c0_13] : memref<32x192xf32, #tpu.memory_space<vmem>>, vector<32x192xf32>
    %cst_14 = arith.constant dense<0.000000e+00> : vector<32x256xf32>
    %47 = tpu.matmul %46, %45, %cst_14 {dimension_numbers = #tpu.dot_dimension_numbers<[1], [0], [0], [1], [0, 0, 1, 1], [], []>} : vector<32x192xf32>, vector<192x256xf32>, vector<32x256xf32> -> vector<32x256xf32>
    %c0_15 = arith.constant 0 : index
    %c0_16 = arith.constant 0 : index
    %48 = vector.load %arg5[%c0_15, %c0_16] : memref<32x1xf32, #tpu.memory_space<vmem>>, vector<32x1xf32>
    %49 = vector.broadcast %48 : vector<32x1xf32> to vector<32x256xf32>
    %50 = arith.addf %47, %49 : vector<32x256xf32>
    %c10_i32 = arith.constant 10 : i32
    %51 = vector.broadcast %c10_i32 : i32 to vector<1x256xi32>
    %52 = arith.cmpi sge, %2, %51 : vector<1x256xi32>
    %c72_i32 = arith.constant 72 : i32
    %53 = vector.broadcast %c72_i32 : i32 to vector<1x256xi32>
    %54 = arith.cmpi slt, %2, %53 : vector<1x256xi32>
    %55 = arith.andi %52, %54 : vector<1x256xi1>
    %cst_17 = arith.constant 0.000000e+00 : f32
    %56 = vector.shape_cast %55 : vector<1x256xi1> to vector<1x256xi1>
    %57 = vector.broadcast %56 : vector<1x256xi1> to vector<32x256xi1>
    %58 = vector.broadcast %cst_17 : f32 to vector<32x256xf32>
    %59 = arith.select %57, %50, %58 : vector<32x256xi1>, vector<32x256xf32>
    %cst_18 = arith.constant 0.000000e+00 : f32
    %60 = vector.broadcast %cst_18 : f32 to vector<32x8xf32>
    %61 = tpu.concatenate %59, %60 in 1 : vector<32x256xf32>, vector<32x8xf32> -> vector<32x264xf32>
    %62 = vector.extract_strided_slice %61 {offsets = [0, 1], sizes = [32, 256], strides = [1, 1]} : vector<32x264xf32> to vector<32x256xf32>
    %63 = arith.maximumf %59, %62 : vector<32x256xf32>
    %64 = vector.extract_strided_slice %61 {offsets = [0, 2], sizes = [32, 256], strides = [1, 1]} : vector<32x264xf32> to vector<32x256xf32>
    %65 = arith.maximumf %63, %64 : vector<32x256xf32>
    %c10_i32_19 = arith.constant 10 : i32
    %66 = vector.broadcast %c10_i32_19 : i32 to vector<1x256xi32>
    %67 = arith.cmpi sge, %2, %66 : vector<1x256xi32>
    %c70_i32 = arith.constant 70 : i32
    %68 = vector.broadcast %c70_i32 : i32 to vector<1x256xi32>
    %69 = arith.cmpi slt, %2, %68 : vector<1x256xi32>
    %70 = arith.andi %67, %69 : vector<1x256xi1>
    %cst_20 = arith.constant 0.000000e+00 : f32
    %71 = vector.shape_cast %70 : vector<1x256xi1> to vector<1x256xi1>
    %72 = vector.broadcast %71 : vector<1x256xi1> to vector<32x256xi1>
    %73 = vector.broadcast %cst_20 : f32 to vector<32x256xf32>
    %74 = arith.select %72, %65, %73 : vector<32x256xi1>, vector<32x256xf32>
    %cst_21 = arith.constant 0.000000e+00 : f32
    %75 = vector.broadcast %cst_21 : f32 to vector<32x8xf32>
    %76 = tpu.concatenate %74, %75 in 1 : vector<32x256xf32>, vector<32x8xf32> -> vector<32x264xf32>
    %77 = vector.extract_strided_slice %76 {offsets = [0, 0], sizes = [32, 256], strides = [1, 1]} : vector<32x264xf32> to vector<32x256xf32>
    %78 = vector.extract_strided_slice %76 {offsets = [0, 1], sizes = [32, 256], strides = [1, 1]} : vector<32x264xf32> to vector<32x256xf32>
    %79 = vector.extract_strided_slice %76 {offsets = [0, 2], sizes = [32, 256], strides = [1, 1]} : vector<32x264xf32> to vector<32x256xf32>
    %80 = tpu.concatenate %77, %78, %79 in 0 : vector<32x256xf32>, vector<32x256xf32>, vector<32x256xf32> -> vector<96x256xf32>
    %c0_22 = arith.constant 0 : index
    %c0_23 = arith.constant 0 : index
    %81 = vector.load %arg6[%c0_22, %c0_23] : memref<16x96xf32, #tpu.memory_space<vmem>>, vector<16x96xf32>
    %cst_24 = arith.constant dense<0.000000e+00> : vector<16x256xf32>
    %82 = tpu.matmul %81, %80, %cst_24 {dimension_numbers = #tpu.dot_dimension_numbers<[1], [0], [0], [1], [0, 0, 1, 1], [], []>} : vector<16x96xf32>, vector<96x256xf32>, vector<16x256xf32> -> vector<16x256xf32>
    %c0_25 = arith.constant 0 : index
    %c0_26 = arith.constant 0 : index
    %83 = vector.load %arg7[%c0_25, %c0_26] : memref<16x1xf32, #tpu.memory_space<vmem>>, vector<16x1xf32>
    %84 = vector.broadcast %83 : vector<16x1xf32> to vector<16x256xf32>
    %85 = arith.addf %82, %84 : vector<16x256xf32>
    %c9_i32 = arith.constant 9 : i32
    %86 = vector.broadcast %c9_i32 : i32 to vector<1x256xi32>
    %87 = arith.cmpi sge, %2, %86 : vector<1x256xi32>
    %c69_i32 = arith.constant 69 : i32
    %88 = vector.broadcast %c69_i32 : i32 to vector<1x256xi32>
    %89 = arith.cmpi slt, %2, %88 : vector<1x256xi32>
    %90 = arith.andi %87, %89 : vector<1x256xi1>
    %cst_27 = arith.constant 0.000000e+00 : f32
    %91 = vector.shape_cast %90 : vector<1x256xi1> to vector<1x256xi1>
    %92 = vector.broadcast %91 : vector<1x256xi1> to vector<16x256xi1>
    %93 = vector.broadcast %cst_27 : f32 to vector<16x256xf32>
    %94 = arith.select %92, %85, %93 : vector<16x256xi1>, vector<16x256xf32>
    %cst_28 = arith.constant 0.000000e+00 : f32
    %95 = vector.broadcast %cst_28 : f32 to vector<16x8xf32>
    %96 = tpu.concatenate %94, %95 in 1 : vector<16x256xf32>, vector<16x8xf32> -> vector<16x264xf32>
    %97 = vector.extract_strided_slice %96 {offsets = [0, 0], sizes = [16, 256], strides = [1, 1]} : vector<16x264xf32> to vector<16x256xf32>
    %98 = vector.extract_strided_slice %96 {offsets = [0, 1], sizes = [16, 256], strides = [1, 1]} : vector<16x264xf32> to vector<16x256xf32>
    %99 = vector.extract_strided_slice %96 {offsets = [0, 2], sizes = [16, 256], strides = [1, 1]} : vector<16x264xf32> to vector<16x256xf32>
    %100 = vector.extract_strided_slice %96 {offsets = [0, 3], sizes = [16, 256], strides = [1, 1]} : vector<16x264xf32> to vector<16x256xf32>
    %101 = vector.extract_strided_slice %96 {offsets = [0, 4], sizes = [16, 256], strides = [1, 1]} : vector<16x264xf32> to vector<16x256xf32>
    %102 = tpu.concatenate %97, %98, %99, %100, %101 in 0 : vector<16x256xf32>, vector<16x256xf32>, vector<16x256xf32>, vector<16x256xf32>, vector<16x256xf32> -> vector<80x256xf32>
    %c0_29 = arith.constant 0 : index
    %c0_30 = arith.constant 0 : index
    %103 = vector.load %arg8[%c0_29, %c0_30] : memref<32x80xf32, #tpu.memory_space<vmem>>, vector<32x80xf32>
    %cst_31 = arith.constant dense<0.000000e+00> : vector<32x256xf32>
    %104 = tpu.matmul %103, %102, %cst_31 {dimension_numbers = #tpu.dot_dimension_numbers<[1], [0], [0], [1], [0, 0, 1, 1], [], []>} : vector<32x80xf32>, vector<80x256xf32>, vector<32x256xf32> -> vector<32x256xf32>
    %c0_32 = arith.constant 0 : index
    %c0_33 = arith.constant 0 : index
    %105 = vector.load %arg9[%c0_32, %c0_33] : memref<32x1xf32, #tpu.memory_space<vmem>>, vector<32x1xf32>
    %106 = vector.broadcast %105 : vector<32x1xf32> to vector<32x256xf32>
    %107 = arith.addf %104, %106 : vector<32x256xf32>
    %c6_i32 = arith.constant 6 : i32
    %108 = vector.broadcast %c6_i32 : i32 to vector<1x256xi32>
    %109 = arith.cmpi sge, %2, %108 : vector<1x256xi32>
    %c68_i32 = arith.constant 68 : i32
    %110 = vector.broadcast %c68_i32 : i32 to vector<1x256xi32>
    %111 = arith.cmpi slt, %2, %110 : vector<1x256xi32>
    %112 = arith.andi %109, %111 : vector<1x256xi1>
    %cst_34 = arith.constant 0.000000e+00 : f32
    %113 = vector.shape_cast %112 : vector<1x256xi1> to vector<1x256xi1>
    %114 = vector.broadcast %113 : vector<1x256xi1> to vector<32x256xi1>
    %115 = vector.broadcast %cst_34 : f32 to vector<32x256xf32>
    %116 = arith.select %114, %107, %115 : vector<32x256xi1>, vector<32x256xf32>
    %cst_35 = arith.constant 0.000000e+00 : f32
    %117 = vector.broadcast %cst_35 : f32 to vector<32x8xf32>
    %118 = tpu.concatenate %116, %117 in 1 : vector<32x256xf32>, vector<32x8xf32> -> vector<32x264xf32>
    %119 = vector.extract_strided_slice %118 {offsets = [0, 0], sizes = [32, 256], strides = [1, 1]} : vector<32x264xf32> to vector<32x256xf32>
    %120 = vector.extract_strided_slice %118 {offsets = [0, 1], sizes = [32, 256], strides = [1, 1]} : vector<32x264xf32> to vector<32x256xf32>
    %121 = vector.extract_strided_slice %118 {offsets = [0, 2], sizes = [32, 256], strides = [1, 1]} : vector<32x264xf32> to vector<32x256xf32>
    %122 = vector.extract_strided_slice %118 {offsets = [0, 3], sizes = [32, 256], strides = [1, 1]} : vector<32x264xf32> to vector<32x256xf32>
    %123 = tpu.concatenate %119, %120, %121, %122 in 0 : vector<32x256xf32>, vector<32x256xf32>, vector<32x256xf32>, vector<32x256xf32> -> vector<128x256xf32>
    %c0_36 = arith.constant 0 : index
    %c0_37 = arith.constant 0 : index
    %124 = vector.load %arg10[%c0_36, %c0_37] : memref<64x128xf32, #tpu.memory_space<vmem>>, vector<64x128xf32>
    %cst_38 = arith.constant dense<0.000000e+00> : vector<64x256xf32>
    %125 = tpu.matmul %124, %123, %cst_38 {dimension_numbers = #tpu.dot_dimension_numbers<[1], [0], [0], [1], [0, 0, 1, 1], [], []>} : vector<64x128xf32>, vector<128x256xf32>, vector<64x256xf32> -> vector<64x256xf32>
    %c0_39 = arith.constant 0 : index
    %c0_40 = arith.constant 0 : index
    %126 = vector.load %arg11[%c0_39, %c0_40] : memref<64x1xf32, #tpu.memory_space<vmem>>, vector<64x1xf32>
    %127 = vector.broadcast %126 : vector<64x1xf32> to vector<64x256xf32>
    %128 = arith.addf %125, %127 : vector<64x256xf32>
    %c4_i32 = arith.constant 4 : i32
    %129 = vector.broadcast %c4_i32 : i32 to vector<1x256xi32>
    %130 = arith.cmpi sge, %2, %129 : vector<1x256xi32>
    %c67_i32 = arith.constant 67 : i32
    %131 = vector.broadcast %c67_i32 : i32 to vector<1x256xi32>
    %132 = arith.cmpi slt, %2, %131 : vector<1x256xi32>
    %133 = arith.andi %130, %132 : vector<1x256xi1>
    %cst_41 = arith.constant 0.000000e+00 : f32
    %134 = vector.shape_cast %133 : vector<1x256xi1> to vector<1x256xi1>
    %135 = vector.broadcast %134 : vector<1x256xi1> to vector<64x256xi1>
    %136 = vector.broadcast %cst_41 : f32 to vector<64x256xf32>
    %137 = arith.select %135, %128, %136 : vector<64x256xi1>, vector<64x256xf32>
    %cst_42 = arith.constant 0.000000e+00 : f32
    %138 = vector.broadcast %cst_42 : f32 to vector<64x8xf32>
    %139 = tpu.concatenate %137, %138 in 1 : vector<64x256xf32>, vector<64x8xf32> -> vector<64x264xf32>
    %140 = vector.extract_strided_slice %139 {offsets = [0, 0], sizes = [64, 256], strides = [1, 1]} : vector<64x264xf32> to vector<64x256xf32>
    %141 = vector.extract_strided_slice %139 {offsets = [0, 1], sizes = [64, 256], strides = [1, 1]} : vector<64x264xf32> to vector<64x256xf32>
    %142 = vector.extract_strided_slice %139 {offsets = [0, 2], sizes = [64, 256], strides = [1, 1]} : vector<64x264xf32> to vector<64x256xf32>
    %143 = vector.extract_strided_slice %139 {offsets = [0, 3], sizes = [64, 256], strides = [1, 1]} : vector<64x264xf32> to vector<64x256xf32>
    %144 = tpu.concatenate %140, %141, %142, %143 in 0 : vector<64x256xf32>, vector<64x256xf32>, vector<64x256xf32>, vector<64x256xf32> -> vector<256x256xf32>
    %c0_43 = arith.constant 0 : index
    %c0_44 = arith.constant 0 : index
    %145 = vector.load %arg12[%c0_43, %c0_44] : memref<128x256xf32, #tpu.memory_space<vmem>>, vector<128x256xf32>
    %cst_45 = arith.constant dense<0.000000e+00> : vector<128x256xf32>
    %146 = tpu.matmul %145, %144, %cst_45 {dimension_numbers = #tpu.dot_dimension_numbers<[1], [0], [0], [1], [0, 0, 1, 1], [], []>} : vector<128x256xf32>, vector<256x256xf32>, vector<128x256xf32> -> vector<128x256xf32>
    %c0_46 = arith.constant 0 : index
    %c0_47 = arith.constant 0 : index
    %147 = vector.load %arg13[%c0_46, %c0_47] : memref<128x1xf32, #tpu.memory_space<vmem>>, vector<128x1xf32>
    %148 = vector.broadcast %147 : vector<128x1xf32> to vector<128x256xf32>
    %149 = arith.addf %146, %148 : vector<128x256xf32>
    %c2_i32 = arith.constant 2 : i32
    %150 = vector.broadcast %c2_i32 : i32 to vector<1x256xi32>
    %151 = arith.cmpi sge, %2, %150 : vector<1x256xi32>
    %c66_i32 = arith.constant 66 : i32
    %152 = vector.broadcast %c66_i32 : i32 to vector<1x256xi32>
    %153 = arith.cmpi slt, %2, %152 : vector<1x256xi32>
    %154 = arith.andi %151, %153 : vector<1x256xi1>
    %cst_48 = arith.constant 0.000000e+00 : f32
    %155 = vector.shape_cast %154 : vector<1x256xi1> to vector<1x256xi1>
    %156 = vector.broadcast %155 : vector<1x256xi1> to vector<128x256xi1>
    %157 = vector.broadcast %cst_48 : f32 to vector<128x256xf32>
    %158 = arith.select %156, %149, %157 : vector<128x256xi1>, vector<128x256xf32>
    %cst_49 = arith.constant 0.000000e+00 : f32
    %159 = vector.broadcast %cst_49 : f32 to vector<128x8xf32>
    %160 = tpu.concatenate %158, %159 in 1 : vector<128x256xf32>, vector<128x8xf32> -> vector<128x264xf32>
    %161 = vector.extract_strided_slice %160 {offsets = [0, 0], sizes = [128, 256], strides = [1, 1]} : vector<128x264xf32> to vector<128x256xf32>
    %162 = vector.extract_strided_slice %160 {offsets = [0, 1], sizes = [128, 256], strides = [1, 1]} : vector<128x264xf32> to vector<128x256xf32>
    %163 = vector.extract_strided_slice %160 {offsets = [0, 2], sizes = [128, 256], strides = [1, 1]} : vector<128x264xf32> to vector<128x256xf32>
    %164 = tpu.concatenate %161, %162, %163 in 0 : vector<128x256xf32>, vector<128x256xf32>, vector<128x256xf32> -> vector<384x256xf32>
    %c0_50 = arith.constant 0 : index
    %c0_51 = arith.constant 0 : index
    %165 = vector.load %arg14[%c0_50, %c0_51] : memref<1x384xf32, #tpu.memory_space<vmem>>, vector<1x384xf32>
    %cst_52 = arith.constant dense<0.000000e+00> : vector<1x256xf32>
    %166 = tpu.matmul %165, %164, %cst_52 {dimension_numbers = #tpu.dot_dimension_numbers<[1], [0], [0], [1], [0, 0, 1, 1], [], []>} : vector<1x384xf32>, vector<384x256xf32>, vector<1x256xf32> -> vector<1x256xf32>
    %c0_53 = arith.constant 0 : index
    %c0_54 = arith.constant 0 : index
    %167 = vector.load %arg15[%c0_53, %c0_54] : memref<1x1xf32, #tpu.memory_space<vmem>>, vector<1x1xf32>
    %168 = vector.broadcast %167 : vector<1x1xf32> to vector<1x256xf32>
    %169 = arith.addf %166, %168 : vector<1x256xf32>
    %c1_i32 = arith.constant 1 : i32
    %170 = vector.broadcast %c1_i32 : i32 to vector<1x256xi32>
    %171 = arith.cmpi sge, %2, %170 : vector<1x256xi32>
    %c65_i32 = arith.constant 65 : i32
    %172 = vector.broadcast %c65_i32 : i32 to vector<1x256xi32>
    %173 = arith.cmpi slt, %2, %172 : vector<1x256xi32>
    %174 = arith.andi %171, %173 : vector<1x256xi1>
    %cst_55 = arith.constant 0.000000e+00 : f32
    %175 = vector.broadcast %cst_55 : f32 to vector<1x256xf32>
    %176 = arith.select %174, %169, %175 : vector<1x256xi1>, vector<1x256xf32>
    %c0_56 = arith.constant 0 : index
    %c0_57 = arith.constant 0 : index
    %c0_58 = arith.constant 0 : index
    %177 = vector.load %arg16[%c0_56, %c0_57, %c0_58] : memref<1x1x256xf32, #tpu.memory_space<vmem>>, vector<1x1x256xf32>
    %178 = vector.shape_cast %177 : vector<1x1x256xf32> to vector<1x256xf32>
    %179 = vector.shape_cast %176 : vector<1x256xf32> to vector<1x1x256xf32>
    tpu.vector_store %arg16[%c0_56, %c0_57, %c0_58], %179 {strides = array<i32>} : memref<1x1x256xf32, #tpu.memory_space<vmem>>, vector<1x1x256xf32>,
    return
  }
  func.func @transform_0(%arg0: i32) -> (i32, i32, i32) {
    %c0_i32 = arith.constant 0 : i32
    %c0_i32_0 = arith.constant 0 : i32
    %c0_i32_1 = arith.constant 0 : i32
    return %arg0, %c0_i32, %c0_i32_0 : i32, i32, i32
  }
  func.func @transform_1(%arg0: i32) -> (i32, i32) {
    %c0_i32 = arith.constant 0 : i32
    %c0_i32_0 = arith.constant 0 : i32
    %c0_i32_1 = arith.constant 0 : i32
    return %c0_i32, %c0_i32_0 : i32, i32
  }
  func.func @transform_2(%arg0: i32) -> (i32, i32) {
    %c0_i32 = arith.constant 0 : i32
    %c0_i32_0 = arith.constant 0 : i32
    %c0_i32_1 = arith.constant 0 : i32
    return %c0_i32, %c0_i32_0 : i32, i32
  }
  func.func @transform_3(%arg0: i32) -> (i32, i32) {
    %c0_i32 = arith.constant 0 : i32
    %c0_i32_0 = arith.constant 0 : i32
    %c0_i32_1 = arith.constant 0 : i32
    return %c0_i32, %c0_i32_0 : i32, i32
  }
  func.func @transform_4(%arg0: i32) -> (i32, i32) {
    %c0_i32 = arith.constant 0 : i32
    %c0_i32_0 = arith.constant 0 : i32
    %c0_i32_1 = arith.constant 0 : i32
    return %c0_i32, %c0_i32_0 : i32, i32
  }
  func.func @transform_5(%arg0: i32) -> (i32, i32) {
    %c0_i32 = arith.constant 0 : i32
    %c0_i32_0 = arith.constant 0 : i32
    %c0_i32_1 = arith.constant 0 : i32
    return %c0_i32, %c0_i32_0 : i32, i32
  }
  func.func @transform_6(%arg0: i32) -> (i32, i32) {
    %c0_i32 = arith.constant 0 : i32
    %c0_i32_0 = arith.constant 0 : i32
    %c0_i32_1 = arith.constant 0 : i32
    return %c0_i32, %c0_i32_0 : i32, i32
  }
  func.func @transform_7(%arg0: i32) -> (i32, i32) {
    %c0_i32 = arith.constant 0 : i32
    %c0_i32_0 = arith.constant 0 : i32
    %c0_i32_1 = arith.constant 0 : i32
    return %c0_i32, %c0_i32_0 : i32, i32
  }
  func.func @transform_8(%arg0: i32) -> (i32, i32) {
    %c0_i32 = arith.constant 0 : i32
    %c0_i32_0 = arith.constant 0 : i32
    %c0_i32_1 = arith.constant 0 : i32
    return %c0_i32, %c0_i32_0 : i32, i32
  }
  func.func @transform_9(%arg0: i32) -> (i32, i32) {
    %c0_i32 = arith.constant 0 : i32
    %c0_i32_0 = arith.constant 0 : i32
    %c0_i32_1 = arith.constant 0 : i32
    return %c0_i32, %c0_i32_0 : i32, i32
  }
  func.func @transform_10(%arg0: i32) -> (i32, i32) {
    %c0_i32 = arith.constant 0 : i32
    %c0_i32_0 = arith.constant 0 : i32
    %c0_i32_1 = arith.constant 0 : i32
    return %c0_i32, %c0_i32_0 : i32, i32
  }
  func.func @transform_11(%arg0: i32) -> (i32, i32) {
    %c0_i32 = arith.constant 0 : i32
    %c0_i32_0 = arith.constant 0 : i32
    %c0_i32_1 = arith.constant 0 : i32
    return %c0_i32, %c0_i32_0 : i32, i32
  }
  func.func @transform_12(%arg0: i32) -> (i32, i32) {
    %c0_i32 = arith.constant 0 : i32
    %c0_i32_0 = arith.constant 0 : i32
    %c0_i32_1 = arith.constant 0 : i32
    return %c0_i32, %c0_i32_0 : i32, i32
  }
  func.func @transform_13(%arg0: i32) -> (i32, i32) {
    %c0_i32 = arith.constant 0 : i32
    %c0_i32_0 = arith.constant 0 : i32
    %c0_i32_1 = arith.constant 0 : i32
    return %c0_i32, %c0_i32_0 : i32, i32
  }
  func.func @transform_14(%arg0: i32) -> (i32, i32) {
    %c0_i32 = arith.constant 0 : i32
    %c0_i32_0 = arith.constant 0 : i32
    %c0_i32_1 = arith.constant 0 : i32
    return %c0_i32, %c0_i32_0 : i32, i32
  }
  func.func @transform_15(%arg0: i32) -> (i32, i32, i32) {
    %c0_i32 = arith.constant 0 : i32
    %c0_i32_0 = arith.constant 0 : i32
    %c0_i32_1 = arith.constant 0 : i32
    return %arg0, %c0_i32, %c0_i32_0 : i32, i32, i32
  }
}

</mosaic_0001>

<bundles_post_ra>
// kernel: tpu_custom_call.1
= control target key start
LH: loop header
LB: loop body
LE: loop exit
PB: predicated region body
PF: predicated region fallthrough
CT: control target
= control target key end

     0   :  { %s5422_s0 = inlined_call_operand.vmem [shape: f32[1,1,256], index: 0, kind: input, shape index: {}]   ;;  %s5423_s1 = inlined_call_operand.vmem [shape: f32[64,3], index: 1, kind: input, shape index: {}]   ;;  %s5424_s2 = inlined_call_operand.vmem [shape: f32[64,1], index: 2, kind: input, shape index: {}]   ;;  %s5425_s3 = inlined_call_operand.vmem [shape: f32[32,192], index: 3, kind: input, shape index: {}]   ;;  %s5426_s4 = inlined_call_operand.vmem [shape: f32[32,1], index: 4, kind: input, shape index: {}]   ;;  %s5427_s5 = inlined_call_operand.vmem [shape: f32[16,96], index: 5, kind: input, shape index: {}]   ;;  %s5428_s6 = inlined_call_operand.vmem [shape: f32[16,1], index: 6, kind: input, shape index: {}]   ;;  %s5429_s7 = inlined_call_operand.vmem [shape: f32[32,80], index: 7, kind: input, shape index: {}]   ;;  %s5430_s8 = inlined_call_operand.vmem [shape: f32[32,1], index: 8, kind: input, shape index: {}]   ;;  %s5431_s9 = inlined_call_operand.vmem [shape: f32[64,128], index: 9, kind: input, shape index: {}]   ;;  %s5432_s10 = inlined_call_operand.vmem [shape: f32[64,1], index: 10, kind: input, shape index: {}]   ;;  %s5433_s11 = inlined_call_operand.hbm [shape: f32[128,256], index: 11, kind: input, shape index: {}]   ;;  %s5434_s12 = inlined_call_operand.vmem [shape: f32[128,1], index: 12, kind: input, shape index: {}]   ;;  %s5435_s13 = inlined_call_operand.vmem [shape: f32[1,384], index: 13, kind: input, shape index: {}]   ;;  %s5436_s14 = inlined_call_operand.<no memory space> [shape: f32[1,1], index: 14, kind: input, shape index: {}]   ;;  %s5437_s15 = inlined_call_operand.hbm [shape: f32[1,1,256], index: 15, kind: output, shape index: {}]  }
   0x1   :  { %v20_v0 = vstv %s5436_s14 }
   0x2   :  { %21 = vst [vmem:[#allocation2] sm:$0x1] %v20_v0 }
   0x3   :  { %22 = vsyncpa [#allocation4], 0 }
   0x4   :  { %23 = vsyncpa [#allocation5], 0  ;;  %s50_s22 = sshll.u32 %s5433_s11, 4  ;;  %s3337_s23 = smov [#allocation3]   ;;  %s51_s22 = int_to_ptr.hbm [resolvable:$true] %s50_s22 }
   0x5   :  { %s52_s24 = sshll.u32 %s3337_s23, 4  ;;  %s3338_s25 = smov 256   ;;  %s53_s24 = int_to_ptr.vmem [resolvable:$true] %s52_s24 }
   0x6   :  { %s3339_s26 = smov 16  }
   0x7   :  { %58 = dma.hbm_to_vmem [thread:$0]  %s51_s22, 4096, %s53_s24, [#allocation4], %s3338_s25, %s3338_s25, %s3339_s26  }
   0x8   :  { %3333 = dma.done.wait [#allocation4], 4096  }
   0x9   :  { %3334 = vsyncadd [#allocation4], 4294963200  ;;  %v3340_v1 = vmov 0.0   ;;  %s3341_s14 = smov 127   ;;  %v74_v3 = vld [vmem:[%s5422_s0] sm:$0x3]  ;;  %v69_v43 = vlaneseq }
   0xa   :  { %v83_v2 = vrot.slane %v3340_v1, 7  ;;  %v76_v4 = vperm.slane %v74_v3, 0  ;;  %v77_v5 = vperm.slane %v74_v3, 1  ;;  %s3342_s11 = smov 126   ;;  %v97_v10 = vrot.slane %v3340_v1, 6  ;;  %v129_v11 = vld [vmem:[%s5424_s2 + $0x30] sm:$0xff] }
   0xb   :  { %v3343_v12 = vmov 0   ;;  %v127_v13 = vld [vmem:[%s5424_s2 + $0x20] sm:$0xff]  ;;  %v124_v14 = vld [vmem:[%s5424_s2 + $0x8] sm:$0xff]  ;;  %v130_v18 = vld [vmem:[%s5424_s2 + $0x38] sm:$0xff]  ;;  %vm104_vm0 = vcmask 1031168   ;;  %vm90_vm1 = vcmask 1039360  }
   0xc   :  { %88 = vrot.lane.b32.xlu1 %v83_v2, %s3341_s14  ;;  %v81_v6 = vrot.slane %v76_v4, 7  ;;  %v95_v7 = vrot.slane %v76_v4, 6  ;;  %v96_v8 = vrot.slane %v77_v5, 6  ;;  %v82_v9 = vrot.slane %v77_v5, 7  ;;  %2784 = vset.pattern.permute.xlu2 %v3343_v12  ;;  %v128_v17 = vld [vmem:[%s5424_s2 + $0x28] sm:$0xff]  ;;  %v126_v22 = vld [vmem:[%s5424_s2 + $0x18] sm:$0xff] }
   0xd   :  { %2783 = vset.pattern.permute.xlu1 %v3343_v12  ;;  %2782 = vset.pattern.permute.xlu0 %v3343_v12  ;;  %v125_v23 = vld [vmem:[%s5424_s2 + $0x10] sm:$0xff]  ;;  %vm109_vm2 = vcmask 1040384   ;;  %vm112_vm3 = vcmask 1041408   ;;  %vm196_vm4 = vcmask 1042432   ;;  %v115_v31 = vld [vmem:[%s5423_s1] sm:$0xff]  ;;  %vm171_vm5 = vcmask 23552  }
   0xe   :  { %84 = vrot.lane.b32.xlu0 %v81_v6, %s3341_s14  ;;  %100 = vrot.lane.b32.xlu2 %v96_v8, %s3342_s11  ;;  %v123_v34 = vld [vmem:[%s5424_s2] sm:$0xff]  ;;  %v116_v35 = vld [vmem:[%s5423_s1 + $0x8] sm:$0xff]  ;;  %v3521_v44 = vand.u32 127, %v69_v43 }
   0xf   :  { %v117_v36 = vld [vmem:[%s5423_s1 + $0x10] sm:$0xff]  ;;  %v118_v37 = vld [vmem:[%s5423_s1 + $0x18] sm:$0xff]  ;;  %v119_v38 = vld [vmem:[%s5423_s1 + $0x20] sm:$0xff] }
  0x10   :  { %v120_v39 = vld [vmem:[%s5423_s1 + $0x28] sm:$0xff]  ;;  %v121_v40 = vld [vmem:[%s5423_s1 + $0x30] sm:$0xff]  ;;  %v122_v41 = vld [vmem:[%s5423_s1 + $0x38] sm:$0xff]  ;;  %v71_v46 = vadd.s32 128, %v3521_v44  ;;  %vm285_vm8 = vcmp.ge.s32.totalorder %v3521_v44, 11  ;;  %vm287_vm9 = vcmp.lt.s32.totalorder %v3521_v44, 75 }
  0x11   :  { %vm3544_vm11 = vmand %vm285_vm8, %vm287_vm9  ;;  %vm491_vm12 = vcmp.lt.s32.totalorder %v3521_v44, 73  ;;  %s2640_s1 = sshll.u32 %s5437_s15, 4  ;;  %s2641_s1 = int_to_ptr.hbm [resolvable:$true] %s2640_s1 }
  0x12   :  { %v3528_v49 = vand.u32 127, %v71_v46  ;;  %vm3699_vm14 = vmand %vm285_vm8, %vm491_vm12 }
  0x14   :  { %98 = vrot.lane.b32.xlu1 %v95_v7, %s3342_s11  ;;  %vm286_vm6 = vcmp.ge.s32.totalorder %v3528_v49, 11  ;;  %vm288_vm7 = vcmp.lt.s32.totalorder %v3528_v49, 75  ;;  %vm492_vm13 = vcmp.lt.s32.totalorder %v3528_v49, 73  ;;  %vm823_vm8 = vcmp.lt.s32.totalorder %v3528_v49, 72 }
  0x15   :  { %vm3538_vm10 = vmand %vm286_vm6, %vm288_vm7  ;;  %vm821_vm7 = vcmp.ge.s32.totalorder %v3528_v49, 10 }
  0x16   :  { %86 = vrot.lane.b32.xlu0 %v82_v9, %s3341_s14  ;;  %102 = vrot.lane.b32.xlu2 %v97_v10, %s3342_s11  ;;  %vm3712_vm15 = vmand %vm286_vm6, %vm492_vm13 }
  0x17   :  { %vm4141_vm9 = vmand %vm821_vm7, %vm823_vm8  ;;  %vm1160_vm8 = vcmask 1014784  }
  0x1c   :  { %163 = vperm.xlu1 %2783, %v129_v11  }
  0x1e   :  { %158 = vperm.xlu2 %2784, %v128_v17   ;;  %168 = vperm.xlu0 %2782, %v130_v18  }
  0x24   :  { %153 = vperm.xlu1 %2783, %v127_v13  }
  0x26   :  { %148 = vperm.xlu2 %2784, %v126_v22   ;;  %143 = vperm.xlu0 %2782, %v125_v23  }
  0x2c   :  { %138 = vperm.xlu1 %2783, %v124_v14  }
  0x2e   :  { %133 = vperm.xlu2 %2784, %v123_v34   ;;  %331 = vrot.lane.b32.xlu0 %v3340_v1, %s3341_s14 }
  0x36   :  { %413 = vrot.lane.b32.xlu2 %v3340_v1, %s3342_s11 }
  0x68   :  { %v101_v16 = vpop.permute.xlu2 %100 }
  0x70   :  { %v103_v20 = vpop.permute.xlu2 %102 }
  0x71   :  { %v106_v25 = vsel %vm104_vm0, %v101_v16, %v103_v20 }
  0x78   :  { %v159_v60 = vpop.permute.xlu2 %158 }
  0x7e   :  { %v89_v15 = vpop.permute.xlu1 %88 }
  0x80   :  { %v85_v19 = vpop.permute.xlu0 %84 }
  0x86   :  { %v99_v21 = vpop.permute.xlu1 %98 }
  0x87   :  { %v105_v26 = vsel %vm104_vm0, %v99_v21, %v101_v16 }
  0x88   :  { %v87_v24 = vpop.permute.xlu0 %86 }
  0x89   :  { %v91_v27 = vsel %vm90_vm1, %v85_v19, %v87_v24  ;;  %v92_v28 = vsel %vm90_vm1, %v87_v24, %v89_v15 }
  0x8a   :  { %v110_v29 = vsel %vm109_vm2, %v76_v4, %v91_v27  ;;  %v111_v30 = vsel %vm109_vm2, %v77_v5, %v92_v28  ;;  %v149_v5 = vpop.permute.xlu2 %148 }
  0x8b   :  { %v113_v32 = vsel %vm112_vm3, %v110_v29, %v105_v26  ;;  %v114_v33 = vsel %vm112_vm3, %v111_v30, %v106_v25  ;;  %vm691_vm3 = vcmask 523264  }
  0x8c   :  { %2650 = vmatpush.msk.msra.mxu0 %vm196_vm4, %v113_v32  ;;  %2659 = vmatpush.msk.msra.mxu1 %vm196_vm4, %v114_v33  ;;  %vm820_vm4 = vcmp.ge.s32.totalorder %v3521_v44, 10 }
  0x8d   :  { %2651 = vmatmul.msk.f32.vlgmr.msra.gmra.mxu0 %vm171_vm5, %v115_v31  ;;  %2660 = vmatmul.msk.f32.vlgmr.msra.gmra.mxu1 %vm171_vm5, %v115_v31 }
  0x8e   :  { %v3518_v42 = vpop.permute.xlu1 %163 }
  0x90   :  { %v3530_v50 = vpop.permute.xlu0 %168 }
  0x95   :  { %2652 = vmatmul.msk.f32.gmra.mxu0 %vm171_vm5, %v116_v35  ;;  %2661 = vmatmul.msk.f32.gmra.mxu1 %vm171_vm5, %v116_v35 }
  0x96   :  { %v154_v45 = vpop.permute.xlu1 %153 }
  0x98   :  { %v144_v61 = vpop.permute.xlu0 %143 }
  0x9d   :  { %2653 = vmatmul.msk.f32.gmra.mxu0 %vm171_vm5, %v117_v36  ;;  %2662 = vmatmul.msk.f32.gmra.mxu1 %vm171_vm5, %v117_v36  ;;  %v134_v36 = vpop.permute.xlu2 %133 }
  0x9e   :  { %v139_v51 = vpop.permute.xlu1 %138 }
  0xa5   :  { %2654 = vmatmul.msk.f32.gmra.mxu0 %vm171_vm5, %v118_v37  ;;  %2663 = vmatmul.msk.f32.gmra.mxu1 %vm171_vm5, %v118_v37 }
  0xad   :  { %2655 = vmatmul.msk.f32.gmra.mxu0 %vm171_vm5, %v119_v38  ;;  %2664 = vmatmul.msk.f32.gmra.mxu1 %vm171_vm5, %v119_v38 }
  0xb5   :  { %2656 = vmatmul.msk.f32.gmra.mxu0 %vm171_vm5, %v120_v39  ;;  %2665 = vmatmul.msk.f32.gmra.mxu1 %vm171_vm5, %v120_v39 }
  0xbd   :  { %2657 = vmatmul.msk.f32.gmra.mxu0 %vm171_vm5, %v121_v40  ;;  %2666 = vmatmul.msk.f32.gmra.mxu1 %vm171_vm5, %v121_v40 }
  0xc5   :  { %2658 = vmatmul.msk.f32.gmra.mxu0 %vm171_vm5, %v122_v41  ;;  %2667 = vmatmul.msk.f32.gmra.mxu1 %vm171_vm5, %v122_v41  ;;  %v3682_v41 = vpop.permute.xlu2 %413  ;;  %vm822_vm5 = vcmp.lt.s32.totalorder %v3521_v44, 72 }
  0xc6   :  { %vm4103_vm6 = vmand %vm820_vm4, %vm822_vm5  ;;  %vm1084_vm5 = vcmp.lt.s32.totalorder %v3528_v49, 69 }
 0x10a   :  { %v3524_v47 = vpop.f32.mrf.mxu0  ;;  %v3526_v48 = vpop.f32.mrf.mxu1 }
 0x10b   :  { %v262_v37 = vadd.f32 %v3526_v48, %v134_v36  ;;  %v221_v39 = vadd.f32 %v3524_v47, %v134_v36 }
 0x10d   :  { %v3665_v38 = vsel %vm3538_vm10, %v262_v37, 0.0  ;;  %v3672_v40 = vsel %vm3544_vm11, %v221_v39, 0.0 }
 0x112   :  { %v223_v52 = vpop.f32.mrf.mxu0  ;;  %v264_v53 = vpop.f32.mrf.mxu1 }
 0x113   :  { %v224_v55 = vadd.f32 %v223_v52, %v139_v51  ;;  %v265_v56 = vadd.f32 %v264_v53, %v139_v51 }
 0x115   :  { %v3550_v58 = vsel %vm3538_vm10, %v265_v56, 0.0  ;;  %v3554_v59 = vsel %vm3544_vm11, %v224_v55, 0.0 }
 0x116   :  { %335 = vrot.lane.b32.xlu1 %v3550_v58, %s3341_s14  ;;  %333 = vrot.lane.b32.xlu0 %v3554_v59, %s3341_s14 }
 0x11a   :  { %v226_v62 = vpop.f32.mrf.mxu0  ;;  %v267_v63 = vpop.f32.mrf.mxu1 }
 0x11b   :  { %v227_v0 = vadd.f32 %v226_v62, %v144_v61  ;;  %v268_v2 = vadd.f32 %v267_v63, %v144_v61 }
 0x11d   :  { %v3562_v3 = vsel %vm3538_vm10, %v268_v2, 0.0  ;;  %v3566_v4 = vsel %vm3544_vm11, %v227_v0, 0.0 }
 0x11e   :  { %339 = vrot.lane.b32.xlu0 %v3562_v3, %s3341_s14  ;;  %337 = vrot.lane.b32.xlu2 %v3566_v4, %s3341_s14 }
 0x122   :  { %v229_v6 = vpop.f32.mrf.mxu0  ;;  %v270_v7 = vpop.f32.mrf.mxu1 }
 0x123   :  { %v230_v8 = vadd.f32 %v229_v6, %v149_v5  ;;  %v271_v10 = vadd.f32 %v270_v7, %v149_v5 }
 0x125   :  { %v3574_v9 = vsel %vm3544_vm11, %v230_v8, 0.0  ;;  %v3592_v15 = vsel %vm3538_vm10, %v271_v10, 0.0 }
 0x126   :  { %341 = vrot.lane.b32.xlu1 %v3574_v9, %s3341_s14  ;;  %421 = vrot.lane.b32.xlu0 %v3562_v3, %s3342_s11 }
 0x127   :  { %419 = vrot.lane.b32.xlu2 %v3566_v4, %s3342_s11 }
 0x12a   :  { %v232_v11 = vpop.f32.mrf.mxu0  ;;  %v273_v12 = vpop.f32.mrf.mxu1 }
 0x12b   :  { %v233_v13 = vadd.f32 %v232_v11, %v154_v45  ;;  %v274_v16 = vadd.f32 %v273_v12, %v154_v45  ;;  %v3684_v45 = vpop.permute.xlu0 %331 }
 0x12d   :  { %v3584_v14 = vsel %vm3544_vm11, %v233_v13, 0.0  ;;  %v3598_v18 = vsel %vm3538_vm10, %v274_v16, 0.0 }
 0x12e   :  { %423 = vrot.lane.b32.xlu1 %v3574_v9, %s3342_s11  ;;  %345 = vrot.lane.b32.xlu0 %v3584_v14, %s3341_s14 }
 0x12f   :  { %343 = vrot.lane.b32.xlu2 %v3592_v15, %s3341_s14 }
 0x132   :  { %v276_v17 = vpop.f32.mrf.mxu1  ;;  %v235_v19 = vpop.f32.mrf.mxu0 }
 0x133   :  { %v277_v20 = vadd.f32 %v276_v17, %v159_v60  ;;  %v236_v21 = vadd.f32 %v235_v19, %v159_v60  ;;  %v660_v60 = vld [vmem:[%s5425_s3 + $0x8] sm:$0xff] }
 0x135   :  { %v3608_v22 = vsel %vm3538_vm10, %v277_v20, 0.0  ;;  %v3616_v24 = vsel %vm3544_vm11, %v236_v21, 0.0 }
 0x136   :  { %347 = vrot.lane.b32.xlu1 %v3598_v18, %s3341_s14  ;;  %427 = vrot.lane.b32.xlu0 %v3584_v14, %s3342_s11 }
 0x137   :  { %425 = vrot.lane.b32.xlu2 %v3592_v15, %s3342_s11 }
 0x13a   :  { %v279_v23 = vpop.f32.mrf.mxu1  ;;  %v238_v26 = vpop.f32.mrf.mxu0 }
 0x13b   :  { %v280_v25 = vadd.f32 %v279_v23, %v3518_v42  ;;  %v239_v28 = vadd.f32 %v238_v26, %v3518_v42 }
 0x13d   :  { %v3623_v27 = vsel %vm3538_vm10, %v280_v25, 0.0  ;;  %v3634_v29 = vsel %vm3544_vm11, %v239_v28, 0.0 }
 0x13e   :  { %429 = vrot.lane.b32.xlu1 %v3598_v18, %s3342_s11  ;;  %351 = vrot.lane.b32.xlu0 %v3608_v22, %s3341_s14 }
 0x13f   :  { %349 = vrot.lane.b32.xlu2 %v3616_v24, %s3341_s14 }
 0x142   :  { %v241_v30 = vpop.f32.mrf.mxu0  ;;  %v282_v31 = vpop.f32.mrf.mxu1 }
 0x143   :  { %v242_v32 = vadd.f32 %v241_v30, %v3530_v50  ;;  %v283_v33 = vadd.f32 %v282_v31, %v3530_v50 }
 0x145   :  { %v3646_v34 = vsel %vm3544_vm11, %v242_v32, 0.0  ;;  %v3654_v35 = vsel %vm3538_vm10, %v283_v33, 0.0  ;;  %vm926_vm10 = vcmp.lt.s32.totalorder %v3521_v44, 70  ;;  %vm927_vm11 = vcmp.lt.s32.totalorder %v3528_v49, 70 }
 0x146   :  { %355 = vrot.lane.b32.xlu1 %v3623_v27, %s3341_s14  ;;  %433 = vrot.lane.b32.xlu0 %v3608_v22, %s3342_s11  ;;  %vm4178_vm12 = vmand %vm820_vm4, %vm926_vm10  ;;  %vm1082_vm4 = vcmp.ge.s32.totalorder %v3528_v49, 9  ;;  %vm1197_vm10 = vcmask 654336  }
 0x147   :  { %431 = vrot.lane.b32.xlu2 %v3616_v24, %s3342_s11  ;;  %vm4185_vm13 = vmand %vm821_vm7, %vm927_vm11  ;;  %vm1269_vm11 = vcmp.ge.s32.totalorder %v3528_v49, 6 }
 0x148   :  { %vm4333_vm7 = vmand %vm1082_vm4, %vm1084_vm5  ;;  %vm1529_vm4 = vcmp.ge.s32.totalorder %v3528_v49, 4  ;;  %vm1531_vm5 = vcmp.lt.s32.totalorder %v3528_v49, 67 }
 0x14e   :  { %435 = vrot.lane.b32.xlu1 %v3634_v29, %s3342_s11  ;;  %353 = vrot.lane.b32.xlu0 %v3634_v29, %s3341_s14 }
 0x14f   :  { %437 = vrot.lane.b32.xlu2 %v3623_v27, %s3342_s11 }
 0x156   :  { %357 = vrot.lane.b32.xlu1 %v3646_v34, %s3341_s14  ;;  %439 = vrot.lane.b32.xlu0 %v3646_v34, %s3342_s11 }
 0x157   :  { %359 = vrot.lane.b32.xlu2 %v3654_v35, %s3341_s14 }
 0x15e   :  { %441 = vrot.lane.b32.xlu1 %v3654_v35, %s3342_s11  ;;  %415 = vrot.lane.b32.xlu0 %v3554_v59, %s3342_s11 }
 0x15f   :  { %329 = vrot.lane.b32.xlu2 %v3665_v38, %s3341_s14 }
 0x166   :  { %327 = vrot.lane.b32.xlu1 %v3672_v40, %s3341_s14  ;;  %411 = vrot.lane.b32.xlu0 %v3665_v38, %s3342_s11 }
 0x167   :  { %409 = vrot.lane.b32.xlu2 %v3672_v40, %s3342_s11 }
 0x16e   :  { %417 = vrot.lane.b32.xlu1 %v3550_v58, %s3342_s11 }
 0x178   :  { %v338_v42 = vpop.permute.xlu2 %337 }
 0x181   :  { %v420_v46 = vpop.permute.xlu2 %419 }
 0x188   :  { %v3686_v47 = vpop.permute.xlu0 %333  ;;  %v3688_v48 = vpop.permute.xlu1 %335 }
 0x189   :  { %v344_v50 = vpop.permute.xlu2 %343 }
 0x190   :  { %v340_v51 = vpop.permute.xlu0 %339 }
 0x191   :  { %v365_v52 = vsel %vm90_vm1, %v338_v42, %v340_v51  ;;  %v366_v53 = vsel %vm90_vm1, %v340_v51, %v3684_v45  ;;  %v426_v63 = vpop.permute.xlu2 %425 }
 0x192   :  { %v397_v54 = vmax.f32 %v3566_v4, %v365_v52  ;;  %v398_v55 = vmax.f32 %v3562_v3, %v366_v53  ;;  %v368_v4 = vsel %vm90_vm1, %v344_v50, %v3684_v45  ;;  %v450_v7 = vsel %vm104_vm0, %v426_v63, %v3682_v41 }
 0x193   :  { %v400_v11 = vmax.f32 %v3592_v15, %v368_v4 }
 0x195   :  { %v3732_v12 = vmax.f32 %v400_v11, %v450_v7 }
 0x197   :  { %v506_v15 = vsel %vm3712_vm15, %v3732_v12, 0.0 }
 0x198   :  { %v342_v56 = vpop.permute.xlu1 %341  ;;  %v422_v57 = vpop.permute.xlu0 %421 }
 0x199   :  { %v447_v61 = vsel %vm104_vm0, %v420_v46, %v422_v57  ;;  %v448_v62 = vsel %vm104_vm0, %v422_v57, %v3682_v41  ;;  %v367_v8 = vsel %vm90_vm1, %v342_v56, %v344_v50  ;;  %v350_v25 = vpop.permute.xlu2 %349 }
 0x19a   :  { %v3706_v0 = vmax.f32 %v397_v54, %v447_v61  ;;  %v3708_v2 = vmax.f32 %v398_v55, %v448_v62  ;;  %v399_v13 = vmax.f32 %v3574_v9, %v367_v8 }
 0x19c   :  { %v503_v5 = vsel %vm3699_vm14, %v3706_v0, 0.0  ;;  %v504_v6 = vsel %vm3712_vm15, %v3708_v2, 0.0 }
 0x19d   :  { %v3727_v10 = vpack.i.bf16 %v504_v6, %v503_v5 }
 0x19f   :  { %2786 = vrot.lane.b32.xlu0 %v3727_v10, %s3341_s14 }
 0x1a0   :  { %v424_v16 = vpop.permute.xlu1 %423  ;;  %v346_v17 = vpop.permute.xlu0 %345 }
 0x1a1   :  { %v449_v19 = vsel %vm104_vm0, %v424_v16, %v426_v63  ;;  %v432_v37 = vpop.permute.xlu2 %431 }
 0x1a2   :  { %v3736_v20 = vmax.f32 %v399_v13, %v449_v19 }
 0x1a4   :  { %v505_v21 = vsel %vm3699_vm14, %v3736_v20, 0.0 }
 0x1a5   :  { %v3744_v23 = vpack.i.bf16 %v506_v15, %v505_v21 }
 0x1a7   :  { %2791 = vrot.lane.b32.xlu2 %v3744_v23, %s3341_s14 }
 0x1a8   :  { %v348_v9 = vpop.permute.xlu1 %347  ;;  %v428_v26 = vpop.permute.xlu0 %427 }
 0x1a9   :  { %v369_v28 = vsel %vm90_vm1, %v346_v17, %v348_v9  ;;  %v370_v30 = vsel %vm90_vm1, %v348_v9, %v3684_v45  ;;  %v438_v5 = vpop.permute.xlu2 %437 }
 0x1aa   :  { %v401_v31 = vmax.f32 %v3584_v14, %v369_v28  ;;  %v402_v32 = vmax.f32 %v3598_v18, %v370_v30  ;;  %v456_v16 = vsel %vm104_vm0, %v438_v5, %v3682_v41 }
 0x1b0   :  { %v430_v33 = vpop.permute.xlu1 %429  ;;  %v352_v36 = vpop.permute.xlu0 %351 }
 0x1b1   :  { %v451_v39 = vsel %vm104_vm0, %v428_v26, %v430_v33  ;;  %v452_v42 = vsel %vm104_vm0, %v430_v33, %v3682_v41  ;;  %v371_v18 = vsel %vm90_vm1, %v350_v25, %v352_v36  ;;  %v372_v52 = vsel %vm90_vm1, %v352_v36, %v3684_v45  ;;  %v360_v9 = vpop.permute.xlu2 %359 }
 0x1b2   :  { %v3756_v46 = vmax.f32 %v401_v31, %v451_v39  ;;  %v3758_v50 = vmax.f32 %v402_v32, %v452_v42  ;;  %v403_v54 = vmax.f32 %v3616_v24, %v371_v18  ;;  %v404_v55 = vmax.f32 %v3608_v22, %v372_v52 }
 0x1b4   :  { %v507_v51 = vsel %vm3699_vm14, %v3756_v46, 0.0  ;;  %v508_v14 = vsel %vm3712_vm15, %v3758_v50, 0.0 }
 0x1b5   :  { %v3769_v53 = vpack.i.bf16 %v508_v14, %v507_v51 }
 0x1b7   :  { %2796 = vrot.lane.b32.xlu1 %v3769_v53, %s3341_s14 }
 0x1b8   :  { %v356_v56 = vpop.permute.xlu1 %355  ;;  %v434_v57 = vpop.permute.xlu0 %433 }
 0x1b9   :  { %v453_v61 = vsel %vm104_vm0, %v432_v37, %v434_v57  ;;  %v454_v62 = vsel %vm104_vm0, %v434_v57, %v3682_v41  ;;  %v374_v6 = vsel %vm90_vm1, %v356_v56, %v3684_v45  ;;  %v330_v33 = vpop.permute.xlu2 %329 }
 0x1ba   :  { %v3778_v63 = vmax.f32 %v403_v54, %v453_v61  ;;  %v3780_v4 = vmax.f32 %v404_v55, %v454_v62  ;;  %v406_v8 = vmax.f32 %v3623_v27, %v374_v6 }
 0x1bc   :  { %v509_v24 = vsel %vm3699_vm14, %v3778_v63, 0.0  ;;  %v510_v22 = vsel %vm3712_vm15, %v3780_v4, 0.0  ;;  %v3798_v19 = vmax.f32 %v406_v8, %v456_v16 }
 0x1bd   :  { %v3790_v7 = vpack.i.bf16 %v510_v22, %v509_v24 }
 0x1be   :  { %v512_v26 = vsel %vm3712_vm15, %v3798_v19, 0.0 }
 0x1bf   :  { %2801 = vrot.lane.b32.xlu0 %v3790_v7, %s3341_s14 }
 0x1c0   :  { %v436_v11 = vpop.permute.xlu1 %435  ;;  %v354_v13 = vpop.permute.xlu0 %353 }
 0x1c1   :  { %v373_v17 = vsel %vm90_vm1, %v354_v13, %v356_v56  ;;  %v455_v15 = vsel %vm104_vm0, %v436_v11, %v438_v5  ;;  %v410_v6 = vpop.permute.xlu2 %409  ;;  %v363_v13 = vsel %vm90_vm1, %v3686_v47, %v3688_v48 }
 0x1c2   :  { %v405_v21 = vmax.f32 %v3634_v29, %v373_v17  ;;  %v376_v29 = vsel %vm90_vm1, %v360_v9, %v3684_v45 }
 0x1c3   :  { %v408_v36 = vmax.f32 %v3654_v35, %v376_v29 }
 0x1c4   :  { %v3802_v25 = vmax.f32 %v405_v21, %v455_v15  ;;  %v395_v15 = vmax.f32 %v3554_v59, %v363_v13 }
 0x1c6   :  { %v511_v27 = vsel %vm3699_vm14, %v3802_v25, 0.0 }
 0x1c7   :  { %v2805_v28 = vpack.i.bf16 %v512_v26, %v511_v27 }
 0x1c8   :  { %v358_v30 = vpop.permute.xlu1 %357  ;;  %v440_v31 = vpop.permute.xlu0 %439 }
 0x1c9   :  { %2806 = vrot.lane.b32.xlu2 %v2805_v28, %s3341_s14  ;;  %v375_v32 = vsel %vm90_vm1, %v358_v30, %v360_v9  ;;  %v669_v30 = vld [vmem:[%s5426_s4 + $0x10] sm:$0xff] }
 0x1ca   :  { %v407_v37 = vmax.f32 %v3646_v34, %v375_v32  ;;  %v362_v34 = vsel %vm90_vm1, %v330_v33, %v3684_v45 }
 0x1cb   :  { %v394_v56 = vmax.f32 %v3665_v38, %v362_v34  ;;  %v364_v38 = vsel %vm90_vm1, %v3688_v48, %v3684_v45 }
 0x1cc   :  { %v396_v21 = vmax.f32 %v3550_v58, %v364_v38 }
 0x1d0   :  { %v442_v39 = vpop.permute.xlu1 %441  ;;  %v416_v42 = vpop.permute.xlu0 %415 }
 0x1d1   :  { %v457_v51 = vsel %vm104_vm0, %v440_v31, %v442_v39  ;;  %v458_v14 = vsel %vm104_vm0, %v442_v39, %v3682_v41  ;;  %v670_v31 = vld [vmem:[%s5426_s4 + $0x18] sm:$0xff] }
 0x1d2   :  { %v3819_v18 = vmax.f32 %v407_v37, %v457_v51  ;;  %v3821_v52 = vmax.f32 %v408_v36, %v458_v14 }
 0x1d4   :  { %v513_v54 = vsel %vm3699_vm14, %v3819_v18, 0.0  ;;  %v514_v35 = vsel %vm3712_vm15, %v3821_v52, 0.0 }
 0x1d5   :  { %v2835_v55 = vpack.i.bf16 %v514_v35, %v513_v54 }
 0x1d7   :  { %2836 = vrot.lane.b32.xlu0 %v2835_v55, %s3342_s11  ;;  %2811 = vrot.lane.b32.xlu1 %v2835_v55, %s3341_s14 }
 0x1d8   :  { %v328_v57 = vpop.permute.xlu1 %327  ;;  %v412_v61 = vpop.permute.xlu0 %411 }
 0x1d9   :  { %v361_v62 = vsel %vm90_vm1, %v328_v57, %v330_v33  ;;  %v444_v5 = vsel %vm104_vm0, %v412_v61, %v3682_v41  ;;  %v443_v8 = vsel %vm104_vm0, %v410_v6, %v412_v61 }
 0x1da   :  { %v393_v24 = vmax.f32 %v3672_v40, %v361_v62  ;;  %v3838_v22 = vmax.f32 %v394_v56, %v444_v5 }
 0x1dc   :  { %v3841_v11 = vmax.f32 %v393_v24, %v443_v8  ;;  %v500_v40 = vsel %vm3712_vm15, %v3838_v22, 0.0 }
 0x1de   :  { %v499_v16 = vsel %vm3699_vm14, %v3841_v11, 0.0 }
 0x1df   :  { %2841 = vrot.lane.b32.xlu0 %v3769_v53, %s3342_s11  ;;  %v2820_v17 = vpack.i.bf16 %v500_v40, %v499_v16 }
 0x1e0   :  { %v418_v9 = vpop.permute.xlu1 %417 }
 0x1e1   :  { %v445_v27 = vsel %vm104_vm0, %v416_v42, %v418_v9  ;;  %v446_v47 = vsel %vm104_vm0, %v418_v9, %v3682_v41  ;;  %2821 = vrot.lane.b32.xlu2 %v2820_v17, %s3341_s14 }
 0x1e2   :  { %v3863_v48 = vmax.f32 %v395_v15, %v445_v27  ;;  %v3865_v26 = vmax.f32 %v396_v21, %v446_v47 }
 0x1e4   :  { %v501_v53 = vsel %vm3699_vm14, %v3863_v48, 0.0  ;;  %v502_v58 = vsel %vm3712_vm15, %v3865_v26, 0.0 }
 0x1e5   :  { %v2855_v59 = vpack.i.bf16 %v502_v58, %v501_v53 }
 0x1e7   :  { %2856 = vrot.lane.b32.xlu0 %v2855_v59, %s3342_s11  ;;  %2816 = vrot.lane.b32.xlu1 %v2855_v59, %s3341_s14 }
 0x1e9   :  { %2831 = vrot.lane.b32.xlu2 %v3790_v7, %s3342_s11  ;;  %v667_v7 = vld [vmem:[%s5426_s4] sm:$0xff] }
 0x1ef   :  { %683 = vperm.xlu0 %2782, %v669_v30   ;;  %2826 = vrot.lane.b32.xlu1 %v2805_v28, %s3342_s11  ;;  %v668_v28 = vld [vmem:[%s5426_s4 + $0x8] sm:$0xff]  ;;  %s3344_s4 = smov 124  }
 0x1f1   :  { %2851 = vrot.lane.b32.xlu2 %v3727_v10, %s3342_s11 }
 0x1f7   :  { %2846 = vrot.lane.b32.xlu1 %v3744_v23, %s3342_s11 }
 0x1f9   :  { %688 = vperm.xlu2 %2784, %v670_v31  }
 0x1ff   :  { %2861 = vrot.lane.b32.xlu1 %v2820_v17, %s3342_s11 }
 0x201   :  { %673 = vperm.xlu2 %2784, %v667_v7   ;;  %v3897_v29 = vpop.permute.xlu2 %2791 }
 0x202   :  { %v2794_v6 = vunpack.i.h.bf16 %v3897_v29  ;;  %v2793_v24 = vunpack.i.l.bf16 %v3897_v29  ;;  %v664_v29 = vld [vmem:[%s5425_s3 + $0x28] sm:$0xff] }
 0x204   :  { %v569_v17 = vsel %vm90_vm1, %v2793_v24, %v2794_v6 }
 0x207   :  { %678 = vperm.xlu1 %2783, %v668_v28  }
 0x211   :  { %v3895_v10 = vpop.permute.xlu0 %2786 }
 0x212   :  { %v2789_v38 = vunpack.i.h.bf16 %v3895_v10  ;;  %v2788_v13 = vunpack.i.l.bf16 %v3895_v10  ;;  %v665_v10 = vld [vmem:[%s5425_s3 + $0x30] sm:$0xff] }
 0x214   :  { %v567_v21 = vsel %vm90_vm1, %v2788_v13, %v2789_v38 }
 0x223   :  { %v3903_v33 = vpop.permute.xlu2 %2806 }
 0x224   :  { %v2809_v36 = vunpack.i.h.bf16 %v3903_v33  ;;  %v2808_v37 = vunpack.i.l.bf16 %v3903_v33  ;;  %v662_v33 = vld [vmem:[%s5425_s3 + $0x18] sm:$0xff] }
 0x226   :  { %v575_v5 = vsel %vm90_vm1, %v2808_v37, %v2809_v36 }
 0x229   :  { %v3899_v32 = vpop.permute.xlu1 %2796 }
 0x22a   :  { %v2799_v61 = vunpack.i.h.bf16 %v3899_v32  ;;  %v2798_v62 = vunpack.i.l.bf16 %v3899_v32 }
 0x22c   :  { %v571_v16 = vsel %vm90_vm1, %v2798_v62, %v2799_v61 }
 0x231   :  { %v3901_v23 = vpop.permute.xlu0 %2801 }
 0x232   :  { %v2804_v34 = vunpack.i.h.bf16 %v3901_v23  ;;  %v2803_v55 = vunpack.i.l.bf16 %v3901_v23  ;;  %v663_v23 = vld [vmem:[%s5425_s3 + $0x20] sm:$0xff] }
 0x234   :  { %v573_v8 = vsel %vm90_vm1, %v2803_v55, %v2804_v34 }
 0x23b   :  { %v3938_v40 = vpop.permute.xlu2 %2821 }
 0x23c   :  { %v2824_v9 = vunpack.i.h.bf16 %v3938_v40  ;;  %v2823_v27 = vunpack.i.l.bf16 %v3938_v40 }
 0x23e   :  { %v563_v30 = vsel %vm90_vm1, %v2823_v27, %v2824_v9 }
 0x243   :  { %v2832_v59 = vpop.permute.xlu2 %2831 }
 0x244   :  { %v2834_v28 = vunpack.i.h.bf16 %v2832_v59  ;;  %v2833_v37 = vunpack.i.l.bf16 %v2832_v59 }
 0x246   :  { %v637_v62 = vsel %vm104_vm0, %v2833_v37, %v2834_v28 }
 0x249   :  { %v3907_v39 = vpop.permute.xlu1 %2811  ;;  %v3909_v42 = vpop.permute.xlu0 %2836 }
 0x24a   :  { %v2814_v51 = vunpack.i.h.bf16 %v3907_v39  ;;  %v2813_v14 = vunpack.i.l.bf16 %v3907_v39  ;;  %v2839_v54 = vunpack.i.h.bf16 %v3909_v42  ;;  %v2838_v35 = vunpack.i.l.bf16 %v3909_v42 }
 0x24b   :  { %v574_v39 = vsel %vm90_vm1, %v2804_v34, %v3684_v45  ;;  %v570_v34 = vsel %vm90_vm1, %v2794_v6, %v3684_v45  ;;  %v564_v6 = vsel %vm90_vm1, %v2824_v9, %v3684_v45 }
 0x24c   :  { %v577_v56 = vsel %vm90_vm1, %v2813_v14, %v2814_v51  ;;  %v641_v57 = vsel %vm104_vm0, %v2838_v35, %v2839_v54 }
 0x24d   :  { %704 = vmatpush.msra.mxu2 %v577_v56  ;;  %741 = vmatpush.msra.mxu3 %v641_v57 }
 0x24f   :  { %705 = vmatpush.msra.mxu2 %v575_v5 }
 0x251   :  { %706 = vmatpush.msra.mxu2 %v573_v8  ;;  %v2842_v31 = vpop.permute.xlu0 %2841 }
 0x252   :  { %v2844_v55 = vunpack.i.h.bf16 %v2842_v31  ;;  %v2843_v56 = vunpack.i.l.bf16 %v2842_v31  ;;  %v578_v31 = vsel %vm90_vm1, %v2814_v51, %v3684_v45 }
 0x253   :  { %707 = vmatpush.msra.mxu2 %v571_v16 }
 0x254   :  { %v635_v5 = vsel %vm104_vm0, %v2843_v56, %v2844_v55 }
 0x255   :  { %708 = vmatpush.msra.mxu2 %v569_v17 }
 0x257   :  { %709 = vmatpush.msra.mxu2 %v567_v21 }
 0x259   :  { %v3946_v15 = vpop.permute.xlu1 %2816 }
 0x25a   :  { %v2819_v47 = vunpack.i.h.bf16 %v3946_v15  ;;  %v2818_v53 = vunpack.i.l.bf16 %v3946_v15 }
 0x25c   :  { %v565_v58 = vsel %vm90_vm1, %v2818_v53, %v2819_v47 }
 0x25d   :  { %710 = vmatpush.msra.mxu2 %v565_v58 }
 0x25f   :  { %711 = vmatpush.msra.mxu2 %v563_v30 }
 0x261   :  { %v2827_v7 = vpop.permute.xlu1 %2826  ;;  %2668 = vmatpush.msk.msra.mxu2 %vm3699_vm14, %v3819_v18  ;;  %v2852_v18 = vpop.permute.xlu2 %2851 }
 0x262   :  { %v2829_v14 = vunpack.i.h.bf16 %v2827_v7  ;;  %v2828_v35 = vunpack.i.l.bf16 %v2827_v7  ;;  %v2854_v8 = vunpack.i.h.bf16 %v2852_v18  ;;  %v636_v7 = vsel %vm104_vm0, %v2844_v55, %v3682_v41 }
 0x263   :  { %2669 = vmatpush.msk.msra.mxu2 %vm3699_vm14, %v3802_v25  ;;  %v2857_v25 = vpop.permute.xlu0 %2856 }
 0x264   :  { %v639_v57 = vsel %vm104_vm0, %v2828_v35, %v2829_v14  ;;  %v2859_v17 = vunpack.i.h.bf16 %v2857_v25  ;;  %v640_v30 = vsel %vm104_vm0, %v2829_v14, %v3682_v41  ;;  %v632_v51 = vsel %vm104_vm0, %v2854_v8, %v3682_v41 }
 0x265   :  { %2670 = vmatpush.msk.msra.mxu2 %vm3699_vm14, %v3778_v63  ;;  %742 = vmatpush.msra.mxu3 %v639_v57  ;;  %v2853_v63 = vunpack.i.l.bf16 %v2852_v18  ;;  %v566_v35 = vsel %vm90_vm1, %v2819_v47, %v3684_v45 }
 0x266   :  { %v630_v14 = vsel %vm104_vm0, %v2859_v17, %v3682_v41 }
 0x267   :  { %2671 = vmatpush.msk.msra.mxu2 %vm3699_vm14, %v3756_v46  ;;  %743 = vmatpush.msra.mxu3 %v637_v62  ;;  %v2858_v46 = vunpack.i.l.bf16 %v2857_v25  ;;  %v631_v27 = vsel %vm104_vm0, %v2853_v63, %v2854_v8 }
 0x269   :  { %v2847_v24 = vpop.permute.xlu1 %2846  ;;  %2672 = vmatpush.msk.msra.mxu2 %vm3699_vm14, %v3736_v20  ;;  %744 = vmatpush.msra.mxu3 %v635_v5  ;;  %v3986_v20 = vld [vmem:[%s5425_s3] sm:$0xff] }
 0x26a   :  { %v2849_v13 = vunpack.i.h.bf16 %v2847_v24  ;;  %v2848_v16 = vunpack.i.l.bf16 %v2847_v24 }
 0x26b   :  { %2673 = vmatpush.msk.msra.mxu2 %vm3699_vm14, %v3706_v0  ;;  %v642_v0 = vsel %vm104_vm0, %v2839_v54, %v3682_v41  ;;  %v661_v54 = vld [vmem:[%s5425_s3 + $0x10] sm:$0xff]  ;;  %v684_v57 = vpop.permute.xlu0 %683 }
 0x26c   :  { %v633_v21 = vsel %vm104_vm0, %v2848_v16, %v2849_v13  ;;  %v634_v37 = vsel %vm104_vm0, %v2849_v13, %v3682_v41 }
 0x26d   :  { %2674 = vmatpush.msk.msra.mxu2 %vm3699_vm14, %v3863_v48  ;;  %745 = vmatpush.msra.mxu3 %v633_v21  ;;  %v629_v48 = vsel %vm104_vm0, %v2858_v46, %v2859_v17 }
 0x26f   :  { %2675 = vmatpush.msk.msra.mxu2 %vm3699_vm14, %v3841_v11  ;;  %746 = vmatpush.msra.mxu3 %v631_v27  ;;  %v638_v11 = vsel %vm104_vm0, %v2834_v28, %v3682_v41  ;;  %v576_v28 = vsel %vm90_vm1, %v2809_v36, %v3684_v45  ;;  %v572_v36 = vsel %vm90_vm1, %v2799_v61, %v3684_v45  ;;  %vm1028_vm14 = vcmask 785408  }
 0x270   :  { %720 = vmatmul.f32.vlgmr.msra.gmra.mxu2 %v3986_v20  ;;  %v568_v61 = vsel %vm90_vm1, %v2789_v38, %v3684_v45  ;;  %v666_v38 = vld [vmem:[%s5425_s3 + $0x38] sm:$0xff] }
 0x271   :  { %799 = vmatpush.msrb.mxu2 %v642_v0  ;;  %v2862_v53 = vpop.permute.xlu1 %2861  ;;  %747 = vmatpush.msra.mxu3 %v629_v48 }
 0x272   :  { %v2864_v58 = vunpack.i.h.bf16 %v2862_v53  ;;  %v2863_v59 = vunpack.i.l.bf16 %v2862_v53 }
 0x273   :  { %800 = vmatpush.msrb.mxu2 %v640_v30 }
 0x274   :  { %v627_v42 = vsel %vm104_vm0, %v2863_v59, %v2864_v58  ;;  %v628_v32 = vsel %vm104_vm0, %v2864_v58, %v3682_v41 }
 0x275   :  { %801 = vmatpush.msrb.mxu2 %v638_v11  ;;  %748 = vmatpush.msra.mxu3 %v627_v42 }
 0x276   :  { %2676 = vmatmul.msk.f32.vlgmr.msra.gmra.mxu3 %vm691_vm3, %v660_v60 }
 0x277   :  { %762 = vmatpush.msrb.mxu3 %v578_v31  ;;  %802 = vmatpush.msrb.mxu2 %v636_v7 }
 0x278   :  { %723 = vmatmul.f32.gmra.mxu2 %v661_v54 }
 0x279   :  { %763 = vmatpush.msrb.mxu3 %v576_v28  ;;  %803 = vmatpush.msrb.mxu2 %v634_v37  ;;  %v679_v40 = vpop.permute.xlu1 %678 }
 0x27b   :  { %764 = vmatpush.msrb.mxu3 %v574_v39  ;;  %804 = vmatpush.msrb.mxu2 %v632_v51 }
 0x27d   :  { %765 = vmatpush.msrb.mxu3 %v572_v36  ;;  %805 = vmatpush.msrb.mxu2 %v630_v14 }
 0x27e   :  { %2677 = vmatmul.msk.f32.gmra.mxu3 %vm691_vm3, %v662_v33 }
 0x27f   :  { %766 = vmatpush.msrb.mxu3 %v570_v34  ;;  %806 = vmatpush.msrb.mxu2 %v628_v32 }
 0x280   :  { %726 = vmatmul.f32.gmra.mxu2 %v663_v23 }
 0x281   :  { %767 = vmatpush.msrb.mxu3 %v568_v61 }
 0x283   :  { %768 = vmatpush.msrb.mxu3 %v566_v35 }
 0x285   :  { %769 = vmatpush.msrb.mxu3 %v564_v6 }
 0x286   :  { %2678 = vmatmul.msk.f32.gmra.mxu3 %vm691_vm3, %v664_v29 }
 0x287   :  { %2680 = vmatpush.msk.msrb.mxu3 %vm3712_vm15, %v3821_v52 }
 0x288   :  { %729 = vmatmul.f32.gmra.mxu2 %v665_v10 }
 0x289   :  { %2681 = vmatpush.msk.msrb.mxu3 %vm3712_vm15, %v3798_v19  ;;  %v1172_v19 = vld [vmem:[%s5429_s7 + $0x18] sm:$0xff] }
 0x28b   :  { %2682 = vmatpush.msk.msrb.mxu3 %vm3712_vm15, %v3780_v4 }
 0x28d   :  { %2683 = vmatpush.msk.msrb.mxu3 %vm3712_vm15, %v3758_v50 }
 0x28e   :  { %2679 = vmatmul.msk.f32.gmra.mxu3 %vm691_vm3, %v666_v38 }
 0x28f   :  { %2684 = vmatpush.msk.msrb.mxu3 %vm3712_vm15, %v3732_v12 }
 0x290   :  { %2688 = vmatmul.msk.f32.vlgmr.msrb.gmra.mxu2 %vm691_vm3, %v660_v60 }
 0x291   :  { %2685 = vmatpush.msk.msrb.mxu3 %vm3712_vm15, %v3708_v2  ;;  %v689_v2 = vpop.permute.xlu2 %688 }
 0x293   :  { %2686 = vmatpush.msk.msrb.mxu3 %vm3712_vm15, %v3865_v26 }
 0x295   :  { %2687 = vmatpush.msk.msrb.mxu3 %vm3712_vm15, %v3838_v22  ;;  %vm1081_vm15 = vcmp.ge.s32.totalorder %v3521_v44, 9 }
 0x296   :  { %778 = vmatmul.f32.vlgmr.msrb.gmra.mxu3 %v3986_v20 }
 0x298   :  { %2689 = vmatmul.msk.f32.gmra.mxu2 %vm691_vm3, %v662_v33 }
 0x299   :  { %v674_v50 = vpop.permute.xlu2 %673 }
 0x29e   :  { %781 = vmatmul.f32.gmra.mxu3 %v661_v54 }
 0x2a0   :  { %2690 = vmatmul.msk.f32.gmra.mxu2 %vm691_vm3, %v664_v29 }
 0x2a6   :  { %784 = vmatmul.f32.gmra.mxu3 %v663_v23 }
 0x2a8   :  { %2691 = vmatmul.msk.f32.gmra.mxu2 %vm691_vm3, %v666_v38  ;;  %vm1083_vm3 = vcmp.lt.s32.totalorder %v3521_v44, 69 }
 0x2ae   :  { %787 = vmatmul.f32.gmra.mxu3 %v665_v10 }
 0x2f3   :  { %v721_v12 = vpop.f32.mrf.mxu2 }
 0x2f4   :  { %v722_v3 = vadd.f32 %v721_v12, %v674_v50 }
 0x2f9   :  { %v750_v4 = vpop.f32.mrf.mxu3 }
 0x2fa   :  { %v751_v52 = vadd.f32 %v750_v4, %v722_v3 }
 0x2fb   :  { %v724_v22 = vpop.f32.mrf.mxu2 }
 0x2fc   :  { %v4109_v26 = vsel %vm4103_vm6, %v751_v52, 0.0  ;;  %v725_v15 = vadd.f32 %v724_v22, %v679_v40 }
 0x2fd   :  { %846 = vrot.lane.b32.xlu1 %v4109_v26, %s3341_s14 }
 0x301   :  { %v753_v9 = vpop.f32.mrf.mxu3 }
 0x302   :  { %v754_v47 = vadd.f32 %v753_v9, %v725_v15 }
 0x303   :  { %v727_v55 = vpop.f32.mrf.mxu2 }
 0x304   :  { %v4115_v56 = vsel %vm4103_vm6, %v754_v47, 0.0  ;;  %v728_v62 = vadd.f32 %v727_v55, %v684_v57 }
 0x305   :  { %850 = vrot.lane.b32.xlu0 %v4115_v56, %s3341_s14 }
 0x309   :  { %v756_v18 = vpop.f32.mrf.mxu3 }
 0x30a   :  { %v757_v5 = vadd.f32 %v756_v18, %v728_v62 }
 0x30b   :  { %v730_v25 = vpop.f32.mrf.mxu2 }
 0x30c   :  { %v4121_v24 = vsel %vm4103_vm6, %v757_v5, 0.0  ;;  %v731_v8 = vadd.f32 %v730_v25, %v689_v2 }
 0x30d   :  { %854 = vrot.lane.b32.xlu2 %v4121_v24, %s3341_s14  ;;  %890 = vrot.lane.b32.xlu0 %v4115_v56, %s3342_s11 }
 0x311   :  { %v759_v63 = vpop.f32.mrf.mxu3 }
 0x312   :  { %v760_v13 = vadd.f32 %v759_v63, %v731_v8 }
 0x313   :  { %v808_v16 = vpop.f32.mrf.mxu2 }
 0x314   :  { %v4129_v17 = vsel %vm4103_vm6, %v760_v13, 0.0  ;;  %vm4329_vm6 = vmand %vm1081_vm15, %vm1083_vm3 }
 0x315   :  { %894 = vrot.lane.b32.xlu2 %v4121_v24, %s3342_s11  ;;  %858 = vrot.lane.b32.xlu0 %v4129_v17, %s3341_s14 }
 0x316   :  { %898 = vrot.lane.b32.xlu1 %v4129_v17, %s3342_s11 }
 0x319   :  { %v779_v46 = vpop.f32.mrf.mxu3 }
 0x31a   :  { %v780_v21 = vadd.f32 %v779_v46, %v674_v50 }
 0x31b   :  { %v811_v0 = vpop.f32.mrf.mxu2 }
 0x31c   :  { %v809_v27 = vadd.f32 %v808_v16, %v780_v21 }
 0x31e   :  { %v4147_v48 = vsel %vm4141_vm9, %v809_v27, 0.0 }
 0x31f   :  { %848 = vrot.lane.b32.xlu2 %v4147_v48, %s3341_s14 }
 0x321   :  { %v782_v53 = vpop.f32.mrf.mxu3 }
 0x322   :  { %v783_v58 = vadd.f32 %v782_v53, %v679_v40 }
 0x323   :  { %v814_v60 = vpop.f32.mrf.mxu2 }
 0x324   :  { %v812_v59 = vadd.f32 %v811_v0, %v783_v58 }
 0x326   :  { %v4153_v30 = vsel %vm4141_vm9, %v812_v59, 0.0 }
 0x327   :  { %852 = vrot.lane.b32.xlu1 %v4153_v30, %s3341_s14 }
 0x329   :  { %v785_v11 = vpop.f32.mrf.mxu3 }
 0x32a   :  { %v786_v42 = vadd.f32 %v785_v11, %v684_v57 }
 0x32b   :  { %v817_v28 = vpop.f32.mrf.mxu2 }
 0x32c   :  { %v815_v54 = vadd.f32 %v814_v60, %v786_v42 }
 0x32e   :  { %v835_v31 = vsel %vm4141_vm9, %v815_v54, 0.0 }
 0x32f   :  { %856 = vrot.lane.b32.xlu0 %v835_v31, %s3341_s14 }
 0x331   :  { %v788_v7 = vpop.f32.mrf.mxu3 }
 0x332   :  { %v789_v37 = vadd.f32 %v788_v7, %v689_v2 }
 0x334   :  { %v818_v39 = vadd.f32 %v817_v28, %v789_v37 }
 0x336   :  { %v837_v51 = vsel %vm4141_vm9, %v818_v39, 0.0  ;;  %vm1141_vm9 = vcmask 1022976  }
 0x337   :  { %900 = vrot.lane.b32.xlu2 %v837_v51, %s3342_s11  ;;  %896 = vrot.lane.b32.xlu0 %v835_v31, %s3342_s11 }
 0x338   :  { %860 = vrot.lane.b32.xlu1 %v837_v51, %s3341_s14 }
 0x33f   :  { %888 = vrot.lane.b32.xlu0 %v4147_v48, %s3342_s11  ;;  %886 = vrot.lane.b32.xlu2 %v4109_v26, %s3342_s11 }
 0x340   :  { %892 = vrot.lane.b32.xlu1 %v4153_v30, %s3342_s11 }
 0x367   :  { %v855_v36 = vpop.permute.xlu2 %854 }
 0x36f   :  { %v847_v23 = vpop.permute.xlu1 %846  ;;  %v895_v34 = vpop.permute.xlu2 %894 }
 0x377   :  { %v851_v33 = vpop.permute.xlu0 %850 }
 0x379   :  { %v849_v35 = vpop.permute.xlu2 %848 }
 0x37a   :  { %v862_v57 = vsel %vm90_vm1, %v847_v23, %v849_v35  ;;  %v863_v63 = vsel %vm90_vm1, %v849_v35, %v3684_v45 }
 0x37b   :  { %v878_v0 = vmax.f32 %v4109_v26, %v862_v57  ;;  %v879_v53 = vmax.f32 %v4147_v48, %v863_v63 }
 0x37f   :  { %v891_v14 = vpop.permute.xlu0 %890 }
 0x387   :  { %v859_v32 = vpop.permute.xlu0 %858 }
 0x388   :  { %v899_v61 = vpop.permute.xlu1 %898 }
 0x391   :  { %v901_v2 = vpop.permute.xlu2 %900 }
 0x392   :  { %v908_v5 = vsel %vm104_vm0, %v899_v61, %v901_v2  ;;  %v909_v25 = vsel %vm104_vm0, %v901_v2, %v3682_v41 }
 0x399   :  { %v853_v6 = vpop.permute.xlu1 %852  ;;  %v887_v58 = vpop.permute.xlu2 %886 }
 0x39a   :  { %v864_v46 = vsel %vm90_vm1, %v851_v33, %v853_v6  ;;  %v865_v21 = vsel %vm90_vm1, %v853_v6, %v3684_v45 }
 0x39b   :  { %v880_v11 = vmax.f32 %v4115_v56, %v864_v46  ;;  %v881_v42 = vmax.f32 %v4153_v30, %v865_v21 }
 0x3a1   :  { %v857_v29 = vpop.permute.xlu0 %856 }
 0x3a2   :  { %v866_v10 = vsel %vm90_vm1, %v855_v36, %v857_v29  ;;  %v867_v38 = vsel %vm90_vm1, %v857_v29, %v3684_v45 }
 0x3a3   :  { %v882_v50 = vmax.f32 %v4121_v24, %v866_v10  ;;  %v883_v3 = vmax.f32 %v835_v31, %v867_v38 }
 0x3a9   :  { %v897_v4 = vpop.permute.xlu0 %896 }
 0x3aa   :  { %v906_v52 = vsel %vm104_vm0, %v895_v34, %v897_v4  ;;  %v907_v22 = vsel %vm104_vm0, %v897_v4, %v3682_v41  ;;  %v861_v40 = vpop.permute.xlu1 %860  ;;  %v1017_v34 = vld [vmem:[%s5428_s6 + $0x8] sm:$0xff] }
 0x3ab   :  { %v4192_v15 = vmax.f32 %v882_v50, %v906_v52  ;;  %v4194_v9 = vmax.f32 %v883_v3, %v907_v22  ;;  %v868_v47 = vsel %vm90_vm1, %v859_v32, %v861_v40  ;;  %v869_v55 = vsel %vm90_vm1, %v861_v40, %v3684_v45  ;;  %v1016_v32 = vld [vmem:[%s5428_s6] sm:$0xff] }
 0x3ac   :  { %v884_v62 = vmax.f32 %v4129_v17, %v868_v47  ;;  %v885_v18 = vmax.f32 %v837_v51, %v869_v55 }
 0x3ad   :  { %v938_v24 = vsel %vm4178_vm12, %v4192_v15, 0.0  ;;  %v939_v8 = vsel %vm4185_vm13, %v4194_v9, 0.0 }
 0x3ae   :  { %v4212_v13 = vmax.f32 %v884_v62, %v908_v5  ;;  %v4214_v16 = vmax.f32 %v885_v18, %v909_v25  ;;  %v2870_v17 = vpack.i.bf16 %v939_v8, %v938_v24 }
 0x3b0   :  { %2871 = vrot.lane.b32.xlu2 %v2870_v17, %s3342_s11  ;;  %v940_v20 = vsel %vm4178_vm12, %v4212_v13, 0.0  ;;  %v941_v27 = vsel %vm4185_vm13, %v4214_v16, 0.0 }
 0x3b1   :  { %v889_v59 = vpop.permute.xlu0 %888  ;;  %v2875_v60 = vpack.i.bf16 %v941_v27, %v940_v20 }
 0x3b2   :  { %v902_v54 = vsel %vm104_vm0, %v887_v58, %v889_v59  ;;  %v903_v31 = vsel %vm104_vm0, %v889_v59, %v3682_v41  ;;  %v893_v7 = vpop.permute.xlu1 %892 }
 0x3b3   :  { %v4233_v28 = vmax.f32 %v878_v0, %v902_v54  ;;  %v4235_v37 = vmax.f32 %v879_v53, %v903_v31  ;;  %v904_v26 = vsel %vm104_vm0, %v891_v14, %v893_v7  ;;  %v905_v48 = vsel %vm104_vm0, %v893_v7, %v3682_v41  ;;  %2876 = vrot.lane.b32.xlu1 %v2875_v60, %s3342_s11 }
 0x3b4   :  { %v4241_v56 = vmax.f32 %v880_v11, %v904_v26  ;;  %v4243_v30 = vmax.f32 %v881_v42, %v905_v48 }
 0x3b5   :  { %v934_v39 = vsel %vm4178_vm12, %v4233_v28, 0.0  ;;  %v935_v51 = vsel %vm4185_vm13, %v4235_v37, 0.0 }
 0x3b6   :  { %v936_v33 = vsel %vm4178_vm12, %v4241_v56, 0.0  ;;  %v937_v36 = vsel %vm4185_vm13, %v4243_v30, 0.0  ;;  %v2880_v23 = vpack.i.bf16 %v935_v51, %v934_v39 }
 0x3b7   :  { %v2865_v14 = vpack.i.bf16 %v937_v36, %v936_v33 }
 0x3b8   :  { %2896 = vrot.lane.b32.xlu2 %v2875_v60, %s3341_s14 }
 0x3b9   :  { %2866 = vrot.lane.b32.xlu0 %v2865_v14, %s3342_s11 }
 0x3bb   :  { %2881 = vrot.lane.b32.xlu1 %v2880_v23, %s3342_s11 }
 0x3c0   :  { %2901 = vrot.lane.b32.xlu2 %v2880_v23, %s3341_s14 }
 0x3c1   :  { %2886 = vrot.lane.b32.xlu0 %v2870_v17, %s3341_s14 }
 0x3c3   :  { %2891 = vrot.lane.b32.xlu1 %v2865_v14, %s3341_s14 }
 0x3c9   :  { %1025 = vperm.xlu0 %2782, %v1017_v34  }
 0x3cb   :  { %1020 = vperm.xlu1 %2783, %v1016_v32  }
 0x3d1   :  { %1154 = vrot.lane.b32.xlu0 %v3340_v1, %s3344_s4 }
 0x40a   :  { %v2872_v61 = vpop.permute.xlu2 %2871 }
 0x40b   :  { %v2874_v29 = vunpack.i.h.bf16 %v2872_v61  ;;  %v2873_v6 = vunpack.i.l.bf16 %v2872_v61 }
 0x40d   :  { %v1002_v4 = vsel %vm104_vm0, %v2873_v6, %v2874_v29  ;;  %v1003_v52 = vsel %vm104_vm0, %v2874_v29, %v3682_v41  ;;  %v1176_v29 = vld [vmem:[%s5430_s8 + $0x18] sm:$0xff]  ;;  %v1173_v6 = vld [vmem:[%s5430_s8] sm:$0xff] }
 0x412   :  { %v2897_v2 = vpop.permute.xlu2 %2896 }
 0x413   :  { %v2899_v55 = vunpack.i.h.bf16 %v2897_v2  ;;  %v2898_v57 = vunpack.i.l.bf16 %v2897_v2 }
 0x415   :  { %v972_v46 = vsel %vm90_vm1, %v2898_v57, %v2899_v55  ;;  %v973_v21 = vsel %vm90_vm1, %v2899_v55, %v3684_v45 }
 0x41a   :  { %v2902_v17 = vpop.permute.xlu2 %2901 }
 0x41b   :  { %v2904_v53 = vunpack.i.h.bf16 %v2902_v17  ;;  %v2903_v58 = vunpack.i.l.bf16 %v2902_v17 }
 0x41d   :  { %v966_v26 = vsel %vm90_vm1, %v2903_v58, %v2904_v53  ;;  %v967_v48 = vsel %vm90_vm1, %v2904_v53, %v3684_v45 }
 0x425   :  { %v2877_v35 = vpop.permute.xlu1 %2876 }
 0x426   :  { %v2879_v10 = vunpack.i.h.bf16 %v2877_v35  ;;  %v2878_v38 = vunpack.i.l.bf16 %v2877_v35 }
 0x428   :  { %v1004_v50 = vsel %vm104_vm0, %v2878_v38, %v2879_v10  ;;  %v1005_v3 = vsel %vm104_vm0, %v2879_v10, %v3682_v41  ;;  %v1174_v10 = vld [vmem:[%s5430_s8 + $0x8] sm:$0xff] }
 0x429   :  { %1039 = vmatpush.msrb.mxu0 %v1004_v50  ;;  %1062 = vmatpush.msrb.mxu1 %v1005_v3 }
 0x42b   :  { %v2867_v22 = vpop.permute.xlu0 %2866  ;;  %1040 = vmatpush.msrb.mxu0 %v1002_v4  ;;  %1063 = vmatpush.msrb.mxu1 %v1003_v52 }
 0x42c   :  { %v2869_v40 = vunpack.i.h.bf16 %v2867_v22  ;;  %v2868_v47 = vunpack.i.l.bf16 %v2867_v22 }
 0x42d   :  { %v2882_v62 = vpop.permute.xlu1 %2881 }
 0x42e   :  { %v2884_v18 = vunpack.i.h.bf16 %v2882_v62  ;;  %v2883_v5 = vunpack.i.l.bf16 %v2882_v62  ;;  %v1000_v25 = vsel %vm104_vm0, %v2868_v47, %v2869_v40  ;;  %v1001_v24 = vsel %vm104_vm0, %v2869_v40, %v3682_v41 }
 0x42f   :  { %1041 = vmatpush.msrb.mxu0 %v1000_v25  ;;  %1064 = vmatpush.msrb.mxu1 %v1001_v24 }
 0x430   :  { %v998_v8 = vsel %vm104_vm0, %v2883_v5, %v2884_v18  ;;  %v999_v63 = vsel %vm104_vm0, %v2884_v18, %v3682_v41 }
 0x431   :  { %1042 = vmatpush.msrb.mxu0 %v998_v8  ;;  %1065 = vmatpush.msrb.mxu1 %v999_v63 }
 0x433   :  { %v2887_v20 = vpop.permute.xlu0 %2886  ;;  %1043 = vmatpush.msrb.mxu0 %v972_v46  ;;  %1066 = vmatpush.msrb.mxu1 %v973_v21 }
 0x434   :  { %v2889_v27 = vunpack.i.h.bf16 %v2887_v20  ;;  %v2888_v0 = vunpack.i.l.bf16 %v2887_v20 }
 0x435   :  { %v2892_v59 = vpop.permute.xlu1 %2891 }
 0x436   :  { %v2894_v60 = vunpack.i.h.bf16 %v2892_v59  ;;  %v2893_v11 = vunpack.i.l.bf16 %v2892_v59  ;;  %v970_v42 = vsel %vm90_vm1, %v2888_v0, %v2889_v27  ;;  %v971_v54 = vsel %vm90_vm1, %v2889_v27, %v3684_v45 }
 0x437   :  { %1044 = vmatpush.msrb.mxu0 %v970_v42  ;;  %1067 = vmatpush.msrb.mxu1 %v971_v54 }
 0x438   :  { %v968_v31 = vsel %vm90_vm1, %v2893_v11, %v2894_v60  ;;  %v969_v7 = vsel %vm90_vm1, %v2894_v60, %v3684_v45 }
 0x439   :  { %1045 = vmatpush.msrb.mxu0 %v968_v31  ;;  %1068 = vmatpush.msrb.mxu1 %v969_v7 }
 0x43b   :  { %1046 = vmatpush.msrb.mxu0 %v966_v26  ;;  %1069 = vmatpush.msrb.mxu1 %v967_v48  ;;  %v1026_v33 = vpop.permute.xlu0 %1025 }
 0x43d   :  { %2692 = vmatpush.msk.msrb.mxu0 %vm4178_vm12, %v4212_v13  ;;  %2698 = vmatpush.msk.msrb.mxu1 %vm4185_vm13, %v4214_v16  ;;  %v1014_v13 = vld [vmem:[%s5427_s5] sm:$0xff]  ;;  %v1021_v12 = vpop.permute.xlu1 %1020 }
 0x43f   :  { %2693 = vmatpush.msk.msrb.mxu0 %vm4178_vm12, %v4192_v15  ;;  %2699 = vmatpush.msk.msrb.mxu1 %vm4185_vm13, %v4194_v9  ;;  %v1015_v15 = vld [vmem:[%s5427_s5 + $0x8] sm:$0xff]  ;;  %s3345_s5 = smov 125  }
 0x441   :  { %2694 = vmatpush.msk.msrb.mxu0 %vm4178_vm12, %v4241_v56  ;;  %2700 = vmatpush.msk.msrb.mxu1 %vm4185_vm13, %v4243_v30 }
 0x443   :  { %2695 = vmatpush.msk.msrb.mxu0 %vm4178_vm12, %v4233_v28  ;;  %2701 = vmatpush.msk.msrb.mxu1 %vm4185_vm13, %v4235_v37  ;;  %v1155_v50 = vpop.permute.xlu0 %1154  ;;  %vm1271_vm12 = vcmp.lt.s32.totalorder %v3528_v49, 68  ;;  %vm1268_vm13 = vcmp.ge.s32.totalorder %v3521_v44, 6 }
 0x444   :  { %2696 = vmatmul.msk.f32.vlgmr.msrb.gmra.mxu0 %vm1028_vm14, %v1014_v13  ;;  %2702 = vmatmul.msk.f32.vlgmr.msrb.gmra.mxu1 %vm1028_vm14, %v1014_v13  ;;  %vm4429_vm15 = vmand %vm1269_vm11, %vm1271_vm12  ;;  %vm2152_vm11 = vcmp.lt.s32.totalorder %v3521_v44, 66  ;;  %vm2151_vm12 = vcmp.ge.s32.totalorder %v3528_v49, 2 }
 0x44c   :  { %2697 = vmatmul.msk.f32.gmra.mxu0 %vm1028_vm14, %v1015_v15  ;;  %2703 = vmatmul.msk.f32.gmra.mxu1 %vm1028_vm14, %v1015_v15  ;;  %vm1270_vm14 = vcmp.lt.s32.totalorder %v3521_v44, 68 }
 0x44d   :  { %vm4435_vm3 = vmand %vm1268_vm13, %vm1270_vm14  ;;  %vm2153_vm13 = vcmp.lt.s32.totalorder %v3528_v49, 66 }
 0x4c1   :  { %v1052_v9 = vpop.f32.mrf.mxu0  ;;  %v1075_v16 = vpop.f32.mrf.mxu1 }
 0x4c2   :  { %v4337_v37 = vadd.f32 %v1052_v9, %v1021_v12  ;;  %v4339_v56 = vadd.f32 %v1075_v16, %v1021_v12 }
 0x4c4   :  { %v1091_v30 = vsel %vm4329_vm6, %v4337_v37, 0.0  ;;  %v1092_v39 = vsel %vm4333_vm7, %v4339_v56, 0.0 }
 0x4c5   :  { %v2910_v51 = vpack.i.bf16 %v1092_v39, %v1091_v30 }
 0x4c7   :  { %2911 = vrot.lane.b32.xlu2 %v2910_v51, %s3345_s5  ;;  %2906 = vrot.lane.b32.xlu0 %v2910_v51, %s3344_s4 }
 0x4c9   :  { %v1055_v36 = vpop.f32.mrf.mxu0  ;;  %v1078_v14 = vpop.f32.mrf.mxu1 }
 0x4ca   :  { %v4349_v23 = vadd.f32 %v1055_v36, %v1026_v33  ;;  %v4351_v34 = vadd.f32 %v1078_v14, %v1026_v33  ;;  %v1170_v33 = vld [vmem:[%s5429_s7 + $0x8] sm:$0xff]  ;;  %v1171_v36 = vld [vmem:[%s5429_s7 + $0x10] sm:$0xff] }
 0x4cc   :  { %v1093_v32 = vsel %vm4329_vm6, %v4349_v23, 0.0  ;;  %v1094_v61 = vsel %vm4333_vm7, %v4351_v34, 0.0 }
 0x4cd   :  { %v2925_v35 = vpack.i.bf16 %v1094_v61, %v1093_v32  ;;  %v1394_v32 = vld [vmem:[%s5431_s9 + $0x20] sm:$0xff] }
 0x4cf   :  { %2926 = vrot.lane.b32.xlu1 %v2925_v35, %s3345_s5  ;;  %2916 = vrot.lane.b32.xlu2 %v2925_v35, %s3344_s4 }
 0x4d0   :  { %1135 = vrot.lane.b32.xlu0 %v3340_v1, %s3345_s5  ;;  %v1175_v1 = vld [vmem:[%s5430_s8 + $0x10] sm:$0xff] }
 0x4d7   :  { %2931 = vrot.lane.b32.xlu1 %v2925_v35, %s3342_s11  ;;  %2921 = vrot.lane.b32.xlu2 %v2910_v51, %s3342_s11 }
 0x4d8   :  { %1194 = vperm.xlu0 %2782, %v1176_v29  }
 0x4df   :  { %2936 = vrot.lane.b32.xlu1 %v2925_v35, %s3341_s14  ;;  %2941 = vrot.lane.b32.xlu2 %v2910_v51, %s3341_s14  ;;  %v1169_v51 = vld [vmem:[%s5429_s7] sm:$0xff]  ;;  %v1393_v35 = vld [vmem:[%s5431_s9 + $0x18] sm:$0xff] }
 0x4e0   :  { %1179 = vperm.xlu0 %2782, %v1173_v6  }
 0x4e7   :  { %1189 = vperm.xlu1 %2783, %v1175_v1   ;;  %1184 = vperm.xlu2 %2784, %v1174_v10  }
 0x521   :  { %v2912_v38 = vpop.permute.xlu2 %2911 }
 0x522   :  { %v2914_v5 = vunpack.i.h.bf16 %v2912_v38  ;;  %v2913_v25 = vunpack.i.l.bf16 %v2912_v38 }
 0x524   :  { %v1142_v20 = vsel %vm1141_vm9, %v2913_v25, %v2914_v5 }
 0x529   :  { %v2917_v2 = vpop.permute.xlu2 %2916 }
 0x52a   :  { %v2919_v3 = vunpack.i.h.bf16 %v2917_v2  ;;  %v2918_v4 = vunpack.i.l.bf16 %v2917_v2 }
 0x52c   :  { %v1164_v52 = vsel %vm1160_vm8, %v2919_v3, %v1155_v50  ;;  %v1163_v22 = vsel %vm1160_vm8, %v2918_v4, %v2919_v3 }
 0x52d   :  { %1216 = vmatpush.msra.mxu3 %v1163_v22  ;;  %1245 = vmatpush.msra.mxu0 %v1164_v52 }
 0x531   :  { %v2922_v21 = vpop.permute.xlu2 %2921 }
 0x532   :  { %v2924_v53 = vunpack.i.h.bf16 %v2922_v21  ;;  %v2923_v58 = vunpack.i.l.bf16 %v2922_v21 }
 0x534   :  { %v1123_v54 = vsel %vm104_vm0, %v2923_v58, %v2924_v53  ;;  %v1124_v31 = vsel %vm104_vm0, %v2924_v53, %v3682_v41  ;;  %v1400_v53 = vld [vmem:[%s5432_s10 + $0x10] sm:$0xff]  ;;  %v1401_v58 = vld [vmem:[%s5432_s10 + $0x18] sm:$0xff] }
 0x539   :  { %v2907_v40 = vpop.permute.xlu0 %2906  ;;  %v2942_v7 = vpop.permute.xlu2 %2941 }
 0x53a   :  { %v2909_v47 = vunpack.i.h.bf16 %v2907_v40  ;;  %v2908_v55 = vunpack.i.l.bf16 %v2907_v40  ;;  %v2944_v48 = vunpack.i.h.bf16 %v2942_v7  ;;  %v2943_v13 = vunpack.i.l.bf16 %v2942_v7 }
 0x53c   :  { %v1161_v57 = vsel %vm1160_vm8, %v2908_v55, %v2909_v47  ;;  %v1162_v62 = vsel %vm1160_vm8, %v2909_v47, %v1155_v50  ;;  %v1107_v30 = vsel %vm90_vm1, %v2943_v13, %v2944_v48  ;;  %v1108_v39 = vsel %vm90_vm1, %v2944_v48, %v3684_v45  ;;  %vm4607_vm8 = vmand %vm1529_vm4, %vm1531_vm5 }
 0x53d   :  { %1217 = vmatpush.msra.mxu3 %v1161_v57  ;;  %1246 = vmatpush.msra.mxu0 %v1162_v62  ;;  %vm2617_vm4 = vcmp.lt.s32.totalorder %v3521_v44, 65 }
 0x541   :  { %v2927_v18 = vpop.permute.xlu1 %2926  ;;  %v1185_v14 = vpop.permute.xlu2 %1184 }
 0x542   :  { %v2929_v24 = vunpack.i.h.bf16 %v2927_v18  ;;  %v2928_v8 = vunpack.i.l.bf16 %v2927_v18  ;;  %v4379_v63 = vpop.permute.xlu0 %1135 }
 0x543   :  { %v1143_v27 = vsel %vm1141_vm9, %v2914_v5, %v4379_v63 }
 0x544   :  { %v1144_v17 = vsel %vm1141_vm9, %v2928_v8, %v2929_v24  ;;  %v1145_v46 = vsel %vm1141_vm9, %v2929_v24, %v4379_v63 }
 0x545   :  { %1218 = vmatpush.msra.mxu3 %v1144_v17  ;;  %1247 = vmatpush.msra.mxu0 %v1145_v46 }
 0x547   :  { %1219 = vmatpush.msra.mxu3 %v1142_v20  ;;  %1248 = vmatpush.msra.mxu0 %v1143_v27  ;;  %v1403_v27 = vld [vmem:[%s5432_s10 + $0x28] sm:$0xff] }
 0x549   :  { %v2932_v0 = vpop.permute.xlu1 %2931 }
 0x54a   :  { %v2934_v59 = vunpack.i.h.bf16 %v2932_v0  ;;  %v2933_v60 = vunpack.i.l.bf16 %v2932_v0  ;;  %v1195_v4 = vpop.permute.xlu0 %1194  ;;  %v1404_v0 = vld [vmem:[%s5432_s10 + $0x30] sm:$0xff] }
 0x54c   :  { %v1125_v11 = vsel %vm104_vm0, %v2933_v60, %v2934_v59  ;;  %v1126_v42 = vsel %vm104_vm0, %v2934_v59, %v3682_v41  ;;  %v1405_v59 = vld [vmem:[%s5432_s10 + $0x38] sm:$0xff]  ;;  %v1398_v60 = vld [vmem:[%s5432_s10] sm:$0xff] }
 0x54d   :  { %1220 = vmatpush.msra.mxu3 %v1125_v11  ;;  %1249 = vmatpush.msra.mxu0 %v1126_v42  ;;  %v1402_v11 = vld [vmem:[%s5432_s10 + $0x20] sm:$0xff]  ;;  %v1399_v42 = vld [vmem:[%s5432_s10 + $0x8] sm:$0xff] }
 0x54f   :  { %1221 = vmatpush.msra.mxu3 %v1123_v54  ;;  %1250 = vmatpush.msra.mxu0 %v1124_v31 }
 0x551   :  { %v2937_v26 = vpop.permute.xlu1 %2936 }
 0x552   :  { %v2939_v15 = vunpack.i.h.bf16 %v2937_v26  ;;  %v2938_v12 = vunpack.i.l.bf16 %v2937_v26  ;;  %v1180_v25 = vpop.permute.xlu0 %1179 }
 0x554   :  { %v1109_v9 = vsel %vm90_vm1, %v2938_v12, %v2939_v15  ;;  %v1110_v16 = vsel %vm90_vm1, %v2939_v15, %v3684_v45 }
 0x555   :  { %1222 = vmatpush.msra.mxu3 %v1109_v9  ;;  %1251 = vmatpush.msra.mxu0 %v1110_v16 }
 0x557   :  { %1223 = vmatpush.msra.mxu3 %v1107_v30  ;;  %1252 = vmatpush.msra.mxu0 %v1108_v39 }
 0x559   :  { %2704 = vmatpush.msk.msra.mxu3 %vm4329_vm6, %v4349_v23  ;;  %2710 = vmatpush.msk.msra.mxu0 %vm4333_vm7, %v4351_v34  ;;  %v1190_v38 = vpop.permute.xlu1 %1189 }
 0x55b   :  { %2705 = vmatpush.msk.msra.mxu3 %vm4329_vm6, %v4337_v37  ;;  %2711 = vmatpush.msk.msra.mxu0 %vm4333_vm7, %v4339_v56  ;;  %vm1528_vm6 = vcmp.ge.s32.totalorder %v3521_v44, 4  ;;  %vm1530_vm7 = vcmp.lt.s32.totalorder %v3521_v44, 67 }
 0x55c   :  { %2706 = vmatmul.msk.f32.vlgmr.msra.gmra.mxu3 %vm1197_vm10, %v1169_v51  ;;  %2712 = vmatmul.msk.f32.vlgmr.msra.gmra.mxu0 %vm1197_vm10, %v1169_v51 }
 0x564   :  { %2707 = vmatmul.msk.f32.gmra.mxu3 %vm1197_vm10, %v1170_v33  ;;  %2713 = vmatmul.msk.f32.gmra.mxu0 %vm1197_vm10, %v1170_v33 }
 0x56c   :  { %2708 = vmatmul.msk.f32.gmra.mxu3 %vm1197_vm10, %v1171_v36  ;;  %2714 = vmatmul.msk.f32.gmra.mxu0 %vm1197_vm10, %v1171_v36 }
 0x574   :  { %2709 = vmatmul.msk.f32.gmra.mxu3 %vm1197_vm10, %v1172_v19  ;;  %2715 = vmatmul.msk.f32.gmra.mxu0 %vm1197_vm10, %v1172_v19  ;;  %vm4613_vm10 = vmand %vm1528_vm6, %vm1530_vm7  ;;  %vm2630_vm7 = vcmp.lt.s32.totalorder %v69_v43, 256 }
 0x5d9   :  { %v1256_v28 = vpop.f32.mrf.mxu0 }
 0x5da   :  { %v4472_v17 = vadd.f32 %v1256_v28, %v1180_v25 }
 0x5dc   :  { %v1279_v21 = vsel %vm4429_vm15, %v4472_v17, 0.0 }
 0x5df   :  { %v1227_v37 = vpop.f32.mrf.mxu3 }
 0x5e0   :  { %v4468_v8 = vadd.f32 %v1227_v37, %v1180_v25 }
 0x5e1   :  { %v1259_v56 = vpop.f32.mrf.mxu0 }
 0x5e2   :  { %v4427_v23 = vadd.f32 %v1259_v56, %v1185_v14  ;;  %v1278_v46 = vsel %vm4435_vm3, %v4468_v8, 0.0 }
 0x5e3   :  { %v2980_v20 = vpack.i.bf16 %v1279_v21, %v1278_v46 }
 0x5e4   :  { %v1281_v6 = vsel %vm4429_vm15, %v4427_v23, 0.0 }
 0x5e7   :  { %v1230_v34 = vpop.f32.mrf.mxu3 }
 0x5e8   :  { %v4433_v61 = vadd.f32 %v1230_v34, %v1185_v14 }
 0x5e9   :  { %v1262_v29 = vpop.f32.mrf.mxu0 }
 0x5ea   :  { %v1280_v1 = vsel %vm4435_vm3, %v4433_v61, 0.0  ;;  %v4446_v2 = vadd.f32 %v1262_v29, %v1190_v38 }
 0x5eb   :  { %v2945_v10 = vpack.i.bf16 %v1281_v6, %v1280_v1 }
 0x5ec   :  { %v1283_v52 = vsel %vm4429_vm15, %v4446_v2, 0.0 }
 0x5ed   :  { %2946 = vrot.lane.b32.xlu0 %v2945_v10, %s3345_s5 }
 0x5ef   :  { %v1233_v50 = vpop.f32.mrf.mxu3 }
 0x5f0   :  { %v4448_v3 = vadd.f32 %v1233_v50, %v1190_v38 }
 0x5f1   :  { %v1265_v40 = vpop.f32.mrf.mxu0 }
 0x5f2   :  { %v1282_v22 = vsel %vm4435_vm3, %v4448_v3, 0.0  ;;  %v4458_v55 = vadd.f32 %v1265_v40, %v1195_v4 }
 0x5f3   :  { %v2950_v47 = vpack.i.bf16 %v1283_v52, %v1282_v22 }
 0x5f4   :  { %v1285_v18 = vsel %vm4429_vm15, %v4458_v55, 0.0 }
 0x5f5   :  { %2951 = vrot.lane.b32.xlu2 %v2950_v47, %s3345_s5  ;;  %2966 = vrot.lane.b32.xlu0 %v2950_v47, %s3342_s11 }
 0x5f7   :  { %v1236_v57 = vpop.f32.mrf.mxu3 }
 0x5f8   :  { %v4460_v62 = vadd.f32 %v1236_v57, %v1195_v4 }
 0x5fa   :  { %v1284_v5 = vsel %vm4435_vm3, %v4460_v62, 0.0 }
 0x5fb   :  { %v2955_v24 = vpack.i.bf16 %v1285_v18, %v1284_v5 }
 0x5fd   :  { %2956 = vrot.lane.b32.xlu1 %v2955_v24, %s3345_s5  ;;  %2976 = vrot.lane.b32.xlu2 %v2955_v24, %s3342_s11 }
 0x5fe   :  { %2996 = vrot.lane.b32.xlu0 %v2955_v24, %s3341_s14 }
 0x605   :  { %2981 = vrot.lane.b32.xlu2 %v2980_v20, %s3342_s11  ;;  %2961 = vrot.lane.b32.xlu1 %v2980_v20, %s3345_s5 }
 0x606   :  { %3001 = vrot.lane.b32.xlu0 %v2980_v20, %s3341_s14 }
 0x60d   :  { %2991 = vrot.lane.b32.xlu2 %v2945_v10, %s3341_s14  ;;  %2971 = vrot.lane.b32.xlu1 %v2945_v10, %s3342_s11 }
 0x60e   :  { %1433 = vperm.xlu0 %2782, %v1403_v27  }
 0x615   :  { %1438 = vperm.xlu2 %2784, %v1404_v0   ;;  %2986 = vrot.lane.b32.xlu1 %v2950_v47, %s3341_s14 }
 0x616   :  { %1418 = vperm.xlu0 %2782, %v1400_v53  }
 0x61d   :  { %1423 = vperm.xlu2 %2784, %v1401_v58   ;;  %1443 = vperm.xlu1 %2783, %v1405_v59  }
 0x625   :  { %1408 = vperm.xlu2 %2784, %v1398_v60   ;;  %1428 = vperm.xlu1 %2783, %v1402_v11  }
 0x62d   :  { %1413 = vperm.xlu1 %2783, %v1399_v42  }
 0x64f   :  { %v2952_v54 = vpop.permute.xlu2 %2951 }
 0x650   :  { %v2954_v26 = vunpack.i.h.bf16 %v2952_v54  ;;  %v2953_v48 = vunpack.i.l.bf16 %v2952_v54 }
 0x652   :  { %v1378_v33 = vsel %vm1141_vm9, %v2953_v48, %v2954_v26  ;;  %v1379_v36 = vsel %vm1141_vm9, %v2954_v26, %v4379_v63 }
 0x657   :  { %v2977_v12 = vpop.permute.xlu2 %2976 }
 0x658   :  { %v2979_v56 = vunpack.i.h.bf16 %v2977_v12  ;;  %v2978_v14 = vunpack.i.l.bf16 %v2977_v12 }
 0x65a   :  { %v1348_v4 = vsel %vm104_vm0, %v2978_v14, %v2979_v56  ;;  %v1349_v52 = vsel %vm104_vm0, %v2979_v56, %v3682_v41 }
 0x65f   :  { %v2947_v31 = vpop.permute.xlu0 %2946  ;;  %v2982_v50 = vpop.permute.xlu2 %2981 }
 0x660   :  { %v2949_v9 = vunpack.i.h.bf16 %v2947_v31  ;;  %v2948_v16 = vunpack.i.l.bf16 %v2947_v31  ;;  %v2984_v18 = vunpack.i.h.bf16 %v2982_v50  ;;  %v2983_v5 = vunpack.i.l.bf16 %v2982_v50 }
 0x662   :  { %v1376_v19 = vsel %vm1141_vm9, %v2948_v16, %v2949_v9  ;;  %v1377_v28 = vsel %vm1141_vm9, %v2949_v9, %v4379_v63  ;;  %v1342_v0 = vsel %vm104_vm0, %v2983_v5, %v2984_v18  ;;  %v1343_v53 = vsel %vm104_vm0, %v2984_v18, %v3682_v41 }
 0x667   :  { %v2967_v51 = vpop.permute.xlu0 %2966  ;;  %v2992_v58 = vpop.permute.xlu2 %2991 }
 0x668   :  { %v2969_v6 = vunpack.i.h.bf16 %v2967_v51  ;;  %v2968_v1 = vunpack.i.l.bf16 %v2967_v51  ;;  %v2994_v54 = vunpack.i.h.bf16 %v2992_v58  ;;  %v2993_v31 = vunpack.i.l.bf16 %v2992_v58 }
 0x66a   :  { %v1346_v40 = vsel %vm104_vm0, %v2968_v1, %v2969_v6  ;;  %v1347_v47 = vsel %vm104_vm0, %v2969_v6, %v3682_v41  ;;  %v1312_v9 = vsel %vm90_vm1, %v2993_v31, %v2994_v54  ;;  %v1313_v16 = vsel %vm90_vm1, %v2994_v54, %v3684_v45 }
 0x66f   :  { %v2957_v7 = vpop.permute.xlu1 %2956 }
 0x670   :  { %v2959_v13 = vunpack.i.h.bf16 %v2957_v7  ;;  %v2958_v15 = vunpack.i.l.bf16 %v2957_v7  ;;  %v2997_v22 = vpop.permute.xlu0 %2996 }
 0x671   :  { %v2999_v46 = vunpack.i.h.bf16 %v2997_v22  ;;  %v2998_v21 = vunpack.i.l.bf16 %v2997_v22 }
 0x672   :  { %v1380_v30 = vsel %vm1141_vm9, %v2958_v15, %v2959_v13  ;;  %v1381_v39 = vsel %vm1141_vm9, %v2959_v13, %v4379_v63 }
 0x673   :  { %1446 = vmatpush.msra.mxu2 %v1380_v30  ;;  %1487 = vmatpush.msra.mxu1 %v1381_v39  ;;  %v1316_v59 = vsel %vm90_vm1, %v2998_v21, %v2999_v46  ;;  %v1317_v60 = vsel %vm90_vm1, %v2999_v46, %v3684_v45 }
 0x675   :  { %1447 = vmatpush.msra.mxu2 %v1378_v33  ;;  %1488 = vmatpush.msra.mxu1 %v1379_v36 }
 0x677   :  { %1448 = vmatpush.msra.mxu2 %v1376_v19  ;;  %1489 = vmatpush.msra.mxu1 %v1377_v28  ;;  %v2962_v37 = vpop.permute.xlu1 %2961 }
 0x678   :  { %v2964_v34 = vunpack.i.h.bf16 %v2962_v37  ;;  %v2963_v29 = vunpack.i.l.bf16 %v2962_v37  ;;  %v3002_v11 = vpop.permute.xlu0 %3001 }
 0x679   :  { %v3004_v48 = vunpack.i.h.bf16 %v3002_v11  ;;  %v3003_v13 = vunpack.i.l.bf16 %v3002_v11 }
 0x67a   :  { %v1374_v10 = vsel %vm1141_vm9, %v2963_v29, %v2964_v34  ;;  %v1375_v38 = vsel %vm1141_vm9, %v2964_v34, %v4379_v63 }
 0x67b   :  { %1449 = vmatpush.msra.mxu2 %v1374_v10  ;;  %1490 = vmatpush.msra.mxu1 %v1375_v38  ;;  %v1310_v30 = vsel %vm90_vm1, %v3003_v13, %v3004_v48  ;;  %v1311_v39 = vsel %vm90_vm1, %v3004_v48, %v3684_v45  ;;  %v1439_v38 = vpop.permute.xlu2 %1438 }
 0x67d   :  { %1450 = vmatpush.msra.mxu2 %v1348_v4  ;;  %1491 = vmatpush.msra.mxu1 %v1349_v52 }
 0x67f   :  { %v2972_v57 = vpop.permute.xlu1 %2971  ;;  %1451 = vmatpush.msra.mxu2 %v1346_v40  ;;  %1492 = vmatpush.msra.mxu1 %v1347_v47 }
 0x680   :  { %v2974_v25 = vunpack.i.h.bf16 %v2972_v57  ;;  %v2973_v24 = vunpack.i.l.bf16 %v2972_v57  ;;  %v1434_v19 = vpop.permute.xlu0 %1433 }
 0x682   :  { %v1344_v20 = vsel %vm104_vm0, %v2973_v24, %v2974_v25  ;;  %v1345_v27 = vsel %vm104_vm0, %v2974_v25, %v3682_v41 }
 0x683   :  { %1452 = vmatpush.msra.mxu2 %v1344_v20  ;;  %1493 = vmatpush.msra.mxu1 %v1345_v27  ;;  %v1424_v25 = vpop.permute.xlu2 %1423 }
 0x685   :  { %1453 = vmatpush.msra.mxu2 %v1342_v0  ;;  %1494 = vmatpush.msra.mxu1 %v1343_v53 }
 0x687   :  { %v2987_v42 = vpop.permute.xlu1 %2986  ;;  %1454 = vmatpush.msra.mxu2 %v1316_v59  ;;  %1495 = vmatpush.msra.mxu1 %v1317_v60 }
 0x688   :  { %v2989_v7 = vunpack.i.h.bf16 %v2987_v42  ;;  %v2988_v26 = vunpack.i.l.bf16 %v2987_v42  ;;  %v1419_v4 = vpop.permute.xlu0 %1418 }
 0x68a   :  { %v1314_v15 = vsel %vm90_vm1, %v2988_v26, %v2989_v7  ;;  %v1315_v12 = vsel %vm90_vm1, %v2989_v7, %v3684_v45 }
 0x68b   :  { %1455 = vmatpush.msra.mxu2 %v1314_v15  ;;  %1496 = vmatpush.msra.mxu1 %v1315_v12 }
 0x68d   :  { %1456 = vmatpush.msra.mxu2 %v1312_v9  ;;  %1497 = vmatpush.msra.mxu1 %v1313_v16 }
 0x68f   :  { %1457 = vmatpush.msra.mxu2 %v1310_v30  ;;  %1498 = vmatpush.msra.mxu1 %v1311_v39 }
 0x691   :  { %2716 = vmatpush.msk.msra.mxu2 %vm4435_vm3, %v4460_v62  ;;  %2720 = vmatpush.msk.msra.mxu1 %vm4429_vm15, %v4458_v55  ;;  %v1390_v55 = vld [vmem:[%s5431_s9] sm:$0xff]  ;;  %v1397_v62 = vld [vmem:[%s5431_s9 + $0x38] sm:$0xff] }
 0x693   :  { %2717 = vmatpush.msk.msra.mxu2 %vm4435_vm3, %v4448_v3  ;;  %2721 = vmatpush.msk.msra.mxu1 %vm4429_vm15, %v4446_v2  ;;  %v1395_v2 = vld [vmem:[%s5431_s9 + $0x28] sm:$0xff]  ;;  %v1396_v3 = vld [vmem:[%s5431_s9 + $0x30] sm:$0xff] }
 0x695   :  { %2718 = vmatpush.msk.msra.mxu2 %vm4435_vm3, %v4433_v61  ;;  %2722 = vmatpush.msk.msra.mxu1 %vm4429_vm15, %v4427_v23  ;;  %v1391_v61 = vld [vmem:[%s5431_s9 + $0x8] sm:$0xff]  ;;  %v1392_v23 = vld [vmem:[%s5431_s9 + $0x10] sm:$0xff] }
 0x697   :  { %2719 = vmatpush.msk.msra.mxu2 %vm4435_vm3, %v4468_v8  ;;  %2723 = vmatpush.msk.msra.mxu1 %vm4429_vm15, %v4472_v17  ;;  %v4595_v8 = vpop.permute.xlu1 %1443  ;;  %vm4955_vm15 = vmand %vm2151_vm12, %vm2153_vm13  ;;  %vm2615_vm3 = vcmp.ge.s32.totalorder %v3521_v44, 1 }
 0x698   :  { %1462 = vmatmul.f32.vlgmr.msra.gmra.mxu2 %v1390_v55  ;;  %1503 = vmatmul.f32.vlgmr.msra.gmra.mxu1 %v1390_v55  ;;  %vm2619_vm6 = vmand %vm2615_vm3, %vm2617_vm4 }
 0x69f   :  { %v1429_v51 = vpop.permute.xlu1 %1428 }
 0x6a0   :  { %1465 = vmatmul.f32.gmra.mxu2 %v1391_v61  ;;  %1506 = vmatmul.f32.gmra.mxu1 %v1391_v61 }
 0x6a7   :  { %v1414_v28 = vpop.permute.xlu1 %1413 }
 0x6a8   :  { %1468 = vmatmul.f32.gmra.mxu2 %v1392_v23  ;;  %1509 = vmatmul.f32.gmra.mxu1 %v1392_v23 }
 0x6b0   :  { %1471 = vmatmul.f32.gmra.mxu2 %v1393_v35  ;;  %1512 = vmatmul.f32.gmra.mxu1 %v1393_v35 }
 0x6b8   :  { %1474 = vmatmul.f32.gmra.mxu2 %v1394_v32  ;;  %1515 = vmatmul.f32.gmra.mxu1 %v1394_v32 }
 0x6c0   :  { %1477 = vmatmul.f32.gmra.mxu2 %v1395_v2  ;;  %1518 = vmatmul.f32.gmra.mxu1 %v1395_v2 }
 0x6c8   :  { %1480 = vmatmul.f32.gmra.mxu2 %v1396_v3  ;;  %1521 = vmatmul.f32.gmra.mxu1 %v1396_v3 }
 0x6d0   :  { %1483 = vmatmul.f32.gmra.mxu2 %v1397_v62  ;;  %1524 = vmatmul.f32.gmra.mxu1 %v1397_v62 }
 0x715   :  { %v4597_v17 = vpop.f32.mrf.mxu1 }
 0x71b   :  { %v4599_v33 = vpop.f32.mrf.mxu2 }
 0x71d   :  { %v1507_v36 = vpop.f32.mrf.mxu1 }
 0x71e   :  { %v4605_v37 = vadd.f32 %v1507_v36, %v1414_v28  ;;  %v1409_v36 = vpop.permute.xlu2 %1408 }
 0x720   :  { %v1541_v1 = vsel %vm4607_vm8, %v4605_v37, 0.0 }
 0x723   :  { %v1466_v56 = vpop.f32.mrf.mxu2 }
 0x724   :  { %v4611_v34 = vadd.f32 %v1466_v56, %v1414_v28  ;;  %v4699_v28 = vadd.f32 %v4599_v33, %v1409_v36  ;;  %v1794_v33 = vld [vmem:[%s5434_s12] sm:$0xff] }
 0x725   :  { %v1510_v6 = vpop.f32.mrf.mxu1 }
 0x726   :  { %v1540_v10 = vsel %vm4613_vm10, %v4611_v34, 0.0  ;;  %v4627_v52 = vadd.f32 %v1510_v6, %v1419_v4  ;;  %v1538_v56 = vsel %vm4613_vm10, %v4699_v28, 0.0 }
 0x727   :  { %v4623_v50 = vpack.i.bf16 %v1541_v1, %v1540_v10  ;;  %v1795_v10 = vld [vmem:[%s5434_s12 + $0x8] sm:$0xff] }
 0x728   :  { %v1543_v57 = vsel %vm4607_vm8, %v4627_v52, 0.0 }
 0x729   :  { %3006 = vrot.lane.b32.xlu2 %v4623_v50, %s3341_s14 }
 0x72b   :  { %v1469_v22 = vpop.f32.mrf.mxu2 }
 0x72c   :  { %v4629_v40 = vadd.f32 %v1469_v22, %v1419_v4  ;;  %v1798_v4 = vld [vmem:[%s5434_s12 + $0x20] sm:$0xff]  ;;  %v1807_v22 = vld [vmem:[%s5434_s12 + $0x68] sm:$0xff] }
 0x72d   :  { %v1513_v47 = vpop.f32.mrf.mxu1 }
 0x72e   :  { %v1542_v18 = vsel %vm4613_vm10, %v4629_v40, 0.0  ;;  %v4641_v24 = vadd.f32 %v1513_v47, %v1424_v25  ;;  %v1809_v47 = vld [vmem:[%s5434_s12 + $0x78] sm:$0xff] }
 0x72f   :  { %v4637_v5 = vpack.i.bf16 %v1543_v57, %v1542_v18  ;;  %v1808_v57 = vld [vmem:[%s5434_s12 + $0x70] sm:$0xff] }
 0x730   :  { %v1545_v27 = vsel %vm4607_vm8, %v4641_v24, 0.0  ;;  %v1804_v18 = vld [vmem:[%s5434_s12 + $0x50] sm:$0xff] }
 0x731   :  { %3011 = vrot.lane.b32.xlu0 %v4637_v5, %s3341_s14 }
 0x733   :  { %v1472_v46 = vpop.f32.mrf.mxu2 }
 0x734   :  { %v4643_v21 = vadd.f32 %v1472_v46, %v1424_v25  ;;  %v1806_v25 = vld [vmem:[%s5434_s12 + $0x60] sm:$0xff]  ;;  %v1805_v46 = vld [vmem:[%s5434_s12 + $0x58] sm:$0xff] }
 0x735   :  { %v1516_v20 = vpop.f32.mrf.mxu1 }
 0x736   :  { %v1544_v0 = vsel %vm4613_vm10, %v4643_v21, 0.0  ;;  %v4652_v58 = vadd.f32 %v1516_v20, %v1429_v51  ;;  %v1801_v20 = vld [vmem:[%s5434_s12 + $0x38] sm:$0xff] }
 0x737   :  { %v3015_v53 = vpack.i.bf16 %v1545_v27, %v1544_v0  ;;  %v1803_v0 = vld [vmem:[%s5434_s12 + $0x48] sm:$0xff] }
 0x738   :  { %v1547_v42 = vsel %vm4607_vm8, %v4652_v58, 0.0 }
 0x739   :  { %3016 = vrot.lane.b32.xlu1 %v3015_v53, %s3341_s14 }
 0x73b   :  { %v1475_v59 = vpop.f32.mrf.mxu2 }
 0x73c   :  { %v4654_v60 = vadd.f32 %v1475_v59, %v1429_v51 }
 0x73d   :  { %v1519_v11 = vpop.f32.mrf.mxu1 }
 0x73e   :  { %v1546_v54 = vsel %vm4613_vm10, %v4654_v60, 0.0  ;;  %v4663_v7 = vadd.f32 %v1519_v11, %v1434_v19  ;;  %v1800_v11 = vld [vmem:[%s5434_s12 + $0x30] sm:$0xff] }
 0x73f   :  { %v3020_v31 = vpack.i.bf16 %v1547_v42, %v1546_v54 }
 0x740   :  { %v1549_v15 = vsel %vm4607_vm8, %v4663_v7, 0.0 }
 0x741   :  { %3021 = vrot.lane.b32.xlu0 %v3020_v31, %s3341_s14 }
 0x743   :  { %v1478_v26 = vpop.f32.mrf.mxu2 }
 0x744   :  { %v4665_v48 = vadd.f32 %v1478_v26, %v1434_v19 }
 0x745   :  { %v1522_v13 = vpop.f32.mrf.mxu1 }
 0x746   :  { %v1548_v12 = vsel %vm4613_vm10, %v4665_v48, 0.0  ;;  %v4674_v16 = vadd.f32 %v1522_v13, %v1439_v38 }
 0x747   :  { %v3025_v9 = vpack.i.bf16 %v1549_v15, %v1548_v12 }
 0x748   :  { %v1551_v55 = vsel %vm4607_vm8, %v4674_v16, 0.0 }
 0x749   :  { %3026 = vrot.lane.b32.xlu2 %v3025_v9, %s3341_s14 }
 0x74b   :  { %v1481_v30 = vpop.f32.mrf.mxu2 }
 0x74c   :  { %v4676_v39 = vadd.f32 %v1481_v30, %v1439_v38  ;;  %v1799_v38 = vld [vmem:[%s5434_s12 + $0x28] sm:$0xff] }
 0x74d   :  { %v1525_v23 = vpop.f32.mrf.mxu1 }
 0x74e   :  { %v1550_v61 = vsel %vm4613_vm10, %v4676_v39, 0.0  ;;  %v4687_v32 = vadd.f32 %v1525_v23, %v4595_v8 }
 0x74f   :  { %v3030_v35 = vpack.i.bf16 %v1551_v55, %v1550_v61 }
 0x750   :  { %v1553_v62 = vsel %vm4607_vm8, %v4687_v32, 0.0 }
 0x751   :  { %3031 = vrot.lane.b32.xlu1 %v3030_v35, %s3341_s14  ;;  %3056 = vrot.lane.b32.xlu2 %v3020_v31, %s3345_s5 }
 0x753   :  { %v1484_v2 = vpop.f32.mrf.mxu2 }
 0x754   :  { %v4690_v3 = vadd.f32 %v1484_v2, %v4595_v8  ;;  %v4704_v8 = vadd.f32 %v4597_v17, %v1409_v36  ;;  %v1796_v17 = vld [vmem:[%s5434_s12 + $0x10] sm:$0xff] }
 0x756   :  { %v1552_v51 = vsel %vm4613_vm10, %v4690_v3, 0.0  ;;  %v1539_v6 = vsel %vm4607_vm8, %v4704_v8, 0.0 }
 0x757   :  { %v3040_v19 = vpack.i.bf16 %v1553_v62, %v1552_v51  ;;  %v3050_v1 = vpack.i.bf16 %v1539_v6, %v1538_v56 }
 0x759   :  { %3036 = vrot.lane.b32.xlu1 %v3030_v35, %s3345_s5  ;;  %3041 = vrot.lane.b32.xlu0 %v3040_v19, %s3341_s14 }
 0x75a   :  { %3071 = vrot.lane.b32.xlu2 %v3040_v19, %s3345_s5 }
 0x761   :  { %3046 = vrot.lane.b32.xlu0 %v3025_v9, %s3345_s5  ;;  %3051 = vrot.lane.b32.xlu1 %v3050_v1, %s3341_s14 }
 0x762   :  { %3076 = vrot.lane.b32.xlu2 %v4623_v50, %s3345_s5 }
 0x769   :  { %3061 = vrot.lane.b32.xlu0 %v3015_v53, %s3345_s5  ;;  %3066 = vrot.lane.b32.xlu1 %v4637_v5, %s3345_s5 }
 0x76a   :  { %3086 = vrot.lane.b32.xlu2 %v3030_v35, %s3342_s11 }
 0x771   :  { %3081 = vrot.lane.b32.xlu0 %v3050_v1, %s3345_s5  ;;  %3096 = vrot.lane.b32.xlu1 %v3040_v19, %s3342_s11 }
 0x772   :  { %3106 = vrot.lane.b32.xlu2 %v3015_v53, %s3342_s11  ;;  %v1802_v53 = vld [vmem:[%s5434_s12 + $0x40] sm:$0xff] }
 0x779   :  { %3091 = vrot.lane.b32.xlu0 %v3025_v9, %s3342_s11  ;;  %3101 = vrot.lane.b32.xlu1 %v3020_v31, %s3342_s11 }
 0x77a   :  { %3121 = vrot.lane.b32.xlu2 %v3050_v1, %s3342_s11 }
 0x781   :  { %3111 = vrot.lane.b32.xlu0 %v4637_v5, %s3342_s11  ;;  %3116 = vrot.lane.b32.xlu1 %v4623_v50, %s3342_s11  ;;  %v1797_v50 = vld [vmem:[%s5434_s12 + $0x18] sm:$0xff] }
 0x782   :  { %1822 = vperm.xlu2 %2784, %v1796_v17  }
 0x783   :  { %v4761_v5 = vpop.permute.xlu2 %3006 }
 0x789   :  { %1812 = vperm.xlu0 %2782, %v1794_v33   ;;  %1817 = vperm.xlu1 %2783, %v1795_v10  }
 0x78a   :  { %1837 = vperm.xlu2 %2784, %v1799_v38  }
 0x791   :  { %1827 = vperm.xlu0 %2782, %v1797_v50   ;;  %1832 = vperm.xlu1 %2783, %v1798_v4  }
 0x792   :  { %1877 = vperm.xlu2 %2784, %v1807_v22  }
 0x799   :  { %1887 = vperm.xlu0 %2782, %v1809_v47   ;;  %1882 = vperm.xlu1 %2783, %v1808_v57  }
 0x79a   :  { %1862 = vperm.xlu2 %2784, %v1804_v18  }
 0x7a1   :  { %1872 = vperm.xlu0 %2782, %v1806_v25   ;;  %1867 = vperm.xlu1 %2783, %v1805_v46  }
 0x7a2   :  { %1847 = vperm.xlu2 %2784, %v1801_v20  }
 0x7a3   :  { %v3027_v27 = vpop.permute.xlu2 %3026  ;;  %v4786_v15 = vpop.permute.xlu0 %3011 }
 0x7a4   :  { %v3029_v19 = vunpack.i.h.bf16 %v3027_v27  ;;  %v3028_v56 = vunpack.i.l.bf16 %v3027_v27  ;;  %v3014_v18 = vunpack.i.h.bf16 %v4786_v15  ;;  %v3013_v25 = vunpack.i.l.bf16 %v4786_v15 }
 0x7a5   :  { %v3008_v15 = vunpack.i.l.bf16 %v4761_v5 }
 0x7a6   :  { %v1612_v57 = vsel %vm90_vm1, %v3028_v56, %v3029_v19  ;;  %v1613_v27 = vsel %vm90_vm1, %v3029_v19, %v3684_v45 }
 0x7a9   :  { %1857 = vperm.xlu0 %2782, %v1803_v0   ;;  %1852 = vperm.xlu1 %2783, %v1802_v53  }
 0x7ab   :  { %v4778_v59 = vpop.permute.xlu2 %3056  ;;  %v3017_v12 = vpop.permute.xlu1 %3016 }
 0x7ac   :  { %v3019_v22 = vunpack.i.h.bf16 %v3017_v12  ;;  %v3018_v47 = vunpack.i.l.bf16 %v3017_v12  ;;  %v3059_v46 = vunpack.i.h.bf16 %v4778_v59  ;;  %v3058_v53 = vunpack.i.l.bf16 %v4778_v59 }
 0x7ae   :  { %v1608_v12 = vsel %vm90_vm1, %v3018_v47, %v3019_v22 }
 0x7b1   :  { %1842 = vperm.xlu0 %2782, %v1800_v11  }
 0x7b3   :  { %v3022_v9 = vpop.permute.xlu0 %3021 }
 0x7b4   :  { %v3072_v42 = vpop.permute.xlu2 %3071  ;;  %v3024_v10 = vunpack.i.h.bf16 %v3022_v9  ;;  %v3023_v38 = vunpack.i.l.bf16 %v3022_v9 }
 0x7b5   :  { %v3074_v54 = vunpack.i.h.bf16 %v3072_v42  ;;  %v3073_v31 = vunpack.i.l.bf16 %v3072_v42 }
 0x7b7   :  { %v1744_v26 = vsel %vm1141_vm9, %v3073_v31, %v3074_v54  ;;  %v1745_v13 = vsel %vm1141_vm9, %v3074_v54, %v4379_v63  ;;  %v1610_v31 = vsel %vm90_vm1, %v3023_v38, %v3024_v10 }
 0x7b8   :  { %1955 = vmatpush.msrb.mxu0 %v1744_v26  ;;  %2085 = vmatpush.msrb.mxu1 %v1745_v13  ;;  %v3009_v26 = vunpack.i.h.bf16 %v4761_v5  ;;  %v1611_v13 = vsel %vm90_vm1, %v3024_v10, %v3684_v45  ;;  %v1738_v5 = vsel %vm1141_vm9, %v3058_v53, %v3059_v46 }
 0x7bc   :  { %v4804_v11 = vpop.permute.xlu2 %3076 }
 0x7bd   :  { %v3079_v38 = vunpack.i.h.bf16 %v4804_v11 }
 0x7c3   :  { %v3032_v30 = vpop.permute.xlu1 %3031 }
 0x7c4   :  { %v3034_v55 = vunpack.i.h.bf16 %v3032_v30  ;;  %v3033_v61 = vunpack.i.l.bf16 %v3032_v30 }
 0x7c6   :  { %v1614_v50 = vsel %vm90_vm1, %v3033_v61, %v3034_v55  ;;  %v1615_v4 = vsel %vm90_vm1, %v3034_v55, %v3684_v45  ;;  %v1609_v61 = vsel %vm90_vm1, %v3019_v22, %v3684_v45 }
 0x7cb   :  { %v3037_v23 = vpop.permute.xlu1 %3036  ;;  %v3042_v35 = vpop.permute.xlu0 %3041 }
 0x7cc   :  { %v3039_v2 = vunpack.i.h.bf16 %v3037_v23  ;;  %v3038_v62 = vunpack.i.l.bf16 %v3037_v23  ;;  %v3044_v51 = vunpack.i.h.bf16 %v3042_v35  ;;  %v3043_v36 = vunpack.i.l.bf16 %v3042_v35 }
 0x7cd   :  { %v1606_v23 = vsel %vm90_vm1, %v3013_v25, %v3014_v18  ;;  %v1607_v35 = vsel %vm90_vm1, %v3014_v18, %v3684_v45 }
 0x7ce   :  { %v1616_v6 = vsel %vm90_vm1, %v3043_v36, %v3044_v51  ;;  %v1742_v1 = vsel %vm1141_vm9, %v3038_v62, %v3039_v2  ;;  %v1617_v17 = vsel %vm90_vm1, %v3044_v51, %v3684_v45  ;;  %v1743_v33 = vsel %vm1141_vm9, %v3039_v2, %v4379_v63 }
 0x7cf   :  { %1890 = vmatpush.msrb.mxu3 %v1616_v6  ;;  %1956 = vmatpush.msrb.mxu0 %v1742_v1  ;;  %v1739_v2 = vsel %vm1141_vm9, %v3059_v46, %v4379_v63  ;;  %v1604_v62 = vsel %vm90_vm1, %v3008_v15, %v3009_v26  ;;  %v1605_v36 = vsel %vm90_vm1, %v3009_v26, %v3684_v45 }
 0x7d0   :  { %2020 = vmatpush.msrb.mxu2 %v1617_v17  ;;  %2086 = vmatpush.msrb.mxu1 %v1743_v33 }
 0x7d1   :  { %1891 = vmatpush.msrb.mxu3 %v1614_v50  ;;  %v3078_v50 = vunpack.i.l.bf16 %v4804_v11 }
 0x7d2   :  { %2021 = vmatpush.msrb.mxu2 %v1615_v4  ;;  %v3087_v4 = vpop.permute.xlu2 %3086 }
 0x7d3   :  { %v3047_v20 = vpop.permute.xlu0 %3046  ;;  %1892 = vmatpush.msrb.mxu3 %v1612_v57  ;;  %v3052_v0 = vpop.permute.xlu1 %3051  ;;  %v3088_v53 = vunpack.i.l.bf16 %v3087_v4 }
 0x7d4   :  { %v3049_v42 = vunpack.i.h.bf16 %v3047_v20  ;;  %v3048_v54 = vunpack.i.l.bf16 %v3047_v20  ;;  %2022 = vmatpush.msrb.mxu2 %v1613_v27  ;;  %v3054_v30 = vunpack.i.h.bf16 %v3052_v0  ;;  %v3053_v55 = vunpack.i.l.bf16 %v3052_v0 }
 0x7d5   :  { %1893 = vmatpush.msrb.mxu3 %v1610_v31 }
 0x7d6   :  { %2023 = vmatpush.msrb.mxu2 %v1611_v13  ;;  %v1740_v59 = vsel %vm1141_vm9, %v3048_v54, %v3049_v42  ;;  %v1741_v9 = vsel %vm1141_vm9, %v3049_v42, %v4379_v63  ;;  %v1602_v56 = vsel %vm90_vm1, %v3053_v55, %v3054_v30  ;;  %v1603_v10 = vsel %vm90_vm1, %v3054_v30, %v3684_v45  ;;  %v1762_v42 = vld [vmem:[#allocation3] sm:$0xff]  ;;  %v1764_v30 = vld [vmem:[#allocation3 + $0x10] sm:$0xff] }
 0x7d7   :  { %1894 = vmatpush.msrb.mxu3 %v1608_v12  ;;  %1957 = vmatpush.msrb.mxu0 %v1740_v59 }
 0x7d8   :  { %2024 = vmatpush.msrb.mxu2 %v1609_v61  ;;  %2087 = vmatpush.msrb.mxu1 %v1741_v9 }
 0x7d9   :  { %1895 = vmatpush.msrb.mxu3 %v1606_v23  ;;  %1958 = vmatpush.msrb.mxu0 %v1738_v5 }
 0x7da   :  { %2025 = vmatpush.msrb.mxu2 %v1607_v35  ;;  %2088 = vmatpush.msrb.mxu1 %v1739_v2 }
 0x7db   :  { %v3062_v51 = vpop.permute.xlu0 %3061  ;;  %1896 = vmatpush.msrb.mxu3 %v1604_v62  ;;  %v3067_v19 = vpop.permute.xlu1 %3066 }
 0x7dc   :  { %v3064_v6 = vunpack.i.h.bf16 %v3062_v51  ;;  %v3063_v1 = vunpack.i.l.bf16 %v3062_v51  ;;  %2026 = vmatpush.msrb.mxu2 %v1605_v36  ;;  %v3069_v17 = vunpack.i.h.bf16 %v3067_v19  ;;  %v3068_v33 = vunpack.i.l.bf16 %v3067_v19 }
 0x7dd   :  { %1897 = vmatpush.msrb.mxu3 %v1602_v56  ;;  %v1763_v56 = vld [vmem:[#allocation3 + $0x8] sm:$0xff] }
 0x7de   :  { %2027 = vmatpush.msrb.mxu2 %v1603_v10  ;;  %v1736_v22 = vsel %vm1141_vm9, %v3063_v1, %v3064_v6  ;;  %v1737_v47 = vsel %vm1141_vm9, %v3064_v6, %v4379_v63  ;;  %v1734_v57 = vsel %vm1141_vm9, %v3068_v33, %v3069_v17  ;;  %v1735_v18 = vsel %vm1141_vm9, %v3069_v17, %v4379_v63  ;;  %v1766_v17 = vld [vmem:[#allocation3 + $0x20] sm:$0xff]  ;;  %v1765_v33 = vld [vmem:[#allocation3 + $0x18] sm:$0xff]  ;;  %v1768_v10 = vld [vmem:[#allocation3 + $0x30] sm:$0xff] }
 0x7df   :  { %2724 = vmatpush.msk.msrb.mxu3 %vm4613_vm10, %v4690_v3  ;;  %1959 = vmatpush.msrb.mxu0 %v1736_v22  ;;  %v1732_v3 = vsel %vm1141_vm9, %v3078_v50, %v3079_v38  ;;  %v1770_v50 = vld [vmem:[#allocation3 + $0x40] sm:$0xff]  ;;  %v1772_v22 = vld [vmem:[#allocation3 + $0x50] sm:$0xff] }
 0x7e0   :  { %2732 = vmatpush.msk.msrb.mxu2 %vm4607_vm8, %v4687_v32  ;;  %2089 = vmatpush.msrb.mxu1 %v1737_v47  ;;  %v1771_v47 = vld [vmem:[#allocation3 + $0x48] sm:$0xff] }
 0x7e1   :  { %2725 = vmatpush.msk.msrb.mxu3 %vm4613_vm10, %v4676_v39  ;;  %1960 = vmatpush.msrb.mxu0 %v1734_v57  ;;  %v1733_v39 = vsel %vm1141_vm9, %v3079_v38, %v4379_v63  ;;  %v1767_v38 = vld [vmem:[#allocation3 + $0x28] sm:$0xff]  ;;  %v1774_v57 = vld [vmem:[#allocation3 + $0x60] sm:$0xff] }
 0x7e2   :  { %2733 = vmatpush.msk.msrb.mxu2 %vm4607_vm8, %v4674_v16  ;;  %2090 = vmatpush.msrb.mxu1 %v1735_v18  ;;  %v3089_v16 = vunpack.i.h.bf16 %v3087_v4  ;;  %v1769_v4 = vld [vmem:[#allocation3 + $0x38] sm:$0xff] }
 0x7e3   :  { %v3082_v25 = vpop.permute.xlu0 %3081  ;;  %v3097_v32 = vpop.permute.xlu1 %3096  ;;  %2726 = vmatpush.msk.msrb.mxu3 %vm4613_vm10, %v4665_v48  ;;  %1961 = vmatpush.msrb.mxu0 %v1732_v3  ;;  %v1773_v18 = vld [vmem:[#allocation3 + $0x58] sm:$0xff]  ;;  %v1776_v3 = vld [vmem:[#allocation3 + $0x70] sm:$0xff] }
 0x7e4   :  { %v3084_v46 = vunpack.i.h.bf16 %v3082_v25  ;;  %v3083_v20 = vunpack.i.l.bf16 %v3082_v25  ;;  %v3099_v27 = vunpack.i.h.bf16 %v3097_v32  ;;  %v3098_v0 = vunpack.i.l.bf16 %v3097_v32  ;;  %2734 = vmatpush.msk.msrb.mxu2 %vm4607_vm8, %v4663_v7  ;;  %2091 = vmatpush.msrb.mxu1 %v1733_v39  ;;  %v3107_v7 = vpop.permute.xlu2 %3106  ;;  %v1775_v25 = vld [vmem:[#allocation3 + $0x68] sm:$0xff]  ;;  %v1778_v32 = vld [vmem:[#allocation3 + $0x80] sm:$0xff]  ;;  %v1777_v39 = vld [vmem:[#allocation3 + $0x78] sm:$0xff] }
 0x7e5   :  { %2727 = vmatpush.msk.msrb.mxu3 %vm4613_vm10, %v4654_v60 }
 0x7e6   :  { %2735 = vmatpush.msk.msrb.mxu2 %vm4607_vm8, %v4652_v58  ;;  %v1730_v48 = vsel %vm1141_vm9, %v3083_v20, %v3084_v46  ;;  %v1731_v11 = vsel %vm1141_vm9, %v3084_v46, %v4379_v63  ;;  %v1680_v60 = vsel %vm104_vm0, %v3098_v0, %v3099_v27  ;;  %v1681_v63 = vsel %vm104_vm0, %v3099_v27, %v3682_v41  ;;  %v1780_v46 = vld [vmem:[#allocation3 + $0x90] sm:$0xff]  ;;  %v1779_v20 = vld [vmem:[#allocation3 + $0x88] sm:$0xff]  ;;  %v1782_v27 = vld [vmem:[#allocation3 + $0xa0] sm:$0xff] }
 0x7e7   :  { %2728 = vmatpush.msk.msrb.mxu3 %vm4613_vm10, %v4643_v21  ;;  %1962 = vmatpush.msrb.mxu0 %v1730_v48  ;;  %v1678_v21 = vsel %vm104_vm0, %v3088_v53, %v3089_v16  ;;  %v1781_v0 = vld [vmem:[#allocation3 + $0x98] sm:$0xff]  ;;  %v1783_v53 = vld [vmem:[#allocation3 + $0xa8] sm:$0xff]  ;;  %v1786_v48 = vld [vmem:[#allocation3 + $0xc0] sm:$0xff]  ;;  %vm2150_vm9 = vcmp.ge.s32.totalorder %v3521_v44, 2 }
 0x7e8   :  { %2736 = vmatpush.msk.msrb.mxu2 %vm4607_vm8, %v4641_v24  ;;  %2092 = vmatpush.msrb.mxu1 %v1731_v11  ;;  %v1785_v11 = vld [vmem:[#allocation3 + $0xb8] sm:$0xff]  ;;  %vm4949_vm14 = vmand %vm2150_vm9, %vm2152_vm11 }
 0x7e9   :  { %2729 = vmatpush.msk.msrb.mxu3 %vm4613_vm10, %v4629_v40  ;;  %1963 = vmatpush.msrb.mxu0 %v1680_v60  ;;  %v1679_v40 = vsel %vm104_vm0, %v3089_v16, %v3682_v41  ;;  %v1784_v16 = vld [vmem:[#allocation3 + $0xb0] sm:$0xff]  ;;  %v1787_v60 = vld [vmem:[#allocation3 + $0xc8] sm:$0xff] }
 0x7ea   :  { %2737 = vmatpush.msk.msrb.mxu2 %vm4607_vm8, %v4627_v52  ;;  %2093 = vmatpush.msrb.mxu1 %v1681_v63  ;;  %v3109_v52 = vunpack.i.h.bf16 %v3107_v7  ;;  %v1790_v63 = vld [vmem:[#allocation3 + $0xe0] sm:$0xff] }
 0x7eb   :  { %v3092_v58 = vpop.permute.xlu0 %3091  ;;  %v3102_v24 = vpop.permute.xlu1 %3101  ;;  %2730 = vmatpush.msk.msrb.mxu3 %vm4613_vm10, %v4611_v34  ;;  %1964 = vmatpush.msrb.mxu0 %v1678_v21  ;;  %v3108_v34 = vunpack.i.l.bf16 %v3107_v7  ;;  %v1788_v7 = vld [vmem:[#allocation3 + $0xd0] sm:$0xff]  ;;  %v1789_v21 = vld [vmem:[#allocation3 + $0xd8] sm:$0xff] }
 0x7ec   :  { %v3094_v54 = vunpack.i.h.bf16 %v3092_v58  ;;  %v3093_v31 = vunpack.i.l.bf16 %v3092_v58  ;;  %v3104_v26 = vunpack.i.h.bf16 %v3102_v24  ;;  %v3103_v13 = vunpack.i.l.bf16 %v3102_v24  ;;  %2738 = vmatpush.msk.msrb.mxu2 %vm4607_vm8, %v4605_v37  ;;  %2094 = vmatpush.msrb.mxu1 %v1679_v40  ;;  %v1792_v58 = vld [vmem:[#allocation3 + $0xf0] sm:$0xff]  ;;  %v1791_v24 = vld [vmem:[#allocation3 + $0xe8] sm:$0xff] }
 0x7ed   :  { %2731 = vmatpush.msk.msrb.mxu3 %vm4613_vm10, %v4699_v28  ;;  %v3122_v28 = vpop.permute.xlu2 %3121  ;;  %v1672_v14 = vsel %vm104_vm0, %v3108_v34, %v3109_v52  ;;  %v1673_v9 = vsel %vm104_vm0, %v3109_v52, %v3682_v41 }
 0x7ee   :  { %2739 = vmatpush.msk.msrb.mxu2 %vm4607_vm8, %v4704_v8  ;;  %1906 = vmatmul.f32.vlgmr.msrb.gmra.mxu3 %v1762_v42  ;;  %v1676_v15 = vsel %vm104_vm0, %v3093_v31, %v3094_v54  ;;  %v1677_v12 = vsel %vm104_vm0, %v3094_v54, %v3682_v41  ;;  %v1674_v37 = vsel %vm104_vm0, %v3103_v13, %v3104_v26  ;;  %v3124_v35 = vunpack.i.h.bf16 %v3122_v28 }
 0x7ef   :  { %2036 = vmatmul.f32.vlgmr.msrb.gmra.mxu2 %v1762_v42  ;;  %1965 = vmatpush.msrb.mxu0 %v1676_v15  ;;  %v1675_v29 = vsel %vm104_vm0, %v3104_v26, %v3682_v41  ;;  %v3123_v2 = vunpack.i.l.bf16 %v3122_v28  ;;  %v1793_v42 = vld [vmem:[#allocation3 + $0xf8] sm:$0xff] }
 0x7f0   :  { %2095 = vmatpush.msrb.mxu1 %v1677_v12  ;;  %v1667_v1 = vsel %vm104_vm0, %v3124_v35, %v3682_v41 }
 0x7f1   :  { %1966 = vmatpush.msrb.mxu0 %v1674_v37  ;;  %v1666_v6 = vsel %vm104_vm0, %v3123_v2, %v3124_v35 }
 0x7f2   :  { %2096 = vmatpush.msrb.mxu1 %v1675_v29 }
 0x7f3   :  { %v3112_v8 = vpop.permute.xlu0 %3111  ;;  %v3117_v59 = vpop.permute.xlu1 %3116  ;;  %1967 = vmatpush.msrb.mxu0 %v1672_v14 }
 0x7f4   :  { %v3114_v55 = vunpack.i.h.bf16 %v3112_v8  ;;  %v3113_v61 = vunpack.i.l.bf16 %v3112_v8  ;;  %v3119_v23 = vunpack.i.h.bf16 %v3117_v59  ;;  %v3118_v5 = vunpack.i.l.bf16 %v3117_v59  ;;  %2097 = vmatpush.msrb.mxu1 %v1673_v9 }
 0x7f5   :  { %v1823_v35 = vpop.permute.xlu2 %1822 }
 0x7f6   :  { %1909 = vmatmul.f32.gmra.mxu3 %v1764_v30  ;;  %v1670_v62 = vsel %vm104_vm0, %v3113_v61, %v3114_v55  ;;  %v1671_v51 = vsel %vm104_vm0, %v3114_v55, %v3682_v41  ;;  %v1668_v36 = vsel %vm104_vm0, %v3118_v5, %v3119_v23  ;;  %v1669_v19 = vsel %vm104_vm0, %v3119_v23, %v3682_v41 }
 0x7f7   :  { %2039 = vmatmul.f32.gmra.mxu2 %v1764_v30  ;;  %1968 = vmatpush.msrb.mxu0 %v1670_v62 }
 0x7f8   :  { %2098 = vmatpush.msrb.mxu1 %v1671_v51 }
 0x7f9   :  { %1969 = vmatpush.msrb.mxu0 %v1668_v36 }
 0x7fa   :  { %2099 = vmatpush.msrb.mxu1 %v1669_v19 }
 0x7fb   :  { %1970 = vmatpush.msrb.mxu0 %v1666_v6  ;;  %v1813_v31 = vpop.permute.xlu0 %1812  ;;  %v1818_v14 = vpop.permute.xlu1 %1817 }
 0x7fc   :  { %2100 = vmatpush.msrb.mxu1 %v1667_v1  ;;  %1971 = vmatmul.f32.vlgmr.msrb.gmra.mxu0 %v1763_v56 }
 0x7fd   :  { %2101 = vmatmul.f32.vlgmr.msrb.gmra.mxu1 %v1763_v56 }
 0x7fe   :  { %1912 = vmatmul.f32.gmra.mxu3 %v1766_v17 }
 0x7ff   :  { %2042 = vmatmul.f32.gmra.mxu2 %v1766_v17 }
 0x803   :  { %v1828_v28 = vpop.permute.xlu0 %1827 }
 0x804   :  { %1974 = vmatmul.f32.gmra.mxu0 %v1765_v33 }
 0x805   :  { %2104 = vmatmul.f32.gmra.mxu1 %v1765_v33  ;;  %v1838_v33 = vpop.permute.xlu2 %1837 }
 0x806   :  { %1915 = vmatmul.f32.gmra.mxu3 %v1768_v10 }
 0x807   :  { %2045 = vmatmul.f32.gmra.mxu2 %v1768_v10 }
 0x80b   :  { %v4923_v2 = vpop.permute.xlu0 %1887 }
 0x80c   :  { %1977 = vmatmul.f32.gmra.mxu0 %v1767_v38 }
 0x80d   :  { %2107 = vmatmul.f32.gmra.mxu1 %v1767_v38 }
 0x80e   :  { %1918 = vmatmul.f32.gmra.mxu3 %v1770_v50 }
 0x80f   :  { %2048 = vmatmul.f32.gmra.mxu2 %v1770_v50 }
 0x814   :  { %1980 = vmatmul.f32.gmra.mxu0 %v1769_v4 }
 0x815   :  { %2110 = vmatmul.f32.gmra.mxu1 %v1769_v4 }
 0x816   :  { %1921 = vmatmul.f32.gmra.mxu3 %v1772_v22 }
 0x817   :  { %2051 = vmatmul.f32.gmra.mxu2 %v1772_v22 }
 0x81c   :  { %1983 = vmatmul.f32.gmra.mxu0 %v1771_v47 }
 0x81d   :  { %2113 = vmatmul.f32.gmra.mxu1 %v1771_v47 }
 0x81e   :  { %1924 = vmatmul.f32.gmra.mxu3 %v1774_v57 }
 0x81f   :  { %2054 = vmatmul.f32.gmra.mxu2 %v1774_v57 }
 0x824   :  { %1986 = vmatmul.f32.gmra.mxu0 %v1773_v18 }
 0x825   :  { %2116 = vmatmul.f32.gmra.mxu1 %v1773_v18  ;;  %v4931_v18 = vpop.permute.xlu0 %1872 }
 0x826   :  { %1927 = vmatmul.f32.gmra.mxu3 %v1776_v3 }
 0x827   :  { %2057 = vmatmul.f32.gmra.mxu2 %v1776_v3 }
 0x82c   :  { %1989 = vmatmul.f32.gmra.mxu0 %v1775_v25 }
 0x82d   :  { %2119 = vmatmul.f32.gmra.mxu1 %v1775_v25  ;;  %v1833_v25 = vpop.permute.xlu1 %1832 }
 0x82e   :  { %1930 = vmatmul.f32.gmra.mxu3 %v1778_v32 }
 0x82f   :  { %2060 = vmatmul.f32.gmra.mxu2 %v1778_v32 }
 0x834   :  { %1992 = vmatmul.f32.gmra.mxu0 %v1777_v39 }
 0x835   :  { %2122 = vmatmul.f32.gmra.mxu1 %v1777_v39 }
 0x836   :  { %1933 = vmatmul.f32.gmra.mxu3 %v1780_v46 }
 0x837   :  { %2063 = vmatmul.f32.gmra.mxu2 %v1780_v46 }
 0x83c   :  { %1995 = vmatmul.f32.gmra.mxu0 %v1779_v20 }
 0x83d   :  { %2125 = vmatmul.f32.gmra.mxu1 %v1779_v20 }
 0x83e   :  { %1936 = vmatmul.f32.gmra.mxu3 %v1782_v27 }
 0x83f   :  { %2066 = vmatmul.f32.gmra.mxu2 %v1782_v27 }
 0x844   :  { %1998 = vmatmul.f32.gmra.mxu0 %v1781_v0 }
 0x845   :  { %2128 = vmatmul.f32.gmra.mxu1 %v1781_v0 }
 0x846   :  { %1939 = vmatmul.f32.gmra.mxu3 %v1784_v16 }
 0x847   :  { %2069 = vmatmul.f32.gmra.mxu2 %v1784_v16 }
 0x84c   :  { %2001 = vmatmul.f32.gmra.mxu0 %v1783_v53 }
 0x84d   :  { %2131 = vmatmul.f32.gmra.mxu1 %v1783_v53  ;;  %v4937_v53 = vpop.permute.xlu2 %1877 }
 0x84e   :  { %1942 = vmatmul.f32.gmra.mxu3 %v1786_v48 }
 0x84f   :  { %2072 = vmatmul.f32.gmra.mxu2 %v1786_v48 }
 0x854   :  { %2004 = vmatmul.f32.gmra.mxu0 %v1785_v11 }
 0x855   :  { %2134 = vmatmul.f32.gmra.mxu1 %v1785_v11  ;;  %v1858_v11 = vpop.permute.xlu0 %1857 }
 0x856   :  { %1945 = vmatmul.f32.gmra.mxu3 %v1788_v7 }
 0x857   :  { %2075 = vmatmul.f32.gmra.mxu2 %v1788_v7 }
 0x85c   :  { %2007 = vmatmul.f32.gmra.mxu0 %v1787_v60 }
 0x85d   :  { %2137 = vmatmul.f32.gmra.mxu1 %v1787_v60 }
 0x85e   :  { %1948 = vmatmul.f32.gmra.mxu3 %v1790_v63 }
 0x85f   :  { %2078 = vmatmul.f32.gmra.mxu2 %v1790_v63 }
 0x864   :  { %2010 = vmatmul.f32.gmra.mxu0 %v1789_v21 }
 0x865   :  { %2140 = vmatmul.f32.gmra.mxu1 %v1789_v21 }
 0x866   :  { %1951 = vmatmul.f32.gmra.mxu3 %v1792_v58 }
 0x867   :  { %2081 = vmatmul.f32.gmra.mxu2 %v1792_v58 }
 0x86c   :  { %2013 = vmatmul.f32.gmra.mxu0 %v1791_v24 }
 0x86d   :  { %2143 = vmatmul.f32.gmra.mxu1 %v1791_v24 }
 0x871   :  { %v1907_v40 = vpop.f32.mrf.mxu3 }
 0x872   :  { %v2037_v54 = vpop.f32.mrf.mxu2  ;;  %v1908_v26 = vadd.f32 %v1907_v40, %v1813_v31 }
 0x873   :  { %v2038_v13 = vadd.f32 %v2037_v54, %v1813_v31 }
 0x874   :  { %2016 = vmatmul.f32.gmra.mxu0 %v1793_v42 }
 0x875   :  { %2146 = vmatmul.f32.gmra.mxu1 %v1793_v42  ;;  %v4947_v42 = vpop.permute.xlu1 %1882 }
 0x879   :  { %v1910_v52 = vpop.f32.mrf.mxu3  ;;  %v1972_v34 = vpop.f32.mrf.mxu0 }
 0x87a   :  { %v4915_v15 = vadd.f32 %v1972_v34, %v1908_v26  ;;  %v2040_v12 = vpop.f32.mrf.mxu2  ;;  %v2102_v37 = vpop.f32.mrf.mxu1  ;;  %v1911_v8 = vadd.f32 %v1910_v52, %v1818_v14 }
 0x87b   :  { %v4917_v29 = vadd.f32 %v2102_v37, %v2038_v13  ;;  %v2041_v59 = vadd.f32 %v2040_v12, %v1818_v14  ;;  %v1863_v52 = vpop.permute.xlu2 %1862  ;;  %v1843_v37 = vpop.permute.xlu0 %1842 }
 0x881   :  { %v1913_v9 = vpop.f32.mrf.mxu3  ;;  %v1975_v30 = vpop.f32.mrf.mxu0 }
 0x882   :  { %v4919_v55 = vadd.f32 %v1975_v30, %v1911_v8  ;;  %v2043_v61 = vpop.f32.mrf.mxu2  ;;  %v2105_v23 = vpop.f32.mrf.mxu1  ;;  %v1914_v62 = vadd.f32 %v1913_v9, %v1823_v35 }
 0x883   :  { %v4921_v5 = vadd.f32 %v2105_v23, %v2041_v59  ;;  %v2044_v51 = vadd.f32 %v2043_v61, %v1823_v35 }
 0x889   :  { %v1916_v36 = vpop.f32.mrf.mxu3  ;;  %v1978_v19 = vpop.f32.mrf.mxu0 }
 0x88a   :  { %v4925_v56 = vadd.f32 %v1978_v19, %v1914_v62  ;;  %v2046_v6 = vpop.f32.mrf.mxu2  ;;  %v2108_v1 = vpop.f32.mrf.mxu1  ;;  %v1917_v10 = vadd.f32 %v1916_v36, %v1828_v28 }
 0x88b   :  { %v4927_v17 = vadd.f32 %v2108_v1, %v2044_v51  ;;  %v2047_v38 = vadd.f32 %v2046_v6, %v1828_v28  ;;  %v1868_v62 = vpop.permute.xlu1 %1867  ;;  %v1848_v19 = vpop.permute.xlu2 %1847 }
 0x891   :  { %v1919_v50 = vpop.f32.mrf.mxu3  ;;  %v1981_v4 = vpop.f32.mrf.mxu0 }
 0x892   :  { %v4929_v22 = vadd.f32 %v1981_v4, %v1917_v10  ;;  %v2049_v47 = vpop.f32.mrf.mxu2  ;;  %v2111_v57 = vpop.f32.mrf.mxu1  ;;  %v1920_v32 = vadd.f32 %v1919_v50, %v1833_v25 }
 0x893   :  { %v4933_v3 = vadd.f32 %v2111_v57, %v2047_v38  ;;  %v2050_v39 = vadd.f32 %v2049_v47, %v1833_v25 }
 0x899   :  { %v1922_v46 = vpop.f32.mrf.mxu3  ;;  %v1984_v20 = vpop.f32.mrf.mxu0 }
 0x89a   :  { %v4935_v27 = vadd.f32 %v1984_v20, %v1920_v32  ;;  %v2052_v0 = vpop.f32.mrf.mxu2  ;;  %v2114_v16 = vpop.f32.mrf.mxu1  ;;  %v1923_v7 = vadd.f32 %v1922_v46, %v1838_v33 }
 0x89b   :  { %v4939_v48 = vadd.f32 %v2114_v16, %v2050_v39  ;;  %v2053_v60 = vadd.f32 %v2052_v0, %v1838_v33  ;;  %v1853_v39 = vpop.permute.xlu1 %1852 }
 0x8a1   :  { %v1925_v63 = vpop.f32.mrf.mxu3  ;;  %v1987_v21 = vpop.f32.mrf.mxu0 }
 0x8a2   :  { %v4945_v58 = vadd.f32 %v1987_v21, %v1923_v7  ;;  %v2055_v24 = vpop.f32.mrf.mxu2  ;;  %v2117_v40 = vpop.f32.mrf.mxu1  ;;  %v1926_v28 = vadd.f32 %v1925_v63, %v1843_v37 }
 0x8a3   :  { %v4953_v31 = vadd.f32 %v2117_v40, %v2053_v60  ;;  %v2056_v14 = vadd.f32 %v2055_v24, %v1843_v37 }
 0x8a4   :  { %v2170_v13 = vsel %vm4949_vm14, %v4945_v58, 0.0 }
 0x8a5   :  { %v2171_v34 = vsel %vm4955_vm15, %v4953_v31, 0.0 }
 0x8a6   :  { %v4965_v12 = vpack.i.bf16 %v2171_v34, %v2170_v13 }
 0x8a8   :  { %3126 = vrot.lane.b32.xlu2 %v4965_v12, %s3341_s14 }
 0x8a9   :  { %v1928_v8 = vpop.f32.mrf.mxu3  ;;  %v1990_v59 = vpop.f32.mrf.mxu0 }
 0x8aa   :  { %v4969_v9 = vadd.f32 %v1990_v59, %v1926_v28  ;;  %v2058_v30 = vpop.f32.mrf.mxu2  ;;  %v2120_v61 = vpop.f32.mrf.mxu1  ;;  %v1929_v6 = vadd.f32 %v1928_v8, %v1848_v19 }
 0x8ab   :  { %v4971_v23 = vadd.f32 %v2120_v61, %v2056_v14  ;;  %v2059_v1 = vadd.f32 %v2058_v30, %v1848_v19 }
 0x8ac   :  { %v2172_v35 = vsel %vm4949_vm14, %v4969_v9, 0.0 }
 0x8ad   :  { %v2173_v51 = vsel %vm4955_vm15, %v4971_v23, 0.0 }
 0x8ae   :  { %v4979_v36 = vpack.i.bf16 %v2173_v51, %v2172_v35 }
 0x8b0   :  { %3131 = vrot.lane.b32.xlu0 %v4979_v36, %s3341_s14 }
 0x8b1   :  { %v1931_v33 = vpop.f32.mrf.mxu3  ;;  %v1993_v10 = vpop.f32.mrf.mxu0 }
 0x8b2   :  { %v4983_v38 = vadd.f32 %v1993_v10, %v1929_v6  ;;  %v2061_v50 = vpop.f32.mrf.mxu2  ;;  %v2123_v4 = vpop.f32.mrf.mxu1  ;;  %v1932_v46 = vadd.f32 %v1931_v33, %v1853_v39 }
 0x8b3   :  { %v4985_v47 = vadd.f32 %v2123_v4, %v2059_v1  ;;  %v2062_v20 = vadd.f32 %v2061_v50, %v1853_v39 }
 0x8b4   :  { %v2174_v57 = vsel %vm4949_vm14, %v4983_v38, 0.0 }
 0x8b5   :  { %v2175_v25 = vsel %vm4955_vm15, %v4985_v47, 0.0 }
 0x8b6   :  { %v4993_v32 = vpack.i.bf16 %v2175_v25, %v2174_v57 }
 0x8b8   :  { %3136 = vrot.lane.b32.xlu1 %v4993_v32, %s3341_s14 }
 0x8b9   :  { %v1934_v0 = vpop.f32.mrf.mxu3  ;;  %v1996_v16 = vpop.f32.mrf.mxu0 }
 0x8ba   :  { %v4997_v7 = vadd.f32 %v1996_v16, %v1932_v46  ;;  %v2064_v60 = vpop.f32.mrf.mxu2  ;;  %v2126_v63 = vpop.f32.mrf.mxu1  ;;  %v1935_v34 = vadd.f32 %v1934_v0, %v1858_v11 }
 0x8bb   :  { %v4999_v21 = vadd.f32 %v2126_v63, %v2062_v20  ;;  %v2065_v37 = vadd.f32 %v2064_v60, %v1858_v11 }
 0x8bc   :  { %v2176_v24 = vsel %vm4949_vm14, %v4997_v7, 0.0 }
 0x8bd   :  { %v2177_v40 = vsel %vm4955_vm15, %v4999_v21, 0.0 }
 0x8be   :  { %v5007_v13 = vpack.i.bf16 %v2177_v40, %v2176_v24 }
 0x8c0   :  { %3141 = vrot.lane.b32.xlu2 %v5007_v13, %s3341_s14 }
 0x8c1   :  { %v1937_v28 = vpop.f32.mrf.mxu3  ;;  %v1999_v14 = vpop.f32.mrf.mxu0 }
 0x8c2   :  { %v5011_v8 = vadd.f32 %v1999_v14, %v1935_v34  ;;  %v2067_v59 = vpop.f32.mrf.mxu2  ;;  %v2129_v30 = vpop.f32.mrf.mxu1  ;;  %v1938_v6 = vadd.f32 %v1937_v28, %v1863_v52 }
 0x8c3   :  { %v5013_v61 = vadd.f32 %v2129_v30, %v2065_v37  ;;  %v2068_v11 = vadd.f32 %v2067_v59, %v1863_v52 }
 0x8c4   :  { %v2178_v35 = vsel %vm4949_vm14, %v5011_v8, 0.0 }
 0x8c5   :  { %v2179_v51 = vsel %vm4955_vm15, %v5013_v61, 0.0 }
 0x8c6   :  { %v3145_v19 = vpack.i.bf16 %v2179_v51, %v2178_v35 }
 0x8c8   :  { %3146 = vrot.lane.b32.xlu0 %v3145_v19, %s3341_s14 }
 0x8c9   :  { %v1940_v1 = vpop.f32.mrf.mxu3  ;;  %v2002_v33 = vpop.f32.mrf.mxu0 }
 0x8ca   :  { %v5022_v10 = vadd.f32 %v2002_v33, %v1938_v6  ;;  %v2070_v50 = vpop.f32.mrf.mxu2  ;;  %v2132_v4 = vpop.f32.mrf.mxu1  ;;  %v1941_v20 = vadd.f32 %v1940_v1, %v1868_v62 }
 0x8cb   :  { %v5024_v57 = vadd.f32 %v2132_v4, %v2068_v11  ;;  %v2071_v52 = vadd.f32 %v2070_v50, %v1868_v62 }
 0x8cc   :  { %v2180_v25 = vsel %vm4949_vm14, %v5022_v10, 0.0 }
 0x8cd   :  { %v2181_v39 = vsel %vm4955_vm15, %v5024_v57, 0.0 }
 0x8ce   :  { %v3155_v46 = vpack.i.bf16 %v2181_v39, %v2180_v25 }
 0x8d0   :  { %3156 = vrot.lane.b32.xlu1 %v3155_v46, %s3341_s14  ;;  %3151 = vrot.lane.b32.xlu0 %v3145_v19, %s3342_s11 }
 0x8d1   :  { %v1943_v0 = vpop.f32.mrf.mxu3  ;;  %v2005_v16 = vpop.f32.mrf.mxu0 }
 0x8d2   :  { %v5034_v60 = vadd.f32 %v2005_v16, %v1941_v20  ;;  %v2073_v63 = vpop.f32.mrf.mxu2  ;;  %v2135_v24 = vpop.f32.mrf.mxu1  ;;  %v1944_v14 = vadd.f32 %v1943_v0, %v4931_v18 }
 0x8d3   :  { %v5036_v40 = vadd.f32 %v2135_v24, %v2071_v52  ;;  %v2074_v62 = vadd.f32 %v2073_v63, %v4931_v18 }
 0x8d4   :  { %v2182_v34 = vsel %vm4949_vm14, %v5034_v60, 0.0 }
 0x8d5   :  { %v2183_v37 = vsel %vm4955_vm15, %v5036_v40, 0.0 }
 0x8d6   :  { %v3165_v28 = vpack.i.bf16 %v2183_v37, %v2182_v34 }
 0x8d8   :  { %3161 = vrot.lane.b32.xlu1 %v3155_v46, %s3342_s11  ;;  %3166 = vrot.lane.b32.xlu2 %v3165_v28, %s3341_s14 }
 0x8d9   :  { %v1946_v59 = vpop.f32.mrf.mxu3  ;;  %v2008_v30 = vpop.f32.mrf.mxu0 }
 0x8da   :  { %v2009_v35 = vadd.f32 %v2008_v30, %v1944_v14  ;;  %v2076_v51 = vpop.f32.mrf.mxu2  ;;  %v2138_v19 = vpop.f32.mrf.mxu1  ;;  %v1947_v50 = vadd.f32 %v1946_v59, %v4937_v53 }
 0x8db   :  { %v5048_v6 = vadd.f32 %v2138_v19, %v2074_v62  ;;  %v2077_v18 = vadd.f32 %v2076_v51, %v4937_v53 }
 0x8dc   :  { %v2184_v11 = vsel %vm4949_vm14, %v2009_v35, 0.0 }
 0x8dd   :  { %v2185_v1 = vsel %vm4955_vm15, %v5048_v6, 0.0 }
 0x8de   :  { %v3180_v33 = vpack.i.bf16 %v2185_v1, %v2184_v11 }
 0x8e0   :  { %3176 = vrot.lane.b32.xlu1 %v3180_v33, %s3341_s14  ;;  %3181 = vrot.lane.b32.xlu0 %v3180_v33, %s3342_s11 }
 0x8e1   :  { %3171 = vrot.lane.b32.xlu2 %v3165_v28, %s3342_s11  ;;  %v2011_v4 = vpop.f32.mrf.mxu0  ;;  %v1949_v46 = vpop.f32.mrf.mxu3 }
 0x8e2   :  { %v2012_v25 = vadd.f32 %v2011_v4, %v1947_v50  ;;  %v2141_v39 = vpop.f32.mrf.mxu1  ;;  %v2079_v0 = vpop.f32.mrf.mxu2  ;;  %v1950_v24 = vadd.f32 %v1949_v46, %v4947_v42 }
 0x8e3   :  { %v5060_v20 = vadd.f32 %v2141_v39, %v2077_v18  ;;  %v2080_v53 = vadd.f32 %v2079_v0, %v4947_v42  ;;  %v2168_v0 = vsel %vm4949_vm14, %v4935_v27, 0.0 }
 0x8e4   :  { %v2186_v52 = vsel %vm4949_vm14, %v2012_v25, 0.0 }
 0x8e5   :  { %v2187_v16 = vsel %vm4955_vm15, %v5060_v20, 0.0 }
 0x8e6   :  { %v3190_v63 = vpack.i.bf16 %v2187_v16, %v2186_v52  ;;  %v2167_v52 = vsel %vm4955_vm15, %v4933_v3, 0.0  ;;  %v2169_v16 = vsel %vm4955_vm15, %v4939_v48, 0.0 }
 0x8e8   :  { %3191 = vrot.lane.b32.xlu1 %v3190_v63, %s3342_s11  ;;  %3186 = vrot.lane.b32.xlu0 %v3190_v63, %s3341_s14  ;;  %v3210_v63 = vpack.i.bf16 %v2169_v16, %v2168_v0 }
 0x8e9   :  { %v2014_v34 = vpop.f32.mrf.mxu0  ;;  %v1952_v59 = vpop.f32.mrf.mxu3 }
 0x8ea   :  { %v2015_v37 = vadd.f32 %v2014_v34, %v1950_v24  ;;  %v2144_v28 = vpop.f32.mrf.mxu1  ;;  %v2082_v51 = vpop.f32.mrf.mxu2  ;;  %v1953_v11 = vadd.f32 %v1952_v59, %v4923_v2 }
 0x8eb   :  { %v5071_v14 = vadd.f32 %v2144_v28, %v2080_v53  ;;  %v2083_v42 = vadd.f32 %v2082_v51, %v4923_v2  ;;  %v2166_v2 = vsel %vm4949_vm14, %v4929_v22, 0.0 }
 0x8ec   :  { %v2188_v62 = vsel %vm4949_vm14, %v2015_v37, 0.0 }
 0x8ed   :  { %v2189_v30 = vsel %vm4955_vm15, %v5071_v14, 0.0 }
 0x8ee   :  { %v3195_v19 = vpack.i.bf16 %v2189_v30, %v2188_v62 }
 0x8f0   :  { %3196 = vrot.lane.b32.xlu2 %v3195_v19, %s3341_s14 }
 0x8f1   :  { %v2017_v1 = vpop.f32.mrf.mxu0 }
 0x8f2   :  { %v2018_v33 = vadd.f32 %v2017_v1, %v1953_v11  ;;  %v2147_v50 = vpop.f32.mrf.mxu1 }
 0x8f3   :  { %v5081_v18 = vadd.f32 %v2147_v50, %v2083_v42 }
 0x8f4   :  { %v2190_v4 = vsel %vm4949_vm14, %v2018_v33, 0.0  ;;  %2740 = vmatpush.msk.msra.mxu3 %vm4949_vm14, %v2018_v33 }
 0x8f5   :  { %v2191_v39 = vsel %vm4955_vm15, %v5081_v18, 0.0 }
 0x8f6   :  { %v3220_v46 = vpack.i.bf16 %v2191_v39, %v2190_v4  ;;  %2741 = vmatpush.msk.msra.mxu3 %vm4949_vm14, %v2015_v37 }
 0x8f8   :  { %3206 = vrot.lane.b32.xlu1 %v3220_v46, %s3341_s14  ;;  %3221 = vrot.lane.b32.xlu0 %v3220_v46, %s3342_s11 }
 0x8f9   :  { %3201 = vrot.lane.b32.xlu2 %v3195_v19, %s3342_s11  ;;  %2742 = vmatpush.msk.msra.mxu3 %vm4949_vm14, %v2012_v25  ;;  %v3225_v25 = vpack.i.bf16 %v2167_v52, %v2166_v2 }
 0x8fb   :  { %2743 = vmatpush.msk.msra.mxu3 %vm4949_vm14, %v2009_v35 }
 0x8fd   :  { %2744 = vmatpush.msk.msra.mxu3 %vm4949_vm14, %v5034_v60  ;;  %v2164_v60 = vsel %vm4949_vm14, %v4925_v56, 0.0 }
 0x8ff   :  { %2745 = vmatpush.msk.msra.mxu3 %vm4949_vm14, %v5022_v10  ;;  %v2165_v10 = vsel %vm4955_vm15, %v4927_v17, 0.0 }
 0x900   :  { %3211 = vrot.lane.b32.xlu1 %v3210_v63, %s3341_s14  ;;  %3226 = vrot.lane.b32.xlu0 %v3225_v25, %s3341_s14 }
 0x901   :  { %3216 = vrot.lane.b32.xlu2 %v5007_v13, %s3342_s11  ;;  %2746 = vmatpush.msk.msra.mxu3 %vm4949_vm14, %v5011_v8  ;;  %v3235_v13 = vpack.i.bf16 %v2165_v10, %v2164_v60 }
 0x903   :  { %2747 = vmatpush.msk.msra.mxu3 %vm4949_vm14, %v4997_v7 }
 0x905   :  { %2748 = vmatpush.msk.msra.mxu3 %vm4949_vm14, %v4983_v38  ;;  %v2160_v38 = vsel %vm4949_vm14, %v4915_v15, 0.0 }
 0x907   :  { %2749 = vmatpush.msk.msra.mxu3 %vm4949_vm14, %v4969_v9  ;;  %v2161_v9 = vsel %vm4955_vm15, %v4917_v29, 0.0 }
 0x908   :  { %3231 = vrot.lane.b32.xlu1 %v4993_v32, %s3342_s11  ;;  %3241 = vrot.lane.b32.xlu0 %v4979_v36, %s3342_s11  ;;  %v2162_v32 = vsel %vm4949_vm14, %v4919_v55, 0.0  ;;  %v2163_v36 = vsel %vm4955_vm15, %v4921_v5, 0.0  ;;  %v3255_v7 = vpack.i.bf16 %v2161_v9, %v2160_v38 }
 0x909   :  { %3236 = vrot.lane.b32.xlu2 %v3235_v13, %s3341_s14  ;;  %2750 = vmatpush.msk.msra.mxu3 %vm4949_vm14, %v4945_v58  ;;  %v5168_v58 = vld [vmem:[%s5435_s13] sm:$0x7]  ;;  %v3245_v8 = vpack.i.bf16 %v2163_v36, %v2162_v32  ;;  %s3346_s13 = smov [#allocation6]  }
 0x90b   :  { %2751 = vmatpush.msk.msra.mxu3 %vm4949_vm14, %v4935_v27  ;;  %v2489_v27 = vperm.slane %v5168_v58, 0 }
 0x90d   :  { %2752 = vmatpush.msk.msra.mxu3 %vm4949_vm14, %v4929_v22 }
 0x90f   :  { %2753 = vmatpush.msk.msra.mxu3 %vm4949_vm14, %v4925_v56  ;;  %v2481_v56 = vld [vmem:[#allocation2] sm:$0x1] }
 0x910   :  { %3246 = vrot.lane.b32.xlu1 %v3245_v8, %s3341_s14  ;;  %3256 = vrot.lane.b32.xlu0 %v3255_v7, %s3341_s14  ;;  %s2638_s14 = sshll.u32 %s3346_s13, 4  ;;  %s2639_s14 = int_to_ptr.vmem [resolvable:$true] %s2638_s14 }
 0x911   :  { %3251 = vrot.lane.b32.xlu2 %v4965_v12, %s3342_s11  ;;  %2754 = vmatpush.msk.msra.mxu3 %vm4949_vm14, %v4919_v55  ;;  %v5191_v55 = vpop.permute.xlu2 %3126 }
 0x913   :  { %2755 = vmatpush.msk.msra.mxu3 %vm4949_vm14, %v4915_v15 }
 0x914   :  { %2511 = vmatmul.f32.vlgmr.msra.gmra.mxu3 %v2489_v27 }
 0x918   :  { %3261 = vrot.lane.b32.xlu1 %v3210_v63, %s3342_s11  ;;  %3271 = vrot.lane.b32.xlu0 %v3235_v13, %s3342_s11 }
 0x919   :  { %3266 = vrot.lane.b32.xlu2 %v3225_v25, %s3342_s11 }
 0x91a   :  { %v5193_v22 = vpop.permute.xlu2 %3141 }
 0x91b   :  { %v3144_v32 = vunpack.i.h.bf16 %v5193_v22  ;;  %v3143_v36 = vunpack.i.l.bf16 %v5193_v22 }
 0x920   :  { %3276 = vrot.lane.b32.xlu1 %v3245_v8, %s3342_s11  ;;  %2484 = vperm.xlu0 %2782, %v2481_v56  }
 0x921   :  { %3281 = vrot.lane.b32.xlu2 %v3255_v7, %s3342_s11 }
 0x922   :  { %v5197_v54 = vpop.permute.xlu0 %3131 }
 0x92a   :  { %v5195_v15 = vpop.permute.xlu1 %3136 }
 0x932   :  { %v5199_v12 = vpop.permute.xlu2 %3166 }
 0x93a   :  { %v5203_v24 = vpop.permute.xlu0 %3146 }
 0x93b   :  { %v5205_v53 = vpop.permute.xlu2 %3171 }
 0x942   :  { %v5201_v35 = vpop.permute.xlu1 %3156  ;;  %v5209_v37 = vpop.permute.xlu0 %3151 }
 0x94a   :  { %v5207_v34 = vpop.permute.xlu1 %3161  ;;  %v3197_v28 = vpop.permute.xlu2 %3196 }
 0x94b   :  { %v3199_v42 = vunpack.i.h.bf16 %v3197_v28  ;;  %v3198_v1 = vunpack.i.l.bf16 %v3197_v28 }
 0x94d   :  { %v2316_v8 = vsel %vm90_vm1, %v3198_v1, %v3199_v42  ;;  %v2317_v1 = vsel %vm90_vm1, %v3199_v42, %v3684_v45 }
 0x952   :  { %v5211_v62 = vpop.permute.xlu1 %3176  ;;  %v5213_v59 = vpop.permute.xlu0 %3181 }
 0x953   :  { %v3202_v30 = vpop.permute.xlu2 %3201  ;;  %v3179_v7 = vunpack.i.h.bf16 %v5211_v62  ;;  %v3178_v56 = vunpack.i.l.bf16 %v5211_v62  ;;  %v3184_v28 = vunpack.i.h.bf16 %v5213_v59 }
 0x954   :  { %v3204_v33 = vunpack.i.h.bf16 %v3202_v30  ;;  %v3203_v50 = vunpack.i.l.bf16 %v3202_v30  ;;  %v3183_v30 = vunpack.i.l.bf16 %v5213_v59  ;;  %v3174_v59 = vunpack.i.h.bf16 %v5205_v53 }
 0x956   :  { %v2445_v62 = vsel %vm104_vm0, %v3204_v33, %v3682_v41 }
 0x95a   :  { %v3192_v51 = vpop.permute.xlu1 %3191  ;;  %v3187_v19 = vpop.permute.xlu0 %3186 }
 0x95b   :  { %v5215_v11 = vpop.permute.xlu2 %3216  ;;  %v3194_v16 = vunpack.i.h.bf16 %v3192_v51  ;;  %v3193_v25 = vunpack.i.l.bf16 %v3192_v51  ;;  %v3189_v63 = vunpack.i.h.bf16 %v3187_v19  ;;  %v3188_v60 = vunpack.i.l.bf16 %v3187_v19 }
 0x95c   :  { %v2444_v19 = vsel %vm104_vm0, %v3203_v50, %v3204_v33 }
 0x95d   :  { %v2314_v50 = vsel %vm90_vm1, %v3188_v60, %v3189_v63  ;;  %v2315_v42 = vsel %vm90_vm1, %v3189_v63, %v3684_v45  ;;  %v2443_v33 = vsel %vm104_vm0, %v3194_v16, %v3682_v41  ;;  %v3164_v60 = vunpack.i.h.bf16 %v5207_v34 }
 0x95e   :  { %v3149_v63 = vunpack.i.h.bf16 %v5203_v24 }
 0x963   :  { %v5230_v51 = vpop.permute.xlu2 %3236 }
 0x96a   :  { %v3207_v4 = vpop.permute.xlu1 %3206  ;;  %v3222_v39 = vpop.permute.xlu0 %3221 }
 0x96b   :  { %v3209_v46 = vunpack.i.h.bf16 %v3207_v4  ;;  %v3208_v2 = vunpack.i.l.bf16 %v3207_v4  ;;  %v3224_v52 = vunpack.i.h.bf16 %v3222_v39  ;;  %v3223_v0 = vunpack.i.l.bf16 %v3222_v39 }
 0x96c   :  { %v3169_v4 = vunpack.i.h.bf16 %v5199_v12  ;;  %v3168_v39 = vunpack.i.l.bf16 %v5199_v12  ;;  %v3159_v12 = vunpack.i.h.bf16 %v5201_v35 }
 0x96d   :  { %v2318_v10 = vsel %vm90_vm1, %v3208_v2, %v3209_v46  ;;  %v2446_v13 = vsel %vm104_vm0, %v3223_v0, %v3224_v52  ;;  %v2319_v38 = vsel %vm90_vm1, %v3209_v46, %v3684_v45  ;;  %v2447_v9 = vsel %vm104_vm0, %v3224_v52, %v3682_v41 }
 0x96e   :  { %2515 = vmatpush.msra.mxu0 %v2318_v10  ;;  %2535 = vmatpush.msrb.mxu3 %v2446_v13  ;;  %v3173_v46 = vunpack.i.l.bf16 %v5205_v53  ;;  %v2442_v2 = vsel %vm104_vm0, %v3193_v25, %v3194_v16  ;;  %v3158_v52 = vunpack.i.l.bf16 %v5201_v35  ;;  %v3163_v25 = vunpack.i.l.bf16 %v5207_v34 }
 0x96f   :  { %2575 = vmatpush.msra.mxu2 %v2319_v38  ;;  %2595 = vmatpush.msra.mxu1 %v2447_v9  ;;  %v2312_v35 = vsel %vm90_vm1, %v3178_v56, %v3179_v7  ;;  %v2440_v10 = vsel %vm104_vm0, %v3183_v30, %v3184_v28  ;;  %v2313_v16 = vsel %vm90_vm1, %v3179_v7, %v3684_v45  ;;  %v3148_v34 = vunpack.i.l.bf16 %v5203_v24 }
 0x970   :  { %2516 = vmatpush.msra.mxu0 %v2316_v8  ;;  %2536 = vmatpush.msrb.mxu3 %v2444_v19  ;;  %v2441_v13 = vsel %vm104_vm0, %v3184_v28, %v3682_v41  ;;  %v2310_v38 = vsel %vm90_vm1, %v3168_v39, %v3169_v4  ;;  %v3154_v9 = vunpack.i.h.bf16 %v5209_v37  ;;  %v3153_v8 = vunpack.i.l.bf16 %v5209_v37 }
 0x971   :  { %2576 = vmatpush.msra.mxu2 %v2317_v1  ;;  %2596 = vmatpush.msra.mxu1 %v2445_v62  ;;  %v2438_v56 = vsel %vm104_vm0, %v3173_v46, %v3174_v59  ;;  %v3219_v30 = vunpack.i.h.bf16 %v5215_v11  ;;  %v3218_v19 = vunpack.i.l.bf16 %v5215_v11  ;;  %v2311_v7 = vsel %vm90_vm1, %v3169_v4, %v3684_v45  ;;  %v3252_v46 = vpop.permute.xlu2 %3251 }
 0x972   :  { %2517 = vmatpush.msra.mxu0 %v2314_v50  ;;  %v5249_v0 = vpop.permute.xlu1 %3211  ;;  %v5251_v53 = vpop.permute.xlu0 %3226  ;;  %2537 = vmatpush.msrb.mxu3 %v2442_v2  ;;  %v2439_v24 = vsel %vm104_vm0, %v3174_v59, %v3682_v41  ;;  %v3129_v28 = vunpack.i.h.bf16 %v5191_v55  ;;  %v2308_v37 = vsel %vm90_vm1, %v3158_v52, %v3159_v12  ;;  %v2436_v39 = vsel %vm104_vm0, %v3163_v25, %v3164_v60 }
 0x973   :  { %2577 = vmatpush.msra.mxu2 %v2315_v42  ;;  %2597 = vmatpush.msra.mxu1 %v2443_v33  ;;  %v3139_v1 = vunpack.i.h.bf16 %v5195_v15  ;;  %v3138_v11 = vunpack.i.l.bf16 %v5195_v15  ;;  %v2309_v4 = vsel %vm90_vm1, %v3159_v12, %v3684_v45  ;;  %v2437_v62 = vsel %vm104_vm0, %v3164_v60, %v3682_v41 }
 0x974   :  { %2518 = vmatpush.msra.mxu0 %v2312_v35  ;;  %2538 = vmatpush.msrb.mxu3 %v2440_v10  ;;  %v3134_v59 = vunpack.i.h.bf16 %v5197_v54  ;;  %v2306_v50 = vsel %vm90_vm1, %v3148_v34, %v3149_v63  ;;  %v2434_v2 = vsel %vm104_vm0, %v3153_v8, %v3154_v9  ;;  %v2304_v15 = vsel %vm90_vm1, %v3143_v36, %v3144_v32 }
 0x975   :  { %2578 = vmatpush.msra.mxu2 %v2313_v16  ;;  %2598 = vmatpush.msra.mxu1 %v2441_v13  ;;  %v3133_v12 = vunpack.i.l.bf16 %v5197_v54  ;;  %v2307_v52 = vsel %vm90_vm1, %v3149_v63, %v3684_v45  ;;  %v2435_v42 = vsel %vm104_vm0, %v3154_v9, %v3682_v41  ;;  %v2432_v25 = vsel %vm104_vm0, %v3218_v19, %v3219_v30 }
 0x976   :  { %2519 = vmatpush.msra.mxu0 %v2310_v38  ;;  %2539 = vmatpush.msrb.mxu3 %v2438_v56  ;;  %v3128_v54 = vunpack.i.l.bf16 %v5191_v55  ;;  %v2305_v63 = vsel %vm90_vm1, %v3144_v32, %v3684_v45  ;;  %v2433_v13 = vsel %vm104_vm0, %v3219_v30, %v3682_v41  ;;  %v2302_v38 = vsel %vm90_vm1, %v3138_v11, %v3139_v1 }
 0x977   :  { %2579 = vmatpush.msra.mxu2 %v2311_v7  ;;  %2599 = vmatpush.msra.mxu1 %v2439_v24  ;;  %v3254_v34 = vunpack.i.h.bf16 %v3252_v46  ;;  %v3253_v9 = vunpack.i.l.bf16 %v3252_v46  ;;  %v2303_v22 = vsel %vm90_vm1, %v3139_v1, %v3684_v45  ;;  %v3214_v32 = vunpack.i.h.bf16 %v5249_v0 }
 0x978   :  { %2520 = vmatpush.msra.mxu0 %v2308_v37  ;;  %2540 = vmatpush.msrb.mxu3 %v2436_v39  ;;  %v3213_v30 = vunpack.i.l.bf16 %v5249_v0  ;;  %v2300_v19 = vsel %vm90_vm1, %v3133_v12, %v3134_v59  ;;  %v2301_v24 = vsel %vm90_vm1, %v3134_v59, %v3684_v45  ;;  %v3229_v39 = vunpack.i.h.bf16 %v5251_v53 }
 0x979   :  { %2580 = vmatpush.msra.mxu2 %v2309_v4  ;;  %2600 = vmatpush.msra.mxu1 %v2437_v62  ;;  %v3228_v1 = vunpack.i.l.bf16 %v5251_v53  ;;  %v2298_v0 = vsel %vm90_vm1, %v3128_v54, %v3129_v28  ;;  %v2426_v11 = vsel %vm104_vm0, %v3253_v9, %v3254_v34  ;;  %v2299_v4 = vsel %vm90_vm1, %v3129_v28, %v3684_v45 }
 0x97a   :  { %2521 = vmatpush.msra.mxu0 %v2306_v50  ;;  %v3232_v33 = vpop.permute.xlu1 %3231  ;;  %v3242_v60 = vpop.permute.xlu0 %3241  ;;  %2541 = vmatpush.msrb.mxu3 %v2434_v2  ;;  %v2427_v62 = vsel %vm104_vm0, %v3254_v34, %v3682_v41  ;;  %v3239_v46 = vunpack.i.h.bf16 %v5230_v51  ;;  %v3238_v50 = vunpack.i.l.bf16 %v5230_v51  ;;  %v2296_v2 = vsel %vm90_vm1, %v3213_v30, %v3214_v32 }
 0x97b   :  { %2581 = vmatpush.msra.mxu2 %v2307_v52  ;;  %2601 = vmatpush.msra.mxu1 %v2435_v42  ;;  %v3234_v35 = vunpack.i.h.bf16 %v3232_v33  ;;  %v3233_v10 = vunpack.i.l.bf16 %v3232_v33  ;;  %v3244_v16 = vunpack.i.h.bf16 %v3242_v60  ;;  %v3243_v36 = vunpack.i.l.bf16 %v3242_v60  ;;  %v3267_v52 = vpop.permute.xlu2 %3266 }
 0x97c   :  { %2522 = vmatpush.msra.mxu0 %v2304_v15  ;;  %2542 = vmatpush.msrb.mxu3 %v2432_v25  ;;  %v2297_v55 = vsel %vm90_vm1, %v3214_v32, %v3684_v45  ;;  %v2294_v12 = vsel %vm90_vm1, %v3228_v1, %v3229_v39  ;;  %v2295_v42 = vsel %vm90_vm1, %v3229_v39, %v3684_v45 }
 0x97d   :  { %2582 = vmatpush.msra.mxu2 %v2305_v63  ;;  %2602 = vmatpush.msra.mxu1 %v2433_v13  ;;  %v2430_v8 = vsel %vm104_vm0, %v3233_v10, %v3234_v35  ;;  %v2431_v56 = vsel %vm104_vm0, %v3234_v35, %v3682_v41  ;;  %v2428_v7 = vsel %vm104_vm0, %v3243_v36, %v3244_v16  ;;  %v2490_v10 = vperm.slane %v5168_v58, 1 }
 0x97e   :  { %2523 = vmatpush.msra.mxu0 %v2302_v38  ;;  %2543 = vmatpush.msrb.mxu3 %v2430_v8  ;;  %v2429_v37 = vsel %vm104_vm0, %v3244_v16, %v3682_v41  ;;  %v2292_v60 = vsel %vm90_vm1, %v3238_v50, %v3239_v46  ;;  %v2293_v25 = vsel %vm90_vm1, %v3239_v46, %v3684_v45  ;;  %v3269_v16 = vunpack.i.h.bf16 %v3267_v52 }
 0x97f   :  { %2583 = vmatpush.msra.mxu2 %v2303_v22  ;;  %2603 = vmatpush.msra.mxu1 %v2431_v56  ;;  %v3268_v13 = vunpack.i.l.bf16 %v3267_v52 }
 0x980   :  { %2524 = vmatpush.msra.mxu0 %v2300_v19  ;;  %2544 = vmatpush.msrb.mxu3 %v2428_v7 }
 0x981   :  { %2584 = vmatpush.msra.mxu2 %v2301_v24  ;;  %2604 = vmatpush.msra.mxu1 %v2429_v37  ;;  %v2422_v19 = vsel %vm104_vm0, %v3268_v13, %v3269_v16 }
 0x982   :  { %2525 = vmatpush.msra.mxu0 %v2298_v0  ;;  %v3247_v59 = vpop.permute.xlu1 %3246  ;;  %2545 = vmatpush.msrb.mxu3 %v2426_v11  ;;  %v3257_v53 = vpop.permute.xlu0 %3256 }
 0x983   :  { %2585 = vmatpush.msra.mxu2 %v2299_v4  ;;  %2605 = vmatpush.msra.mxu1 %v2427_v62  ;;  %v3249_v15 = vunpack.i.h.bf16 %v3247_v59  ;;  %v3248_v28 = vunpack.i.l.bf16 %v3247_v59  ;;  %v3259_v33 = vunpack.i.h.bf16 %v3257_v53  ;;  %v3258_v51 = vunpack.i.l.bf16 %v3257_v53  ;;  %v3282_v7 = vpop.permute.xlu2 %3281 }
 0x984   :  { %2526 = vmatpush.msra.mxu0 %v2296_v2  ;;  %v3284_v39 = vunpack.i.h.bf16 %v3282_v7  ;;  %v3283_v1 = vunpack.i.l.bf16 %v3282_v7 }
 0x985   :  { %2586 = vmatpush.msra.mxu2 %v2297_v55  ;;  %v2290_v35 = vsel %vm90_vm1, %v3248_v28, %v3249_v15  ;;  %v2291_v54 = vsel %vm90_vm1, %v3249_v15, %v3684_v45  ;;  %v2288_v9 = vsel %vm90_vm1, %v3258_v51, %v3259_v33  ;;  %v2289_v8 = vsel %vm90_vm1, %v3259_v33, %v3684_v45 }
 0x986   :  { %2527 = vmatpush.msra.mxu0 %v2294_v12  ;;  %v2423_v45 = vsel %vm104_vm0, %v3269_v16, %v3682_v41  ;;  %v2416_v62 = vsel %vm104_vm0, %v3283_v1, %v3284_v39  ;;  %vm2618_vm1 = vcmp.lt.s32.totalorder %v3528_v49, 65 }
 0x987   :  { %2587 = vmatpush.msra.mxu2 %v2295_v42 }
 0x988   :  { %2528 = vmatpush.msra.mxu0 %v2292_v60 }
 0x989   :  { %2588 = vmatpush.msra.mxu2 %v2293_v25 }
 0x98a   :  { %v3262_v36 = vpop.permute.xlu1 %3261  ;;  %2529 = vmatpush.msra.mxu0 %v2290_v35  ;;  %v3272_v63 = vpop.permute.xlu0 %3271 }
 0x98b   :  { %v3264_v38 = vunpack.i.h.bf16 %v3262_v36  ;;  %v3263_v34 = vunpack.i.l.bf16 %v3262_v36  ;;  %2589 = vmatpush.msra.mxu2 %v2291_v54  ;;  %v3274_v56 = vunpack.i.h.bf16 %v3272_v63  ;;  %v3273_v22 = vunpack.i.l.bf16 %v3272_v63 }
 0x98c   :  { %2530 = vmatpush.msra.mxu0 %v2288_v9 }
 0x98d   :  { %2590 = vmatpush.msra.mxu2 %v2289_v8  ;;  %2531 = vmatmul.f32.vlgmr.msra.gmra.mxu0 %v2490_v10  ;;  %v2424_v32 = vsel %vm104_vm0, %v3263_v34, %v3264_v38  ;;  %v2425_v30 = vsel %vm104_vm0, %v3264_v38, %v3682_v41  ;;  %v2420_v24 = vsel %vm104_vm0, %v3273_v22, %v3274_v56 }
 0x98e   :  { %2756 = vmatpush.msk.msrb.mxu0 %vm4955_vm15, %v5081_v18  ;;  %2546 = vmatpush.msrb.mxu3 %v2424_v32  ;;  %v2421_v37 = vsel %vm104_vm0, %v3274_v56, %v3682_v41 }
 0x98f   :  { %2606 = vmatpush.msra.mxu1 %v2425_v30  ;;  %2591 = vmatmul.f32.vlgmr.msra.gmra.mxu2 %v2490_v10 }
 0x990   :  { %2757 = vmatpush.msk.msrb.mxu0 %vm4955_vm15, %v5071_v14  ;;  %2547 = vmatpush.msrb.mxu3 %v2422_v19 }
 0x991   :  { %2607 = vmatpush.msra.mxu1 %v2423_v45 }
 0x992   :  { %2758 = vmatpush.msk.msrb.mxu0 %vm4955_vm15, %v5060_v20  ;;  %v3277_v18 = vpop.permute.xlu1 %3276  ;;  %2548 = vmatpush.msrb.mxu3 %v2420_v24  ;;  %v2491_v20 = vperm.slane %v5168_v58, 2 }
 0x993   :  { %v3279_v0 = vunpack.i.h.bf16 %v3277_v18  ;;  %v3278_v14 = vunpack.i.l.bf16 %v3277_v18  ;;  %2608 = vmatpush.msra.mxu1 %v2421_v37 }
 0x994   :  { %2759 = vmatpush.msk.msrb.mxu0 %vm4955_vm15, %v5048_v6  ;;  %v2417_v6 = vsel %vm104_vm0, %v3284_v39, %v3682_v41 }
 0x995   :  { %v2418_v11 = vsel %vm104_vm0, %v3278_v14, %v3279_v0  ;;  %v2419_v4 = vsel %vm104_vm0, %v3279_v0, %v3682_v41  ;;  %vm2616_vm0 = vcmp.ge.s32.totalorder %v3528_v49, 1 }
 0x996   :  { %2760 = vmatpush.msk.msrb.mxu0 %vm4955_vm15, %v5036_v40  ;;  %2549 = vmatpush.msrb.mxu3 %v2418_v11  ;;  %vm2620_vm5 = vmand %vm2616_vm0, %vm2618_vm1 }
 0x997   :  { %2609 = vmatpush.msra.mxu1 %v2419_v4 }
 0x998   :  { %2761 = vmatpush.msk.msrb.mxu0 %vm4955_vm15, %v5024_v57  ;;  %2550 = vmatpush.msrb.mxu3 %v2416_v62 }
 0x999   :  { %2610 = vmatpush.msra.mxu1 %v2417_v6  ;;  %2551 = vmatmul.f32.vlgmr.msrb.gmra.mxu3 %v2491_v20 }
 0x99a   :  { %2762 = vmatpush.msk.msrb.mxu0 %vm4955_vm15, %v5013_v61  ;;  %2611 = vmatmul.f32.vlgmr.msra.gmra.mxu1 %v2491_v20 }
 0x99c   :  { %2763 = vmatpush.msk.msrb.mxu0 %vm4955_vm15, %v4999_v21 }
 0x99e   :  { %2764 = vmatpush.msk.msrb.mxu0 %vm4955_vm15, %v4985_v47 }
 0x9a0   :  { %2765 = vmatpush.msk.msrb.mxu0 %vm4955_vm15, %v4971_v23 }
 0x9a2   :  { %2766 = vmatpush.msk.msrb.mxu0 %vm4955_vm15, %v4953_v31  ;;  %v2485_v31 = vpop.permute.xlu0 %2484 }
 0x9a3   :  { %v2487_v23 = vperm.slane %v2485_v31, 0 }
 0x9a4   :  { %2767 = vmatpush.msk.msrb.mxu0 %vm4955_vm15, %v4939_v48  ;;  %v2512_v48 = vpop.f32.mrf.mxu3 }
 0x9a5   :  { %v2513_v21 = vadd.f32 %v2512_v48, %v2487_v23 }
 0x9a6   :  { %2768 = vmatpush.msk.msrb.mxu0 %vm4955_vm15, %v4933_v3 }
 0x9a8   :  { %2769 = vmatpush.msk.msrb.mxu0 %vm4955_vm15, %v4927_v17 }
 0x9aa   :  { %2770 = vmatpush.msk.msrb.mxu0 %vm4955_vm15, %v4921_v5 }
 0x9ac   :  { %2771 = vmatpush.msk.msrb.mxu0 %vm4955_vm15, %v4917_v29 }
 0x9ad   :  { %2571 = vmatmul.f32.vlgmr.msrb.gmra.mxu0 %v2489_v27 }
 0xa0a   :  { %v2532_v41 = vpop.f32.mrf.mxu0 }
 0xa0b   :  { %v2533_v57 = vadd.f32 %v2532_v41, %v2513_v21 }
 0xa12   :  { %v2592_v47 = vpop.f32.mrf.mxu2 }
 0xa17   :  { %v2612_v17 = vpop.f32.mrf.mxu1 }
 0xa1c   :  { %v2552_v5 = vpop.f32.mrf.mxu3 }
 0xa1d   :  { %v2553_v26 = vadd.f32 %v2552_v5, %v2533_v57 }
 0xa1f   :  { %v2621_v27 = vsel %vm2619_vm6, %v2553_v26, 0.0 }
 0xa2a   :  { %v2572_v3 = vpop.f32.mrf.mxu0 }
 0xa2b   :  { %v2573_v61 = vadd.f32 %v2572_v3, %v2487_v23 }
 0xa2d   :  { %v2593_v29 = vadd.f32 %v2592_v47, %v2573_v61 }
 0xa2f   :  { %v2613_v40 = vadd.f32 %v2612_v17, %v2593_v29 }
 0xa31   :  { %v2622_v58 = vsel %vm2620_vm5, %v2613_v40, 0.0 }
 0xa32   :  { %v2625_v49 = vrot.slane %v2622_v58, 7 }
 0xa34   :  { %v2626_v44 = vsel %vm109_vm2, %v2621_v27, %v2625_v49 }
 0xa35   :  { %2632 = vst.msk [vmem:[#allocation6] sm:$0x3] %vm2630_vm7, %v2626_v44 }
 0xa36   :  { %2643 = dma.vmem_to_hbm [thread:$0]  %s2639_s14, 32, %s2641_s1, [#allocation5]  }
 0xa37   :  { %3335 = dma.done.wait [#allocation5], 32  }
 0xa38   :  { %3336 = vsyncadd [#allocation5], 4294967264 }
 0xa39   :  { %2648 = vsyncpa [#allocation4], 1 }
 0xa3a   :  { %2649 = vsyncpa [#allocation5], 1 }

</bundles_post_ra>
